<compile_context>
chip_gen: v7x
topology: tpu7x:2x2x1
jax: 0.10.0
libtpu: 0.0.40
codegen_flags: <defaults>
</compile_context>

<pallas_src>
import jax
import jax.numpy as jnp
from jax import lax
from jax.experimental import pallas as pl
from jax.experimental.pallas import tpu as pltpu

# ---------------- small, forward-consistent config ----------------
BATCH = 2
IN_CH = 3
IMG = 32
PATCH = 16
EMBED_DIM = 64            # cfg.embed_dim (small synthetic value)
NUM_HEADS = 4
HEAD_DIM = EMBED_DIM // NUM_HEADS      # 16
DEPTH = 2                 # small synthetic trunk depth
MLP_RATIO = 2
MLP_DIM = MLP_RATIO * EMBED_DIM        # 128 (already lane dense)
PROJ_HIDDEN = 64
PROJ_OUT = 32
N_PATCHES = (IMG // PATCH) ** 2        # 4
SEQ_LEN = N_PATCHES + 1                # 5 = CLS + patches
L_PAD = 8                              # token axis padded to a full sublane group
PATCH_DIM = IN_CH * PATCH * PATCH      # 768
B2 = 2 * BATCH                         # Siamese pair folded into one batch
D_PAD = 128                            # lane-dense residual width (zero padded)
HEAD_SPREAD = D_PAD // NUM_HEADS       # 32 lanes per head (16 real + 16 zero)
PROJ_PAD = 128                         # lane-dense projector width
LN_EPS = 1e-6
NEG_INF = -1e30


# ---------------- in-kernel helpers ----------------
def _layernorm(x, g, b):
    """LayerNorm over the real EMBED_DIM columns; lane-pad columns of x are zero
    and gamma/beta pads are zero, so statistics use sum/EMBED_DIM and pads stay 0."""
    s1 = jnp.sum(x, axis=-1, keepdims=True)
    s2 = jnp.sum(x * x, axis=-1, keepdims=True)
    mu = s1 * (1.0 / EMBED_DIM)
    var = s2 * (1.0 / EMBED_DIM) - mu * mu
    return (x - mu) * lax.rsqrt(var + LN_EPS) * g + b


# ---------------- single fused kernel: encoder + projector ----------------
def _fused_kernel(patches_ref, addend_ref, pe_w_ref, ln_ref,
                  qkv_w_ref, qkv_b_ref, proj_w_ref, proj_b_ref,
                  fc1_w_ref, fc1_b_ref, fc2_w_ref, fc2_b_ref, lnf_ref,
                  p1_w_ref, p1_b_ref, p2_w_ref, p2_b_ref, z_ref):
    scale = 1.0 / float(HEAD_DIM) ** 0.5

    # key-padding bias (pad key columns -> -inf before softmax), hoisted once
    col = lax.broadcasted_iota(jnp.int32, (1, L_PAD), 1)
    key_bias = jnp.where(col < SEQ_LEN, 0.0, NEG_INF).astype(jnp.float32)

    # ---- patch embedding + (CLS + pos + patch-bias) additive slab ----
    # slab assembly was done in the wrapper; the kernel prologue is one matmul + add
    x = jnp.dot(patches_ref[...], pe_w_ref[...],
                preferred_element_type=jnp.float32) + addend_ref[...]   # (B2*L_PAD, D_PAD)

    # ---- transformer blocks (statically unrolled; residual stream lives in vregs) ----
    for blk in range(DEPTH):
        lnw = ln_ref[blk]                              # (4, D_PAD)
        g1, b1 = lnw[0:1, :], lnw[1:2, :]
        g2, b2 = lnw[2:3, :], lnw[3:4, :]

        # --- attention sub-block (pre-LN) ---
        h = _layernorm(x, g1, b1)
        qkv = jnp.dot(h, qkv_w_ref[blk],
                      preferred_element_type=jnp.float32) + qkv_b_ref[blk]  # (B2*L_PAD, 3*D_PAD)

        # scores for all (batch, head) pairs stacked along sublanes -> ONE softmax
        s_tiles = []
        for b in range(B2):
            r = b * L_PAD
            for hh in range(NUM_HEADS):
                c = hh * HEAD_SPREAD                   # 32-lane-aligned head slice
                qh = qkv[r:r + L_PAD, c:c + HEAD_SPREAD]
                kh = qkv[r:r + L_PAD, D_PAD + c:D_PAD + c + HEAD_SPREAD]
                # q @ k^T without an explicit transpose (zero pad lanes contribute 0)
                s_tiles.append(lax.dot_general(
                    qh, kh, (((1,), (1,)), ((), ())),
                    preferred_element_type=jnp.float32) * scale)
        s = jnp.concatenate(s_tiles, axis=0) + key_bias    # (B2*NUM_HEADS*L_PAD, L_PAD)
        s = s - jnp.max(s, axis=-1, keepdims=True)
        p = jnp.exp(s)
        p = p * pl.reciprocal(jnp.sum(p, axis=-1, keepdims=True), approx=True)

        # head outputs packed into one (B2*L_PAD, D_PAD) slab -> ONE output projection
        out_rows = []
        for b in range(B2):
            r = b * L_PAD
            heads = []
            for hh in range(NUM_HEADS):
                c = hh * HEAD_SPREAD
                pr = (b * NUM_HEADS + hh) * L_PAD
                vh = qkv[r:r + L_PAD, 2 * D_PAD + c:2 * D_PAD + c + HEAD_SPREAD]
                heads.append(jnp.dot(p[pr:pr + L_PAD, :], vh,
                                     preferred_element_type=jnp.float32))   # (L_PAD, 32)
            out_rows.append(jnp.concatenate(heads, axis=1))                 # (L_PAD, D_PAD)
        attn = jnp.concatenate(out_rows, axis=0)                            # (B2*L_PAD, D_PAD)
        x = x + jnp.dot(attn, proj_w_ref[blk],
                        preferred_element_type=jnp.float32) + proj_b_ref[blk]

        # --- MLP sub-block (pre-LN) ---
        h = _layernorm(x, g2, b2)
        m = jnp.dot(h, fc1_w_ref[blk],
                    preferred_element_type=jnp.float32) + fc1_b_ref[blk]
        # TODO(synk): PyTorch nn.GELU default is the exact erf GELU; tanh approx used here.
        m = jax.nn.gelu(m, approximate=True)
        x = x + jnp.dot(m, fc2_w_ref[blk],
                        preferred_element_type=jnp.float32) + fc2_b_ref[blk]

    # ---- CLS rows only: final LN + fused projector MLP ----
    cls = jnp.concatenate([x[b * L_PAD:b * L_PAD + 1, :] for b in range(B2)], axis=0)
    cls = _layernorm(cls, lnf_ref[0:1, :], lnf_ref[1:2, :])                 # (B2, D_PAD)
    # TODO(synk): self.projector is not defined in the provided source; 2-layer MLP assumed.
    h1 = jnp.dot(cls, p1_w_ref[...], preferred_element_type=jnp.float32) + p1_b_ref[...]
    h1 = jax.nn.gelu(h1, approximate=True)
    z = jnp.dot(h1, p2_w_ref[...], preferred_element_type=jnp.float32) + p2_b_ref[...]
    z_ref[...] = z                                                          # (B2, PROJ_PAD)


def _fused_forward(params, x):
    """x: (2B, C, H, W) -> padded projector output (2B, PROJ_PAD) via one pallas_call."""
    b2 = x.shape[0]
    nh, nw = IMG // PATCH, IMG // PATCH

    # patchify (pure layout glue in the wrapper): NCHW -> (2B, nP, C*P*P)
    patches = x.reshape(b2, IN_CH, nh, PATCH, nw, PATCH)
    patches = patches.transpose(0, 2, 4, 1, 3, 5).reshape(b2, nh * nw, PATCH_DIM)
    # padded token slab: row 0 (CLS slot) and rows SEQ_LEN..L_PAD-1 stay zero
    patches_pad = jnp.zeros((b2, L_PAD, PATCH_DIM), jnp.float32)
    patches_pad = patches_pad.at[:, 1:1 + N_PATCHES, :].set(patches)
    patches_pad = patches_pad.reshape(b2 * L_PAD, PATCH_DIM)

    full = lambda shape: pl.BlockSpec(shape, lambda i, _s=shape: (0,) * len(_s))
    args = (patches_pad, params["addend"], params["pe_w"], params["ln"],
            params["qkv_w"], params["qkv_b"], params["proj_w"], params["proj_b"],
            params["fc1_w"], params["fc1_b"], params["fc2_w"], params["fc2_b"],
            params["lnf"], params["p1_w"], params["p1_b"], params["p2_w"], params["p2_b"])

    # NOTE: on v7x the batch axis could become a size-2 "parallel" grid axis to use
    # both TensorCores; kept as a single invocation here (correct everywhere).
    return pl.pallas_call(
        _fused_kernel,
        out_shape=jax.ShapeDtypeStruct((b2, PROJ_PAD), jnp.float32),
        grid=(1,),
        in_specs=[full(a.shape) for a in args],
        out_specs=full((b2, PROJ_PAD)),
        compiler_params=pltpu.CompilerParams(dimension_semantics=("arbitrary",)),
    )(*args)


# ---------------- parameter init (deterministic, synthetic, pre-padded/spread) ----------------
def init_params(key):
    d = EMBED_DIM
    keys = iter(jax.random.split(key, 32))
    dense = lambda k, fi, fo: jax.random.normal(k, (fi, fo), jnp.float32) * 0.02

    def pad2(a, rows, cols):
        return jnp.zeros((rows, cols), jnp.float32).at[:a.shape[0], :a.shape[1]].set(a)

    def spread_qkv(wq, wk, wv):
        # head h of q/k/v goes to 32-lane-aligned column block [part*128 + h*32, +16)
        W = jnp.zeros((D_PAD, 3 * D_PAD), jnp.float32)
        for part, w in enumerate((wq, wk, wv)):
            for hh in range(NUM_HEADS):
                dst = part * D_PAD + hh * HEAD_SPREAD
                src = hh * HEAD_DIM
                W = W.at[:d, dst:dst + HEAD_DIM].set(w[:, src:src + HEAD_DIM])
        return W

    def spread_proj(w):
        # rows follow the spread head layout so one matmul applies the full output proj
        W = jnp.zeros((D_PAD, D_PAD), jnp.float32)
        for hh in range(NUM_HEADS):
            W = W.at[hh * HEAD_SPREAD:hh * HEAD_SPREAD + HEAD_DIM, :d].set(
                w[hh * HEAD_DIM:hh * HEAD_DIM + HEAD_DIM, :])
        return W

    pe_w = pad2(dense(next(keys), PATCH_DIM, d), PATCH_DIM, D_PAD)
    pe_b = jnp.zeros((d,), jnp.float32)
    cls = jax.random.normal(next(keys), (1, d), jnp.float32) * 0.02
    pos = jax.random.normal(next(keys), (SEQ_LEN, d), jnp.float32) * 0.02

    # additive slab: CLS row = cls + pos[0]; patch rows = pos[1:] + patch-embed bias; pads 0
    addend = jnp.zeros((L_PAD, D_PAD), jnp.float32)
    addend = addend.at[0, :d].set(cls[0] + pos[0])
    addend = addend.at[1:1 + N_PATCHES, :d].set(pos[1:] + pe_b[None, :])
    addend = jnp.tile(addend, (B2, 1))                      # (B2*L_PAD, D_PAD)

    ln_gb = jnp.zeros((4, D_PAD), jnp.float32).at[0, :d].set(1.0).at[2, :d].set(1.0)

    ln, qkv_w, qkv_b, proj_w, proj_b = [], [], [], [], []
    fc1_w, fc1_b, fc2_w, fc2_b = [], [], [], []
    for _ in range(DEPTH):
        ln.append(ln_gb)
        wq, wk, wv = dense(next(keys), d, d), dense(next(keys), d, d), dense(next(keys), d, d)
        qkv_w.append(spread_qkv(wq, wk, wv))
        qkv_b.append(jnp.zeros((1, 3 * D_PAD), jnp.float32))
        proj_w.append(spread_proj(dense(next(keys), d, d)))
        proj_b.append(jnp.zeros((1, D_PAD), jnp.float32))
        fc1_w.append(pad2(dense(next(keys), d, MLP_DIM), D_PAD, MLP_DIM))
        fc1_b.append(jnp.zeros((1, MLP_DIM), jnp.float32))
        fc2_w.append(pad2(dense(next(keys), MLP_DIM, d), MLP_DIM, D_PAD))
        fc2_b.append(jnp.zeros((1, D_PAD), jnp.float32))

    params = {
        "pe_w": pe_w, "addend": addend,
        "ln": jnp.stack(ln), "qkv_w": jnp.stack(qkv_w), "qkv_b": jnp.stack(qkv_b),
        "proj_w": jnp.stack(proj_w), "proj_b": jnp.stack(proj_b),
        "fc1_w": jnp.stack(fc1_w), "fc1_b": jnp.stack(fc1_b),
        "fc2_w": jnp.stack(fc2_w), "fc2_b": jnp.stack(fc2_b),
        "lnf": jnp.zeros((2, D_PAD), jnp.float32).at[0, :d].set(1.0),
        "p1_w": pad2(dense(next(keys), d, PROJ_HIDDEN), D_PAD, PROJ_PAD),
        "p1_b": jnp.zeros((1, PROJ_PAD), jnp.float32),
        "p2_w": pad2(dense(next(keys), PROJ_HIDDEN, PROJ_OUT), PROJ_PAD, PROJ_PAD),
        "p2_b": jnp.zeros((1, PROJ_PAD), jnp.float32),
    }
    return params


# ---------------- OneHeadNet forward ----------------
@jax.jit
def one_head_net_forward(params, x1, x2, boxes1, boxes2, mask):
    del boxes1, boxes2, mask  # TODO(synk): ROI boxes/mask path not defined in the given source
    x = jnp.concatenate([x1, x2], axis=0)     # fold the Siamese pair into one batch
    z = _fused_forward(params, x)             # ONE fused encoder+projector pass (2B, PROJ_PAD)
    z = z[:, :PROJ_OUT]
    return z[:BATCH], z[BATCH:]


# ---------------- main ----------------
if __name__ == "__main__":
    key = jax.random.PRNGKey(0)
    kp, kx1, kx2 = jax.random.split(key, 3)
    params = init_params(kp)

    x1 = jax.random.normal(kx1, (BATCH, IN_CH, IMG, IMG), jnp.float32)
    x2 = jax.random.normal(kx2, (BATCH, IN_CH, IMG, IMG), jnp.float32)
    boxes1 = jnp.zeros((BATCH, 4, 4), jnp.float32)
    boxes2 = jnp.zeros((BATCH, 4, 4), jnp.float32)
    mask = jnp.ones((BATCH, 4), jnp.float32)

    z1, z2 = one_head_net_forward(params, x1, x2, boxes1, boxes2, mask)
    jax.block_until_ready((z1, z2))
    assert z1.shape == (BATCH, PROJ_OUT) and z2.shape == (BATCH, PROJ_OUT)
    assert bool(jnp.all(jnp.isfinite(z1))) and bool(jnp.all(jnp.isfinite(z2)))
    print("KERNEL_OK")
</pallas_src>

<mosaic_0001>
module attributes {stable_mosaic.version = 11 : i64} {
  func.func @_fused_kernel(%arg0: i32, %arg1: memref<32x768xf32, #tpu.memory_space<vmem>>, %arg2: memref<32x128xf32, #tpu.memory_space<vmem>>, %arg3: memref<768x128xf32, #tpu.memory_space<vmem>>, %arg4: memref<2x4x128xf32, #tpu.memory_space<vmem>>, %arg5: memref<2x128x384xf32, #tpu.memory_space<vmem>>, %arg6: memref<2x1x384xf32, #tpu.memory_space<vmem>>, %arg7: memref<2x128x128xf32, #tpu.memory_space<vmem>>, %arg8: memref<2x1x128xf32, #tpu.memory_space<vmem>>, %arg9: memref<2x128x128xf32, #tpu.memory_space<vmem>>, %arg10: memref<2x1x128xf32, #tpu.memory_space<vmem>>, %arg11: memref<2x128x128xf32, #tpu.memory_space<vmem>>, %arg12: memref<2x1x128xf32, #tpu.memory_space<vmem>>, %arg13: memref<2x128xf32, #tpu.memory_space<vmem>>, %arg14: memref<128x128xf32, #tpu.memory_space<vmem>>, %arg15: memref<1x128xf32, #tpu.memory_space<vmem>>, %arg16: memref<128x128xf32, #tpu.memory_space<vmem>>, %arg17: memref<1x128xf32, #tpu.memory_space<vmem>>, %arg18: memref<4x128xf32, #tpu.memory_space<vmem>>) attributes {dimension_semantics = [#tpu.dimension_semantics<arbitrary>], iteration_bounds = array<i64: 1>, scalar_prefetch = 0 : i64, scratch_operands = 0 : i64, tpu.core_type = #tpu.core_type<tc>, window_params = [{pipeline_mode = #tpu.pipeline_mode<synchronous>, transform_indices = @transform_0, window_bounds = array<i64: 32, 768>}, {pipeline_mode = #tpu.pipeline_mode<synchronous>, transform_indices = @transform_1, window_bounds = array<i64: 32, 128>}, {pipeline_mode = #tpu.pipeline_mode<synchronous>, transform_indices = @transform_2, window_bounds = array<i64: 768, 128>}, {pipeline_mode = #tpu.pipeline_mode<synchronous>, transform_indices = @transform_3, window_bounds = array<i64: 2, 4, 128>}, {pipeline_mode = #tpu.pipeline_mode<synchronous>, transform_indices = @transform_4, window_bounds = array<i64: 2, 128, 384>}, {pipeline_mode = #tpu.pipeline_mode<synchronous>, transform_indices = @transform_5, window_bounds = array<i64: 2, 1, 384>}, {pipeline_mode = #tpu.pipeline_mode<synchronous>, transform_indices = @transform_6, window_bounds = array<i64: 2, 128, 128>}, {pipeline_mode = #tpu.pipeline_mode<synchronous>, transform_indices = @transform_7, window_bounds = array<i64: 2, 1, 128>}, {pipeline_mode = #tpu.pipeline_mode<synchronous>, transform_indices = @transform_8, window_bounds = array<i64: 2, 128, 128>}, {pipeline_mode = #tpu.pipeline_mode<synchronous>, transform_indices = @transform_9, window_bounds = array<i64: 2, 1, 128>}, {pipeline_mode = #tpu.pipeline_mode<synchronous>, transform_indices = @transform_10, window_bounds = array<i64: 2, 128, 128>}, {pipeline_mode = #tpu.pipeline_mode<synchronous>, transform_indices = @transform_11, window_bounds = array<i64: 2, 1, 128>}, {pipeline_mode = #tpu.pipeline_mode<synchronous>, transform_indices = @transform_12, window_bounds = array<i64: 2, 128>}, {pipeline_mode = #tpu.pipeline_mode<synchronous>, transform_indices = @transform_13, window_bounds = array<i64: 128, 128>}, {pipeline_mode = #tpu.pipeline_mode<synchronous>, transform_indices = @transform_14, window_bounds = array<i64: 1, 128>}, {pipeline_mode = #tpu.pipeline_mode<synchronous>, transform_indices = @transform_15, window_bounds = array<i64: 128, 128>}, {pipeline_mode = #tpu.pipeline_mode<synchronous>, transform_indices = @transform_16, window_bounds = array<i64: 1, 128>}, {pipeline_mode = #tpu.pipeline_mode<synchronous>, transform_indices = @transform_17, window_bounds = array<i64: 4, 128>}]} {
    %0 = tpu.iota {dimensions = array<i32: 1>} : vector<1x8xi32>
    %c5_i32 = arith.constant 5 : i32
    %1 = vector.broadcast %c5_i32 : i32 to vector<1x8xi32>
    %2 = arith.cmpi slt, %0, %1 : vector<1x8xi32>
    %cst = arith.constant 0.000000e+00 : f32
    %cst_0 = arith.constant -1.000000e+30 : f32
    %3 = vector.broadcast %cst : f32 to vector<1x8xf32>
    %4 = vector.broadcast %cst_0 : f32 to vector<1x8xf32>
    %5 = arith.select %2, %3, %4 : vector<1x8xi1>, vector<1x8xf32>
    %c0 = arith.constant 0 : index
    %c0_1 = arith.constant 0 : index
    %6 = vector.load %arg1[%c0, %c0_1] : memref<32x768xf32, #tpu.memory_space<vmem>>, vector<32x768xf32>
    %c0_2 = arith.constant 0 : index
    %c0_3 = arith.constant 0 : index
    %7 = vector.load %arg3[%c0_2, %c0_3] : memref<768x128xf32, #tpu.memory_space<vmem>>, vector<768x128xf32>
    %cst_4 = arith.constant dense<0.000000e+00> : vector<32x128xf32>
    %8 = tpu.matmul %6, %7, %cst_4 {dimension_numbers = #tpu.dot_dimension_numbers<[1], [0], [0], [1], [0, 0, 1, 1], [], []>} : vector<32x768xf32>, vector<768x128xf32>, vector<32x128xf32> -> vector<32x128xf32>
    %c0_5 = arith.constant 0 : index
    %c0_6 = arith.constant 0 : index
    %9 = vector.load %arg2[%c0_5, %c0_6] : memref<32x128xf32, #tpu.memory_space<vmem>>, vector<32x128xf32>
    %10 = arith.addf %8, %9 : vector<32x128xf32>
    %c0_7 = arith.constant 0 : index
    %c0_8 = arith.constant 0 : index
    %c0_9 = arith.constant 0 : index
    %11 = vector.load %arg4[%c0_7, %c0_8, %c0_9] : memref<2x4x128xf32, #tpu.memory_space<vmem>>, vector<1x4x128xf32>
    %12 = vector.shape_cast %11 : vector<1x4x128xf32> to vector<4x128xf32>
    %13 = vector.extract_strided_slice %12 {offsets = [0, 0], sizes = [1, 128], strides = [1, 1]} : vector<4x128xf32> to vector<1x128xf32>
    %14 = vector.extract_strided_slice %12 {offsets = [1, 0], sizes = [1, 128], strides = [1, 1]} : vector<4x128xf32> to vector<1x128xf32>
    %15 = vector.extract_strided_slice %12 {offsets = [2, 0], sizes = [1, 128], strides = [1, 1]} : vector<4x128xf32> to vector<1x128xf32>
    %16 = vector.extract_strided_slice %12 {offsets = [3, 0], sizes = [1, 128], strides = [1, 1]} : vector<4x128xf32> to vector<1x128xf32>
    %cst_10 = arith.constant dense<0.000000e+00> : vector<32xf32>
    %17 = vector.multi_reduction <add>, %10, %cst_10 [1] : vector<32x128xf32> to vector<32xf32>
    %18 = vector.shape_cast %17 : vector<32xf32> to vector<32x1xf32>
    %19 = arith.mulf %10, %10 : vector<32x128xf32>
    %cst_11 = arith.constant dense<0.000000e+00> : vector<32xf32>
    %20 = vector.multi_reduction <add>, %19, %cst_11 [1] : vector<32x128xf32> to vector<32xf32>
    %21 = vector.shape_cast %20 : vector<32xf32> to vector<32x1xf32>
    %cst_12 = arith.constant 1.562500e-02 : f32
    %22 = vector.broadcast %cst_12 : f32 to vector<32x1xf32>
    %23 = arith.mulf %18, %22 : vector<32x1xf32>
    %cst_13 = arith.constant 1.562500e-02 : f32
    %24 = vector.broadcast %cst_13 : f32 to vector<32x1xf32>
    %25 = arith.mulf %21, %24 : vector<32x1xf32>
    %26 = arith.mulf %23, %23 : vector<32x1xf32>
    %27 = arith.subf %25, %26 : vector<32x1xf32>
    %28 = vector.broadcast %23 : vector<32x1xf32> to vector<32x128xf32>
    %29 = arith.subf %10, %28 : vector<32x128xf32>
    %cst_14 = arith.constant 9.99999997E-7 : f32
    %30 = vector.broadcast %cst_14 : f32 to vector<32x1xf32>
    %31 = arith.addf %27, %30 : vector<32x1xf32>
    %32 = math.rsqrt %31 : vector<32x1xf32>
    %33 = vector.broadcast %32 : vector<32x1xf32> to vector<32x128xf32>
    %34 = arith.mulf %29, %33 : vector<32x128xf32>
    %35 = vector.broadcast %13 : vector<1x128xf32> to vector<32x128xf32>
    %36 = arith.mulf %34, %35 : vector<32x128xf32>
    %37 = vector.broadcast %14 : vector<1x128xf32> to vector<32x128xf32>
    %38 = arith.addf %36, %37 : vector<32x128xf32>
    %c0_15 = arith.constant 0 : index
    %c0_16 = arith.constant 0 : index
    %c0_17 = arith.constant 0 : index
    %39 = vector.load %arg5[%c0_15, %c0_16, %c0_17] : memref<2x128x384xf32, #tpu.memory_space<vmem>>, vector<1x128x384xf32>
    %40 = vector.shape_cast %39 : vector<1x128x384xf32> to vector<128x384xf32>
    %cst_18 = arith.constant dense<0.000000e+00> : vector<32x384xf32>
    %41 = tpu.matmul %38, %40, %cst_18 {dimension_numbers = #tpu.dot_dimension_numbers<[1], [0], [0], [1], [0, 0, 1, 1], [], []>} : vector<32x128xf32>, vector<128x384xf32>, vector<32x384xf32> -> vector<32x384xf32>
    %c0_19 = arith.constant 0 : index
    %c0_20 = arith.constant 0 : index
    %c0_21 = arith.constant 0 : index
    %42 = vector.load %arg6[%c0_19, %c0_20, %c0_21] : memref<2x1x384xf32, #tpu.memory_space<vmem>>, vector<1x1x384xf32>
    %43 = vector.shape_cast %42 : vector<1x1x384xf32> to vector<1x384xf32>
    %44 = vector.broadcast %43 : vector<1x384xf32> to vector<32x384xf32>
    %45 = arith.addf %41, %44 : vector<32x384xf32>
    %46 = vector.extract_strided_slice %45 {offsets = [0, 0], sizes = [8, 32], strides = [1, 1]} : vector<32x384xf32> to vector<8x32xf32>
    %47 = vector.extract_strided_slice %45 {offsets = [0, 128], sizes = [8, 32], strides = [1, 1]} : vector<32x384xf32> to vector<8x32xf32>
    %cst_22 = arith.constant dense<0.000000e+00> : vector<8x8xf32>
    %48 = tpu.matmul %46, %47, %cst_22 {dimension_numbers = #tpu.dot_dimension_numbers<[1], [1], [0], [0], [0, 0, 1, 0], [], []>} : vector<8x32xf32>, vector<8x32xf32>, vector<8x8xf32> -> vector<8x8xf32>
    %cst_23 = arith.constant 2.500000e-01 : f32
    %49 = vector.broadcast %cst_23 : f32 to vector<8x8xf32>
    %50 = arith.mulf %48, %49 : vector<8x8xf32>
    %51 = vector.extract_strided_slice %45 {offsets = [0, 32], sizes = [8, 32], strides = [1, 1]} : vector<32x384xf32> to vector<8x32xf32>
    %52 = vector.extract_strided_slice %45 {offsets = [0, 160], sizes = [8, 32], strides = [1, 1]} : vector<32x384xf32> to vector<8x32xf32>
    %cst_24 = arith.constant dense<0.000000e+00> : vector<8x8xf32>
    %53 = tpu.matmul %51, %52, %cst_24 {dimension_numbers = #tpu.dot_dimension_numbers<[1], [1], [0], [0], [0, 0, 1, 0], [], []>} : vector<8x32xf32>, vector<8x32xf32>, vector<8x8xf32> -> vector<8x8xf32>
    %cst_25 = arith.constant 2.500000e-01 : f32
    %54 = vector.broadcast %cst_25 : f32 to vector<8x8xf32>
    %55 = arith.mulf %53, %54 : vector<8x8xf32>
    %56 = vector.extract_strided_slice %45 {offsets = [0, 64], sizes = [8, 32], strides = [1, 1]} : vector<32x384xf32> to vector<8x32xf32>
    %57 = vector.extract_strided_slice %45 {offsets = [0, 192], sizes = [8, 32], strides = [1, 1]} : vector<32x384xf32> to vector<8x32xf32>
    %cst_26 = arith.constant dense<0.000000e+00> : vector<8x8xf32>
    %58 = tpu.matmul %56, %57, %cst_26 {dimension_numbers = #tpu.dot_dimension_numbers<[1], [1], [0], [0], [0, 0, 1, 0], [], []>} : vector<8x32xf32>, vector<8x32xf32>, vector<8x8xf32> -> vector<8x8xf32>
    %cst_27 = arith.constant 2.500000e-01 : f32
    %59 = vector.broadcast %cst_27 : f32 to vector<8x8xf32>
    %60 = arith.mulf %58, %59 : vector<8x8xf32>
    %61 = vector.extract_strided_slice %45 {offsets = [0, 96], sizes = [8, 32], strides = [1, 1]} : vector<32x384xf32> to vector<8x32xf32>
    %62 = vector.extract_strided_slice %45 {offsets = [0, 224], sizes = [8, 32], strides = [1, 1]} : vector<32x384xf32> to vector<8x32xf32>
    %cst_28 = arith.constant dense<0.000000e+00> : vector<8x8xf32>
    %63 = tpu.matmul %61, %62, %cst_28 {dimension_numbers = #tpu.dot_dimension_numbers<[1], [1], [0], [0], [0, 0, 1, 0], [], []>} : vector<8x32xf32>, vector<8x32xf32>, vector<8x8xf32> -> vector<8x8xf32>
    %cst_29 = arith.constant 2.500000e-01 : f32
    %64 = vector.broadcast %cst_29 : f32 to vector<8x8xf32>
    %65 = arith.mulf %63, %64 : vector<8x8xf32>
    %66 = vector.extract_strided_slice %45 {offsets = [8, 0], sizes = [8, 32], strides = [1, 1]} : vector<32x384xf32> to vector<8x32xf32>
    %67 = vector.extract_strided_slice %45 {offsets = [8, 128], sizes = [8, 32], strides = [1, 1]} : vector<32x384xf32> to vector<8x32xf32>
    %cst_30 = arith.constant dense<0.000000e+00> : vector<8x8xf32>
    %68 = tpu.matmul %66, %67, %cst_30 {dimension_numbers = #tpu.dot_dimension_numbers<[1], [1], [0], [0], [0, 0, 1, 0], [], []>} : vector<8x32xf32>, vector<8x32xf32>, vector<8x8xf32> -> vector<8x8xf32>
    %cst_31 = arith.constant 2.500000e-01 : f32
    %69 = vector.broadcast %cst_31 : f32 to vector<8x8xf32>
    %70 = arith.mulf %68, %69 : vector<8x8xf32>
    %71 = vector.extract_strided_slice %45 {offsets = [8, 32], sizes = [8, 32], strides = [1, 1]} : vector<32x384xf32> to vector<8x32xf32>
    %72 = vector.extract_strided_slice %45 {offsets = [8, 160], sizes = [8, 32], strides = [1, 1]} : vector<32x384xf32> to vector<8x32xf32>
    %cst_32 = arith.constant dense<0.000000e+00> : vector<8x8xf32>
    %73 = tpu.matmul %71, %72, %cst_32 {dimension_numbers = #tpu.dot_dimension_numbers<[1], [1], [0], [0], [0, 0, 1, 0], [], []>} : vector<8x32xf32>, vector<8x32xf32>, vector<8x8xf32> -> vector<8x8xf32>
    %cst_33 = arith.constant 2.500000e-01 : f32
    %74 = vector.broadcast %cst_33 : f32 to vector<8x8xf32>
    %75 = arith.mulf %73, %74 : vector<8x8xf32>
    %76 = vector.extract_strided_slice %45 {offsets = [8, 64], sizes = [8, 32], strides = [1, 1]} : vector<32x384xf32> to vector<8x32xf32>
    %77 = vector.extract_strided_slice %45 {offsets = [8, 192], sizes = [8, 32], strides = [1, 1]} : vector<32x384xf32> to vector<8x32xf32>
    %cst_34 = arith.constant dense<0.000000e+00> : vector<8x8xf32>
    %78 = tpu.matmul %76, %77, %cst_34 {dimension_numbers = #tpu.dot_dimension_numbers<[1], [1], [0], [0], [0, 0, 1, 0], [], []>} : vector<8x32xf32>, vector<8x32xf32>, vector<8x8xf32> -> vector<8x8xf32>
    %cst_35 = arith.constant 2.500000e-01 : f32
    %79 = vector.broadcast %cst_35 : f32 to vector<8x8xf32>
    %80 = arith.mulf %78, %79 : vector<8x8xf32>
    %81 = vector.extract_strided_slice %45 {offsets = [8, 96], sizes = [8, 32], strides = [1, 1]} : vector<32x384xf32> to vector<8x32xf32>
    %82 = vector.extract_strided_slice %45 {offsets = [8, 224], sizes = [8, 32], strides = [1, 1]} : vector<32x384xf32> to vector<8x32xf32>
    %cst_36 = arith.constant dense<0.000000e+00> : vector<8x8xf32>
    %83 = tpu.matmul %81, %82, %cst_36 {dimension_numbers = #tpu.dot_dimension_numbers<[1], [1], [0], [0], [0, 0, 1, 0], [], []>} : vector<8x32xf32>, vector<8x32xf32>, vector<8x8xf32> -> vector<8x8xf32>
    %cst_37 = arith.constant 2.500000e-01 : f32
    %84 = vector.broadcast %cst_37 : f32 to vector<8x8xf32>
    %85 = arith.mulf %83, %84 : vector<8x8xf32>
    %86 = vector.extract_strided_slice %45 {offsets = [16, 0], sizes = [8, 32], strides = [1, 1]} : vector<32x384xf32> to vector<8x32xf32>
    %87 = vector.extract_strided_slice %45 {offsets = [16, 128], sizes = [8, 32], strides = [1, 1]} : vector<32x384xf32> to vector<8x32xf32>
    %cst_38 = arith.constant dense<0.000000e+00> : vector<8x8xf32>
    %88 = tpu.matmul %86, %87, %cst_38 {dimension_numbers = #tpu.dot_dimension_numbers<[1], [1], [0], [0], [0, 0, 1, 0], [], []>} : vector<8x32xf32>, vector<8x32xf32>, vector<8x8xf32> -> vector<8x8xf32>
    %cst_39 = arith.constant 2.500000e-01 : f32
    %89 = vector.broadcast %cst_39 : f32 to vector<8x8xf32>
    %90 = arith.mulf %88, %89 : vector<8x8xf32>
    %91 = vector.extract_strided_slice %45 {offsets = [16, 32], sizes = [8, 32], strides = [1, 1]} : vector<32x384xf32> to vector<8x32xf32>
    %92 = vector.extract_strided_slice %45 {offsets = [16, 160], sizes = [8, 32], strides = [1, 1]} : vector<32x384xf32> to vector<8x32xf32>
    %cst_40 = arith.constant dense<0.000000e+00> : vector<8x8xf32>
    %93 = tpu.matmul %91, %92, %cst_40 {dimension_numbers = #tpu.dot_dimension_numbers<[1], [1], [0], [0], [0, 0, 1, 0], [], []>} : vector<8x32xf32>, vector<8x32xf32>, vector<8x8xf32> -> vector<8x8xf32>
    %cst_41 = arith.constant 2.500000e-01 : f32
    %94 = vector.broadcast %cst_41 : f32 to vector<8x8xf32>
    %95 = arith.mulf %93, %94 : vector<8x8xf32>
    %96 = vector.extract_strided_slice %45 {offsets = [16, 64], sizes = [8, 32], strides = [1, 1]} : vector<32x384xf32> to vector<8x32xf32>
    %97 = vector.extract_strided_slice %45 {offsets = [16, 192], sizes = [8, 32], strides = [1, 1]} : vector<32x384xf32> to vector<8x32xf32>
    %cst_42 = arith.constant dense<0.000000e+00> : vector<8x8xf32>
    %98 = tpu.matmul %96, %97, %cst_42 {dimension_numbers = #tpu.dot_dimension_numbers<[1], [1], [0], [0], [0, 0, 1, 0], [], []>} : vector<8x32xf32>, vector<8x32xf32>, vector<8x8xf32> -> vector<8x8xf32>
    %cst_43 = arith.constant 2.500000e-01 : f32
    %99 = vector.broadcast %cst_43 : f32 to vector<8x8xf32>
    %100 = arith.mulf %98, %99 : vector<8x8xf32>
    %101 = vector.extract_strided_slice %45 {offsets = [16, 96], sizes = [8, 32], strides = [1, 1]} : vector<32x384xf32> to vector<8x32xf32>
    %102 = vector.extract_strided_slice %45 {offsets = [16, 224], sizes = [8, 32], strides = [1, 1]} : vector<32x384xf32> to vector<8x32xf32>
    %cst_44 = arith.constant dense<0.000000e+00> : vector<8x8xf32>
    %103 = tpu.matmul %101, %102, %cst_44 {dimension_numbers = #tpu.dot_dimension_numbers<[1], [1], [0], [0], [0, 0, 1, 0], [], []>} : vector<8x32xf32>, vector<8x32xf32>, vector<8x8xf32> -> vector<8x8xf32>
    %cst_45 = arith.constant 2.500000e-01 : f32
    %104 = vector.broadcast %cst_45 : f32 to vector<8x8xf32>
    %105 = arith.mulf %103, %104 : vector<8x8xf32>
    %106 = vector.extract_strided_slice %45 {offsets = [24, 0], sizes = [8, 32], strides = [1, 1]} : vector<32x384xf32> to vector<8x32xf32>
    %107 = vector.extract_strided_slice %45 {offsets = [24, 128], sizes = [8, 32], strides = [1, 1]} : vector<32x384xf32> to vector<8x32xf32>
    %cst_46 = arith.constant dense<0.000000e+00> : vector<8x8xf32>
    %108 = tpu.matmul %106, %107, %cst_46 {dimension_numbers = #tpu.dot_dimension_numbers<[1], [1], [0], [0], [0, 0, 1, 0], [], []>} : vector<8x32xf32>, vector<8x32xf32>, vector<8x8xf32> -> vector<8x8xf32>
    %cst_47 = arith.constant 2.500000e-01 : f32
    %109 = vector.broadcast %cst_47 : f32 to vector<8x8xf32>
    %110 = arith.mulf %108, %109 : vector<8x8xf32>
    %111 = vector.extract_strided_slice %45 {offsets = [24, 32], sizes = [8, 32], strides = [1, 1]} : vector<32x384xf32> to vector<8x32xf32>
    %112 = vector.extract_strided_slice %45 {offsets = [24, 160], sizes = [8, 32], strides = [1, 1]} : vector<32x384xf32> to vector<8x32xf32>
    %cst_48 = arith.constant dense<0.000000e+00> : vector<8x8xf32>
    %113 = tpu.matmul %111, %112, %cst_48 {dimension_numbers = #tpu.dot_dimension_numbers<[1], [1], [0], [0], [0, 0, 1, 0], [], []>} : vector<8x32xf32>, vector<8x32xf32>, vector<8x8xf32> -> vector<8x8xf32>
    %cst_49 = arith.constant 2.500000e-01 : f32
    %114 = vector.broadcast %cst_49 : f32 to vector<8x8xf32>
    %115 = arith.mulf %113, %114 : vector<8x8xf32>
    %116 = vector.extract_strided_slice %45 {offsets = [24, 64], sizes = [8, 32], strides = [1, 1]} : vector<32x384xf32> to vector<8x32xf32>
    %117 = vector.extract_strided_slice %45 {offsets = [24, 192], sizes = [8, 32], strides = [1, 1]} : vector<32x384xf32> to vector<8x32xf32>
    %cst_50 = arith.constant dense<0.000000e+00> : vector<8x8xf32>
    %118 = tpu.matmul %116, %117, %cst_50 {dimension_numbers = #tpu.dot_dimension_numbers<[1], [1], [0], [0], [0, 0, 1, 0], [], []>} : vector<8x32xf32>, vector<8x32xf32>, vector<8x8xf32> -> vector<8x8xf32>
    %cst_51 = arith.constant 2.500000e-01 : f32
    %119 = vector.broadcast %cst_51 : f32 to vector<8x8xf32>
    %120 = arith.mulf %118, %119 : vector<8x8xf32>
    %121 = vector.extract_strided_slice %45 {offsets = [24, 96], sizes = [8, 32], strides = [1, 1]} : vector<32x384xf32> to vector<8x32xf32>
    %122 = vector.extract_strided_slice %45 {offsets = [24, 224], sizes = [8, 32], strides = [1, 1]} : vector<32x384xf32> to vector<8x32xf32>
    %cst_52 = arith.constant dense<0.000000e+00> : vector<8x8xf32>
    %123 = tpu.matmul %121, %122, %cst_52 {dimension_numbers = #tpu.dot_dimension_numbers<[1], [1], [0], [0], [0, 0, 1, 0], [], []>} : vector<8x32xf32>, vector<8x32xf32>, vector<8x8xf32> -> vector<8x8xf32>
    %cst_53 = arith.constant 2.500000e-01 : f32
    %124 = vector.broadcast %cst_53 : f32 to vector<8x8xf32>
    %125 = arith.mulf %123, %124 : vector<8x8xf32>
    %126 = tpu.concatenate %50, %55, %60, %65, %70, %75, %80, %85, %90, %95, %100, %105, %110, %115, %120, %125 in 0 : vector<8x8xf32>, vector<8x8xf32>, vector<8x8xf32>, vector<8x8xf32>, vector<8x8xf32>, vector<8x8xf32>, vector<8x8xf32>, vector<8x8xf32>, vector<8x8xf32>, vector<8x8xf32>, vector<8x8xf32>, vector<8x8xf32>, vector<8x8xf32>, vector<8x8xf32>, vector<8x8xf32>, vector<8x8xf32> -> vector<128x8xf32>
    %127 = vector.broadcast %5 : vector<1x8xf32> to vector<128x8xf32>
    %128 = arith.addf %126, %127 : vector<128x8xf32>
    %cst_54 = arith.constant dense<0xFF800000> : vector<128xf32>
    %129 = vector.multi_reduction <maximumf>, %128, %cst_54 [1] : vector<128x8xf32> to vector<128xf32>
    %130 = vector.shape_cast %129 : vector<128xf32> to vector<128x1xf32>
    %131 = vector.broadcast %130 : vector<128x1xf32> to vector<128x8xf32>
    %132 = arith.subf %128, %131 : vector<128x8xf32>
    %133 = math.exp %132 : vector<128x8xf32>
    %cst_55 = arith.constant dense<0.000000e+00> : vector<128xf32>
    %134 = vector.multi_reduction <add>, %133, %cst_55 [1] : vector<128x8xf32> to vector<128xf32>
    %135 = vector.shape_cast %134 : vector<128xf32> to vector<128x1xf32>
    %136 = tpu.reciprocal %135 {approx = true} : vector<128x1xf32> -> vector<128x1xf32>
    %137 = vector.broadcast %136 : vector<128x1xf32> to vector<128x8xf32>
    %138 = arith.mulf %133, %137 : vector<128x8xf32>
    %139 = vector.extract_strided_slice %45 {offsets = [0, 256], sizes = [8, 32], strides = [1, 1]} : vector<32x384xf32> to vector<8x32xf32>
    %140 = vector.extract_strided_slice %138 {offsets = [0, 0], sizes = [8, 8], strides = [1, 1]} : vector<128x8xf32> to vector<8x8xf32>
    %cst_56 = arith.constant dense<0.000000e+00> : vector<8x32xf32>
    %141 = tpu.matmul %140, %139, %cst_56 {dimension_numbers = #tpu.dot_dimension_numbers<[1], [0], [0], [1], [0, 0, 1, 1], [], []>} : vector<8x8xf32>, vector<8x32xf32>, vector<8x32xf32> -> vector<8x32xf32>
    %142 = vector.extract_strided_slice %45 {offsets = [0, 288], sizes = [8, 32], strides = [1, 1]} : vector<32x384xf32> to vector<8x32xf32>
    %143 = vector.extract_strided_slice %138 {offsets = [8, 0], sizes = [8, 8], strides = [1, 1]} : vector<128x8xf32> to vector<8x8xf32>
    %cst_57 = arith.constant dense<0.000000e+00> : vector<8x32xf32>
    %144 = tpu.matmul %143, %142, %cst_57 {dimension_numbers = #tpu.dot_dimension_numbers<[1], [0], [0], [1], [0, 0, 1, 1], [], []>} : vector<8x8xf32>, vector<8x32xf32>, vector<8x32xf32> -> vector<8x32xf32>
    %145 = vector.extract_strided_slice %45 {offsets = [0, 320], sizes = [8, 32], strides = [1, 1]} : vector<32x384xf32> to vector<8x32xf32>
    %146 = vector.extract_strided_slice %138 {offsets = [16, 0], sizes = [8, 8], strides = [1, 1]} : vector<128x8xf32> to vector<8x8xf32>
    %cst_58 = arith.constant dense<0.000000e+00> : vector<8x32xf32>
    %147 = tpu.matmul %146, %145, %cst_58 {dimension_numbers = #tpu.dot_dimension_numbers<[1], [0], [0], [1], [0, 0, 1, 1], [], []>} : vector<8x8xf32>, vector<8x32xf32>, vector<8x32xf32> -> vector<8x32xf32>
    %148 = vector.extract_strided_slice %45 {offsets = [0, 352], sizes = [8, 32], strides = [1, 1]} : vector<32x384xf32> to vector<8x32xf32>
    %149 = vector.extract_strided_slice %138 {offsets = [24, 0], sizes = [8, 8], strides = [1, 1]} : vector<128x8xf32> to vector<8x8xf32>
    %cst_59 = arith.constant dense<0.000000e+00> : vector<8x32xf32>
    %150 = tpu.matmul %149, %148, %cst_59 {dimension_numbers = #tpu.dot_dimension_numbers<[1], [0], [0], [1], [0, 0, 1, 1], [], []>} : vector<8x8xf32>, vector<8x32xf32>, vector<8x32xf32> -> vector<8x32xf32>
    %151 = tpu.concatenate %141, %144, %147, %150 in 1 : vector<8x32xf32>, vector<8x32xf32>, vector<8x32xf32>, vector<8x32xf32> -> vector<8x128xf32>
    %152 = vector.extract_strided_slice %45 {offsets = [8, 256], sizes = [8, 32], strides = [1, 1]} : vector<32x384xf32> to vector<8x32xf32>
    %153 = vector.extract_strided_slice %138 {offsets = [32, 0], sizes = [8, 8], strides = [1, 1]} : vector<128x8xf32> to vector<8x8xf32>
    %cst_60 = arith.constant dense<0.000000e+00> : vector<8x32xf32>
    %154 = tpu.matmul %153, %152, %cst_60 {dimension_numbers = #tpu.dot_dimension_numbers<[1], [0], [0], [1], [0, 0, 1, 1], [], []>} : vector<8x8xf32>, vector<8x32xf32>, vector<8x32xf32> -> vector<8x32xf32>
    %155 = vector.extract_strided_slice %45 {offsets = [8, 288], sizes = [8, 32], strides = [1, 1]} : vector<32x384xf32> to vector<8x32xf32>
    %156 = vector.extract_strided_slice %138 {offsets = [40, 0], sizes = [8, 8], strides = [1, 1]} : vector<128x8xf32> to vector<8x8xf32>
    %cst_61 = arith.constant dense<0.000000e+00> : vector<8x32xf32>
    %157 = tpu.matmul %156, %155, %cst_61 {dimension_numbers = #tpu.dot_dimension_numbers<[1], [0], [0], [1], [0, 0, 1, 1], [], []>} : vector<8x8xf32>, vector<8x32xf32>, vector<8x32xf32> -> vector<8x32xf32>
    %158 = vector.extract_strided_slice %45 {offsets = [8, 320], sizes = [8, 32], strides = [1, 1]} : vector<32x384xf32> to vector<8x32xf32>
    %159 = vector.extract_strided_slice %138 {offsets = [48, 0], sizes = [8, 8], strides = [1, 1]} : vector<128x8xf32> to vector<8x8xf32>
    %cst_62 = arith.constant dense<0.000000e+00> : vector<8x32xf32>
    %160 = tpu.matmul %159, %158, %cst_62 {dimension_numbers = #tpu.dot_dimension_numbers<[1], [0], [0], [1], [0, 0, 1, 1], [], []>} : vector<8x8xf32>, vector<8x32xf32>, vector<8x32xf32> -> vector<8x32xf32>
    %161 = vector.extract_strided_slice %45 {offsets = [8, 352], sizes = [8, 32], strides = [1, 1]} : vector<32x384xf32> to vector<8x32xf32>
    %162 = vector.extract_strided_slice %138 {offsets = [56, 0], sizes = [8, 8], strides = [1, 1]} : vector<128x8xf32> to vector<8x8xf32>
    %cst_63 = arith.constant dense<0.000000e+00> : vector<8x32xf32>
    %163 = tpu.matmul %162, %161, %cst_63 {dimension_numbers = #tpu.dot_dimension_numbers<[1], [0], [0], [1], [0, 0, 1, 1], [], []>} : vector<8x8xf32>, vector<8x32xf32>, vector<8x32xf32> -> vector<8x32xf32>
    %164 = tpu.concatenate %154, %157, %160, %163 in 1 : vector<8x32xf32>, vector<8x32xf32>, vector<8x32xf32>, vector<8x32xf32> -> vector<8x128xf32>
    %165 = vector.extract_strided_slice %45 {offsets = [16, 256], sizes = [8, 32], strides = [1, 1]} : vector<32x384xf32> to vector<8x32xf32>
    %166 = vector.extract_strided_slice %138 {offsets = [64, 0], sizes = [8, 8], strides = [1, 1]} : vector<128x8xf32> to vector<8x8xf32>
    %cst_64 = arith.constant dense<0.000000e+00> : vector<8x32xf32>
    %167 = tpu.matmul %166, %165, %cst_64 {dimension_numbers = #tpu.dot_dimension_numbers<[1], [0], [0], [1], [0, 0, 1, 1], [], []>} : vector<8x8xf32>, vector<8x32xf32>, vector<8x32xf32> -> vector<8x32xf32>
    %168 = vector.extract_strided_slice %45 {offsets = [16, 288], sizes = [8, 32], strides = [1, 1]} : vector<32x384xf32> to vector<8x32xf32>
    %169 = vector.extract_strided_slice %138 {offsets = [72, 0], sizes = [8, 8], strides = [1, 1]} : vector<128x8xf32> to vector<8x8xf32>
    %cst_65 = arith.constant dense<0.000000e+00> : vector<8x32xf32>
    %170 = tpu.matmul %169, %168, %cst_65 {dimension_numbers = #tpu.dot_dimension_numbers<[1], [0], [0], [1], [0, 0, 1, 1], [], []>} : vector<8x8xf32>, vector<8x32xf32>, vector<8x32xf32> -> vector<8x32xf32>
    %171 = vector.extract_strided_slice %45 {offsets = [16, 320], sizes = [8, 32], strides = [1, 1]} : vector<32x384xf32> to vector<8x32xf32>
    %172 = vector.extract_strided_slice %138 {offsets = [80, 0], sizes = [8, 8], strides = [1, 1]} : vector<128x8xf32> to vector<8x8xf32>
    %cst_66 = arith.constant dense<0.000000e+00> : vector<8x32xf32>
    %173 = tpu.matmul %172, %171, %cst_66 {dimension_numbers = #tpu.dot_dimension_numbers<[1], [0], [0], [1], [0, 0, 1, 1], [], []>} : vector<8x8xf32>, vector<8x32xf32>, vector<8x32xf32> -> vector<8x32xf32>
    %174 = vector.extract_strided_slice %45 {offsets = [16, 352], sizes = [8, 32], strides = [1, 1]} : vector<32x384xf32> to vector<8x32xf32>
    %175 = vector.extract_strided_slice %138 {offsets = [88, 0], sizes = [8, 8], strides = [1, 1]} : vector<128x8xf32> to vector<8x8xf32>
    %cst_67 = arith.constant dense<0.000000e+00> : vector<8x32xf32>
    %176 = tpu.matmul %175, %174, %cst_67 {dimension_numbers = #tpu.dot_dimension_numbers<[1], [0], [0], [1], [0, 0, 1, 1], [], []>} : vector<8x8xf32>, vector<8x32xf32>, vector<8x32xf32> -> vector<8x32xf32>
    %177 = tpu.concatenate %167, %170, %173, %176 in 1 : vector<8x32xf32>, vector<8x32xf32>, vector<8x32xf32>, vector<8x32xf32> -> vector<8x128xf32>
    %178 = vector.extract_strided_slice %45 {offsets = [24, 256], sizes = [8, 32], strides = [1, 1]} : vector<32x384xf32> to vector<8x32xf32>
    %179 = vector.extract_strided_slice %138 {offsets = [96, 0], sizes = [8, 8], strides = [1, 1]} : vector<128x8xf32> to vector<8x8xf32>
    %cst_68 = arith.constant dense<0.000000e+00> : vector<8x32xf32>
    %180 = tpu.matmul %179, %178, %cst_68 {dimension_numbers = #tpu.dot_dimension_numbers<[1], [0], [0], [1], [0, 0, 1, 1], [], []>} : vector<8x8xf32>, vector<8x32xf32>, vector<8x32xf32> -> vector<8x32xf32>
    %181 = vector.extract_strided_slice %45 {offsets = [24, 288], sizes = [8, 32], strides = [1, 1]} : vector<32x384xf32> to vector<8x32xf32>
    %182 = vector.extract_strided_slice %138 {offsets = [104, 0], sizes = [8, 8], strides = [1, 1]} : vector<128x8xf32> to vector<8x8xf32>
    %cst_69 = arith.constant dense<0.000000e+00> : vector<8x32xf32>
    %183 = tpu.matmul %182, %181, %cst_69 {dimension_numbers = #tpu.dot_dimension_numbers<[1], [0], [0], [1], [0, 0, 1, 1], [], []>} : vector<8x8xf32>, vector<8x32xf32>, vector<8x32xf32> -> vector<8x32xf32>
    %184 = vector.extract_strided_slice %45 {offsets = [24, 320], sizes = [8, 32], strides = [1, 1]} : vector<32x384xf32> to vector<8x32xf32>
    %185 = vector.extract_strided_slice %138 {offsets = [112, 0], sizes = [8, 8], strides = [1, 1]} : vector<128x8xf32> to vector<8x8xf32>
    %cst_70 = arith.constant dense<0.000000e+00> : vector<8x32xf32>
    %186 = tpu.matmul %185, %184, %cst_70 {dimension_numbers = #tpu.dot_dimension_numbers<[1], [0], [0], [1], [0, 0, 1, 1], [], []>} : vector<8x8xf32>, vector<8x32xf32>, vector<8x32xf32> -> vector<8x32xf32>
    %187 = vector.extract_strided_slice %45 {offsets = [24, 352], sizes = [8, 32], strides = [1, 1]} : vector<32x384xf32> to vector<8x32xf32>
    %188 = vector.extract_strided_slice %138 {offsets = [120, 0], sizes = [8, 8], strides = [1, 1]} : vector<128x8xf32> to vector<8x8xf32>
    %cst_71 = arith.constant dense<0.000000e+00> : vector<8x32xf32>
    %189 = tpu.matmul %188, %187, %cst_71 {dimension_numbers = #tpu.dot_dimension_numbers<[1], [0], [0], [1], [0, 0, 1, 1], [], []>} : vector<8x8xf32>, vector<8x32xf32>, vector<8x32xf32> -> vector<8x32xf32>
    %190 = tpu.concatenate %180, %183, %186, %189 in 1 : vector<8x32xf32>, vector<8x32xf32>, vector<8x32xf32>, vector<8x32xf32> -> vector<8x128xf32>
    %191 = tpu.concatenate %151, %164, %177, %190 in 0 : vector<8x128xf32>, vector<8x128xf32>, vector<8x128xf32>, vector<8x128xf32> -> vector<32x128xf32>
    %c0_72 = arith.constant 0 : index
    %c0_73 = arith.constant 0 : index
    %c0_74 = arith.constant 0 : index
    %192 = vector.load %arg7[%c0_72, %c0_73, %c0_74] : memref<2x128x128xf32, #tpu.memory_space<vmem>>, vector<1x128x128xf32>
    %193 = vector.shape_cast %192 : vector<1x128x128xf32> to vector<128x128xf32>
    %cst_75 = arith.constant dense<0.000000e+00> : vector<32x128xf32>
    %194 = tpu.matmul %191, %193, %cst_75 {dimension_numbers = #tpu.dot_dimension_numbers<[1], [0], [0], [1], [0, 0, 1, 1], [], []>} : vector<32x128xf32>, vector<128x128xf32>, vector<32x128xf32> -> vector<32x128xf32>
    %195 = arith.addf %10, %194 : vector<32x128xf32>
    %c0_76 = arith.constant 0 : index
    %c0_77 = arith.constant 0 : index
    %c0_78 = arith.constant 0 : index
    %196 = vector.load %arg8[%c0_76, %c0_77, %c0_78] : memref<2x1x128xf32, #tpu.memory_space<vmem>>, vector<1x1x128xf32>
    %197 = vector.shape_cast %196 : vector<1x1x128xf32> to vector<1x128xf32>
    %198 = vector.broadcast %197 : vector<1x128xf32> to vector<32x128xf32>
    %199 = arith.addf %195, %198 : vector<32x128xf32>
    %cst_79 = arith.constant dense<0.000000e+00> : vector<32xf32>
    %200 = vector.multi_reduction <add>, %199, %cst_79 [1] : vector<32x128xf32> to vector<32xf32>
    %201 = vector.shape_cast %200 : vector<32xf32> to vector<32x1xf32>
    %202 = arith.mulf %199, %199 : vector<32x128xf32>
    %cst_80 = arith.constant dense<0.000000e+00> : vector<32xf32>
    %203 = vector.multi_reduction <add>, %202, %cst_80 [1] : vector<32x128xf32> to vector<32xf32>
    %204 = vector.shape_cast %203 : vector<32xf32> to vector<32x1xf32>
    %cst_81 = arith.constant 1.562500e-02 : f32
    %205 = vector.broadcast %cst_81 : f32 to vector<32x1xf32>
    %206 = arith.mulf %201, %205 : vector<32x1xf32>
    %cst_82 = arith.constant 1.562500e-02 : f32
    %207 = vector.broadcast %cst_82 : f32 to vector<32x1xf32>
    %208 = arith.mulf %204, %207 : vector<32x1xf32>
    %209 = arith.mulf %206, %206 : vector<32x1xf32>
    %210 = arith.subf %208, %209 : vector<32x1xf32>
    %211 = vector.broadcast %206 : vector<32x1xf32> to vector<32x128xf32>
    %212 = arith.subf %199, %211 : vector<32x128xf32>
    %cst_83 = arith.constant 9.99999997E-7 : f32
    %213 = vector.broadcast %cst_83 : f32 to vector<32x1xf32>
    %214 = arith.addf %210, %213 : vector<32x1xf32>
    %215 = math.rsqrt %214 : vector<32x1xf32>
    %216 = vector.broadcast %215 : vector<32x1xf32> to vector<32x128xf32>
    %217 = arith.mulf %212, %216 : vector<32x128xf32>
    %218 = vector.broadcast %15 : vector<1x128xf32> to vector<32x128xf32>
    %219 = arith.mulf %217, %218 : vector<32x128xf32>
    %220 = vector.broadcast %16 : vector<1x128xf32> to vector<32x128xf32>
    %221 = arith.addf %219, %220 : vector<32x128xf32>
    %c0_84 = arith.constant 0 : index
    %c0_85 = arith.constant 0 : index
    %c0_86 = arith.constant 0 : index
    %222 = vector.load %arg9[%c0_84, %c0_85, %c0_86] : memref<2x128x128xf32, #tpu.memory_space<vmem>>, vector<1x128x128xf32>
    %223 = vector.shape_cast %222 : vector<1x128x128xf32> to vector<128x128xf32>
    %cst_87 = arith.constant dense<0.000000e+00> : vector<32x128xf32>
    %224 = tpu.matmul %221, %223, %cst_87 {dimension_numbers = #tpu.dot_dimension_numbers<[1], [0], [0], [1], [0, 0, 1, 1], [], []>} : vector<32x128xf32>, vector<128x128xf32>, vector<32x128xf32> -> vector<32x128xf32>
    %c0_88 = arith.constant 0 : index
    %c0_89 = arith.constant 0 : index
    %c0_90 = arith.constant 0 : index
    %225 = vector.load %arg10[%c0_88, %c0_89, %c0_90] : memref<2x1x128xf32, #tpu.memory_space<vmem>>, vector<1x1x128xf32>
    %226 = vector.shape_cast %225 : vector<1x1x128xf32> to vector<1x128xf32>
    %227 = vector.broadcast %226 : vector<1x128xf32> to vector<32x128xf32>
    %228 = arith.addf %224, %227 : vector<32x128xf32>
    %229 = arith.mulf %228, %228 : vector<32x128xf32>
    %230 = arith.mulf %228, %229 : vector<32x128xf32>
    %cst_91 = arith.constant 4.471500e-02 : f32
    %231 = vector.broadcast %cst_91 : f32 to vector<32x128xf32>
    %232 = arith.mulf %231, %230 : vector<32x128xf32>
    %233 = arith.addf %228, %232 : vector<32x128xf32>
    %cst_92 = arith.constant 0.797884583 : f32
    %234 = vector.broadcast %cst_92 : f32 to vector<32x128xf32>
    %235 = arith.mulf %234, %233 : vector<32x128xf32>
    %236 = math.tanh %235 : vector<32x128xf32>
    %cst_93 = arith.constant 1.000000e+00 : f32
    %237 = vector.broadcast %cst_93 : f32 to vector<32x128xf32>
    %238 = arith.addf %237, %236 : vector<32x128xf32>
    %cst_94 = arith.constant 5.000000e-01 : f32
    %239 = vector.broadcast %cst_94 : f32 to vector<32x128xf32>
    %240 = arith.mulf %239, %238 : vector<32x128xf32>
    %241 = arith.mulf %228, %240 : vector<32x128xf32>
    %c0_95 = arith.constant 0 : index
    %c0_96 = arith.constant 0 : index
    %c0_97 = arith.constant 0 : index
    %242 = vector.load %arg11[%c0_95, %c0_96, %c0_97] : memref<2x128x128xf32, #tpu.memory_space<vmem>>, vector<1x128x128xf32>
    %243 = vector.shape_cast %242 : vector<1x128x128xf32> to vector<128x128xf32>
    %cst_98 = arith.constant dense<0.000000e+00> : vector<32x128xf32>
    %244 = tpu.matmul %241, %243, %cst_98 {dimension_numbers = #tpu.dot_dimension_numbers<[1], [0], [0], [1], [0, 0, 1, 1], [], []>} : vector<32x128xf32>, vector<128x128xf32>, vector<32x128xf32> -> vector<32x128xf32>
    %245 = arith.addf %199, %244 : vector<32x128xf32>
    %c0_99 = arith.constant 0 : index
    %c0_100 = arith.constant 0 : index
    %c0_101 = arith.constant 0 : index
    %246 = vector.load %arg12[%c0_99, %c0_100, %c0_101] : memref<2x1x128xf32, #tpu.memory_space<vmem>>, vector<1x1x128xf32>
    %247 = vector.shape_cast %246 : vector<1x1x128xf32> to vector<1x128xf32>
    %248 = vector.broadcast %247 : vector<1x128xf32> to vector<32x128xf32>
    %249 = arith.addf %245, %248 : vector<32x128xf32>
    %c1 = arith.constant 1 : index
    %c0_102 = arith.constant 0 : index
    %c0_103 = arith.constant 0 : index
    %250 = vector.load %arg4[%c1, %c0_102, %c0_103] : memref<2x4x128xf32, #tpu.memory_space<vmem>>, vector<1x4x128xf32>
    %251 = vector.shape_cast %250 : vector<1x4x128xf32> to vector<4x128xf32>
    %252 = vector.extract_strided_slice %251 {offsets = [0, 0], sizes = [1, 128], strides = [1, 1]} : vector<4x128xf32> to vector<1x128xf32>
    %253 = vector.extract_strided_slice %251 {offsets = [1, 0], sizes = [1, 128], strides = [1, 1]} : vector<4x128xf32> to vector<1x128xf32>
    %254 = vector.extract_strided_slice %251 {offsets = [2, 0], sizes = [1, 128], strides = [1, 1]} : vector<4x128xf32> to vector<1x128xf32>
    %255 = vector.extract_strided_slice %251 {offsets = [3, 0], sizes = [1, 128], strides = [1, 1]} : vector<4x128xf32> to vector<1x128xf32>
    %cst_104 = arith.constant dense<0.000000e+00> : vector<32xf32>
    %256 = vector.multi_reduction <add>, %249, %cst_104 [1] : vector<32x128xf32> to vector<32xf32>
    %257 = vector.shape_cast %256 : vector<32xf32> to vector<32x1xf32>
    %258 = arith.mulf %249, %249 : vector<32x128xf32>
    %cst_105 = arith.constant dense<0.000000e+00> : vector<32xf32>
    %259 = vector.multi_reduction <add>, %258, %cst_105 [1] : vector<32x128xf32> to vector<32xf32>
    %260 = vector.shape_cast %259 : vector<32xf32> to vector<32x1xf32>
    %cst_106 = arith.constant 1.562500e-02 : f32
    %261 = vector.broadcast %cst_106 : f32 to vector<32x1xf32>
    %262 = arith.mulf %257, %261 : vector<32x1xf32>
    %cst_107 = arith.constant 1.562500e-02 : f32
    %263 = vector.broadcast %cst_107 : f32 to vector<32x1xf32>
    %264 = arith.mulf %260, %263 : vector<32x1xf32>
    %265 = arith.mulf %262, %262 : vector<32x1xf32>
    %266 = arith.subf %264, %265 : vector<32x1xf32>
    %267 = vector.broadcast %262 : vector<32x1xf32> to vector<32x128xf32>
    %268 = arith.subf %249, %267 : vector<32x128xf32>
    %cst_108 = arith.constant 9.99999997E-7 : f32
    %269 = vector.broadcast %cst_108 : f32 to vector<32x1xf32>
    %270 = arith.addf %266, %269 : vector<32x1xf32>
    %271 = math.rsqrt %270 : vector<32x1xf32>
    %272 = vector.broadcast %271 : vector<32x1xf32> to vector<32x128xf32>
    %273 = arith.mulf %268, %272 : vector<32x128xf32>
    %274 = vector.broadcast %252 : vector<1x128xf32> to vector<32x128xf32>
    %275 = arith.mulf %273, %274 : vector<32x128xf32>
    %276 = vector.broadcast %253 : vector<1x128xf32> to vector<32x128xf32>
    %277 = arith.addf %275, %276 : vector<32x128xf32>
    %c1_109 = arith.constant 1 : index
    %c0_110 = arith.constant 0 : index
    %c0_111 = arith.constant 0 : index
    %278 = vector.load %arg5[%c1_109, %c0_110, %c0_111] : memref<2x128x384xf32, #tpu.memory_space<vmem>>, vector<1x128x384xf32>
    %279 = vector.shape_cast %278 : vector<1x128x384xf32> to vector<128x384xf32>
    %cst_112 = arith.constant dense<0.000000e+00> : vector<32x384xf32>
    %280 = tpu.matmul %277, %279, %cst_112 {dimension_numbers = #tpu.dot_dimension_numbers<[1], [0], [0], [1], [0, 0, 1, 1], [], []>} : vector<32x128xf32>, vector<128x384xf32>, vector<32x384xf32> -> vector<32x384xf32>
    %c1_113 = arith.constant 1 : index
    %c0_114 = arith.constant 0 : index
    %c0_115 = arith.constant 0 : index
    %281 = vector.load %arg6[%c1_113, %c0_114, %c0_115] : memref<2x1x384xf32, #tpu.memory_space<vmem>>, vector<1x1x384xf32>
    %282 = vector.shape_cast %281 : vector<1x1x384xf32> to vector<1x384xf32>
    %283 = vector.broadcast %282 : vector<1x384xf32> to vector<32x384xf32>
    %284 = arith.addf %280, %283 : vector<32x384xf32>
    %285 = vector.extract_strided_slice %284 {offsets = [0, 0], sizes = [8, 32], strides = [1, 1]} : vector<32x384xf32> to vector<8x32xf32>
    %286 = vector.extract_strided_slice %284 {offsets = [0, 128], sizes = [8, 32], strides = [1, 1]} : vector<32x384xf32> to vector<8x32xf32>
    %cst_116 = arith.constant dense<0.000000e+00> : vector<8x8xf32>
    %287 = tpu.matmul %285, %286, %cst_116 {dimension_numbers = #tpu.dot_dimension_numbers<[1], [1], [0], [0], [0, 0, 1, 0], [], []>} : vector<8x32xf32>, vector<8x32xf32>, vector<8x8xf32> -> vector<8x8xf32>
    %cst_117 = arith.constant 2.500000e-01 : f32
    %288 = vector.broadcast %cst_117 : f32 to vector<8x8xf32>
    %289 = arith.mulf %287, %288 : vector<8x8xf32>
    %290 = vector.extract_strided_slice %284 {offsets = [0, 32], sizes = [8, 32], strides = [1, 1]} : vector<32x384xf32> to vector<8x32xf32>
    %291 = vector.extract_strided_slice %284 {offsets = [0, 160], sizes = [8, 32], strides = [1, 1]} : vector<32x384xf32> to vector<8x32xf32>
    %cst_118 = arith.constant dense<0.000000e+00> : vector<8x8xf32>
    %292 = tpu.matmul %290, %291, %cst_118 {dimension_numbers = #tpu.dot_dimension_numbers<[1], [1], [0], [0], [0, 0, 1, 0], [], []>} : vector<8x32xf32>, vector<8x32xf32>, vector<8x8xf32> -> vector<8x8xf32>
    %cst_119 = arith.constant 2.500000e-01 : f32
    %293 = vector.broadcast %cst_119 : f32 to vector<8x8xf32>
    %294 = arith.mulf %292, %293 : vector<8x8xf32>
    %295 = vector.extract_strided_slice %284 {offsets = [0, 64], sizes = [8, 32], strides = [1, 1]} : vector<32x384xf32> to vector<8x32xf32>
    %296 = vector.extract_strided_slice %284 {offsets = [0, 192], sizes = [8, 32], strides = [1, 1]} : vector<32x384xf32> to vector<8x32xf32>
    %cst_120 = arith.constant dense<0.000000e+00> : vector<8x8xf32>
    %297 = tpu.matmul %295, %296, %cst_120 {dimension_numbers = #tpu.dot_dimension_numbers<[1], [1], [0], [0], [0, 0, 1, 0], [], []>} : vector<8x32xf32>, vector<8x32xf32>, vector<8x8xf32> -> vector<8x8xf32>
    %cst_121 = arith.constant 2.500000e-01 : f32
    %298 = vector.broadcast %cst_121 : f32 to vector<8x8xf32>
    %299 = arith.mulf %297, %298 : vector<8x8xf32>
    %300 = vector.extract_strided_slice %284 {offsets = [0, 96], sizes = [8, 32], strides = [1, 1]} : vector<32x384xf32> to vector<8x32xf32>
    %301 = vector.extract_strided_slice %284 {offsets = [0, 224], sizes = [8, 32], strides = [1, 1]} : vector<32x384xf32> to vector<8x32xf32>
    %cst_122 = arith.constant dense<0.000000e+00> : vector<8x8xf32>
    %302 = tpu.matmul %300, %301, %cst_122 {dimension_numbers = #tpu.dot_dimension_numbers<[1], [1], [0], [0], [0, 0, 1, 0], [], []>} : vector<8x32xf32>, vector<8x32xf32>, vector<8x8xf32> -> vector<8x8xf32>
    %cst_123 = arith.constant 2.500000e-01 : f32
    %303 = vector.broadcast %cst_123 : f32 to vector<8x8xf32>
    %304 = arith.mulf %302, %303 : vector<8x8xf32>
    %305 = vector.extract_strided_slice %284 {offsets = [8, 0], sizes = [8, 32], strides = [1, 1]} : vector<32x384xf32> to vector<8x32xf32>
    %306 = vector.extract_strided_slice %284 {offsets = [8, 128], sizes = [8, 32], strides = [1, 1]} : vector<32x384xf32> to vector<8x32xf32>
    %cst_124 = arith.constant dense<0.000000e+00> : vector<8x8xf32>
    %307 = tpu.matmul %305, %306, %cst_124 {dimension_numbers = #tpu.dot_dimension_numbers<[1], [1], [0], [0], [0, 0, 1, 0], [], []>} : vector<8x32xf32>, vector<8x32xf32>, vector<8x8xf32> -> vector<8x8xf32>
    %cst_125 = arith.constant 2.500000e-01 : f32
    %308 = vector.broadcast %cst_125 : f32 to vector<8x8xf32>
    %309 = arith.mulf %307, %308 : vector<8x8xf32>
    %310 = vector.extract_strided_slice %284 {offsets = [8, 32], sizes = [8, 32], strides = [1, 1]} : vector<32x384xf32> to vector<8x32xf32>
    %311 = vector.extract_strided_slice %284 {offsets = [8, 160], sizes = [8, 32], strides = [1, 1]} : vector<32x384xf32> to vector<8x32xf32>
    %cst_126 = arith.constant dense<0.000000e+00> : vector<8x8xf32>
    %312 = tpu.matmul %310, %311, %cst_126 {dimension_numbers = #tpu.dot_dimension_numbers<[1], [1], [0], [0], [0, 0, 1, 0], [], []>} : vector<8x32xf32>, vector<8x32xf32>, vector<8x8xf32> -> vector<8x8xf32>
    %cst_127 = arith.constant 2.500000e-01 : f32
    %313 = vector.broadcast %cst_127 : f32 to vector<8x8xf32>
    %314 = arith.mulf %312, %313 : vector<8x8xf32>
    %315 = vector.extract_strided_slice %284 {offsets = [8, 64], sizes = [8, 32], strides = [1, 1]} : vector<32x384xf32> to vector<8x32xf32>
    %316 = vector.extract_strided_slice %284 {offsets = [8, 192], sizes = [8, 32], strides = [1, 1]} : vector<32x384xf32> to vector<8x32xf32>
    %cst_128 = arith.constant dense<0.000000e+00> : vector<8x8xf32>
    %317 = tpu.matmul %315, %316, %cst_128 {dimension_numbers = #tpu.dot_dimension_numbers<[1], [1], [0], [0], [0, 0, 1, 0], [], []>} : vector<8x32xf32>, vector<8x32xf32>, vector<8x8xf32> -> vector<8x8xf32>
    %cst_129 = arith.constant 2.500000e-01 : f32
    %318 = vector.broadcast %cst_129 : f32 to vector<8x8xf32>
    %319 = arith.mulf %317, %318 : vector<8x8xf32>
    %320 = vector.extract_strided_slice %284 {offsets = [8, 96], sizes = [8, 32], strides = [1, 1]} : vector<32x384xf32> to vector<8x32xf32>
    %321 = vector.extract_strided_slice %284 {offsets = [8, 224], sizes = [8, 32], strides = [1, 1]} : vector<32x384xf32> to vector<8x32xf32>
    %cst_130 = arith.constant dense<0.000000e+00> : vector<8x8xf32>
    %322 = tpu.matmul %320, %321, %cst_130 {dimension_numbers = #tpu.dot_dimension_numbers<[1], [1], [0], [0], [0, 0, 1, 0], [], []>} : vector<8x32xf32>, vector<8x32xf32>, vector<8x8xf32> -> vector<8x8xf32>
    %cst_131 = arith.constant 2.500000e-01 : f32
    %323 = vector.broadcast %cst_131 : f32 to vector<8x8xf32>
    %324 = arith.mulf %322, %323 : vector<8x8xf32>
    %325 = vector.extract_strided_slice %284 {offsets = [16, 0], sizes = [8, 32], strides = [1, 1]} : vector<32x384xf32> to vector<8x32xf32>
    %326 = vector.extract_strided_slice %284 {offsets = [16, 128], sizes = [8, 32], strides = [1, 1]} : vector<32x384xf32> to vector<8x32xf32>
    %cst_132 = arith.constant dense<0.000000e+00> : vector<8x8xf32>
    %327 = tpu.matmul %325, %326, %cst_132 {dimension_numbers = #tpu.dot_dimension_numbers<[1], [1], [0], [0], [0, 0, 1, 0], [], []>} : vector<8x32xf32>, vector<8x32xf32>, vector<8x8xf32> -> vector<8x8xf32>
    %cst_133 = arith.constant 2.500000e-01 : f32
    %328 = vector.broadcast %cst_133 : f32 to vector<8x8xf32>
    %329 = arith.mulf %327, %328 : vector<8x8xf32>
    %330 = vector.extract_strided_slice %284 {offsets = [16, 32], sizes = [8, 32], strides = [1, 1]} : vector<32x384xf32> to vector<8x32xf32>
    %331 = vector.extract_strided_slice %284 {offsets = [16, 160], sizes = [8, 32], strides = [1, 1]} : vector<32x384xf32> to vector<8x32xf32>
    %cst_134 = arith.constant dense<0.000000e+00> : vector<8x8xf32>
    %332 = tpu.matmul %330, %331, %cst_134 {dimension_numbers = #tpu.dot_dimension_numbers<[1], [1], [0], [0], [0, 0, 1, 0], [], []>} : vector<8x32xf32>, vector<8x32xf32>, vector<8x8xf32> -> vector<8x8xf32>
    %cst_135 = arith.constant 2.500000e-01 : f32
    %333 = vector.broadcast %cst_135 : f32 to vector<8x8xf32>
    %334 = arith.mulf %332, %333 : vector<8x8xf32>
    %335 = vector.extract_strided_slice %284 {offsets = [16, 64], sizes = [8, 32], strides = [1, 1]} : vector<32x384xf32> to vector<8x32xf32>
    %336 = vector.extract_strided_slice %284 {offsets = [16, 192], sizes = [8, 32], strides = [1, 1]} : vector<32x384xf32> to vector<8x32xf32>
    %cst_136 = arith.constant dense<0.000000e+00> : vector<8x8xf32>
    %337 = tpu.matmul %335, %336, %cst_136 {dimension_numbers = #tpu.dot_dimension_numbers<[1], [1], [0], [0], [0, 0, 1, 0], [], []>} : vector<8x32xf32>, vector<8x32xf32>, vector<8x8xf32> -> vector<8x8xf32>
    %cst_137 = arith.constant 2.500000e-01 : f32
    %338 = vector.broadcast %cst_137 : f32 to vector<8x8xf32>
    %339 = arith.mulf %337, %338 : vector<8x8xf32>
    %340 = vector.extract_strided_slice %284 {offsets = [16, 96], sizes = [8, 32], strides = [1, 1]} : vector<32x384xf32> to vector<8x32xf32>
    %341 = vector.extract_strided_slice %284 {offsets = [16, 224], sizes = [8, 32], strides = [1, 1]} : vector<32x384xf32> to vector<8x32xf32>
    %cst_138 = arith.constant dense<0.000000e+00> : vector<8x8xf32>
    %342 = tpu.matmul %340, %341, %cst_138 {dimension_numbers = #tpu.dot_dimension_numbers<[1], [1], [0], [0], [0, 0, 1, 0], [], []>} : vector<8x32xf32>, vector<8x32xf32>, vector<8x8xf32> -> vector<8x8xf32>
    %cst_139 = arith.constant 2.500000e-01 : f32
    %343 = vector.broadcast %cst_139 : f32 to vector<8x8xf32>
    %344 = arith.mulf %342, %343 : vector<8x8xf32>
    %345 = vector.extract_strided_slice %284 {offsets = [24, 0], sizes = [8, 32], strides = [1, 1]} : vector<32x384xf32> to vector<8x32xf32>
    %346 = vector.extract_strided_slice %284 {offsets = [24, 128], sizes = [8, 32], strides = [1, 1]} : vector<32x384xf32> to vector<8x32xf32>
    %cst_140 = arith.constant dense<0.000000e+00> : vector<8x8xf32>
    %347 = tpu.matmul %345, %346, %cst_140 {dimension_numbers = #tpu.dot_dimension_numbers<[1], [1], [0], [0], [0, 0, 1, 0], [], []>} : vector<8x32xf32>, vector<8x32xf32>, vector<8x8xf32> -> vector<8x8xf32>
    %cst_141 = arith.constant 2.500000e-01 : f32
    %348 = vector.broadcast %cst_141 : f32 to vector<8x8xf32>
    %349 = arith.mulf %347, %348 : vector<8x8xf32>
    %350 = vector.extract_strided_slice %284 {offsets = [24, 32], sizes = [8, 32], strides = [1, 1]} : vector<32x384xf32> to vector<8x32xf32>
    %351 = vector.extract_strided_slice %284 {offsets = [24, 160], sizes = [8, 32], strides = [1, 1]} : vector<32x384xf32> to vector<8x32xf32>
    %cst_142 = arith.constant dense<0.000000e+00> : vector<8x8xf32>
    %352 = tpu.matmul %350, %351, %cst_142 {dimension_numbers = #tpu.dot_dimension_numbers<[1], [1], [0], [0], [0, 0, 1, 0], [], []>} : vector<8x32xf32>, vector<8x32xf32>, vector<8x8xf32> -> vector<8x8xf32>
    %cst_143 = arith.constant 2.500000e-01 : f32
    %353 = vector.broadcast %cst_143 : f32 to vector<8x8xf32>
    %354 = arith.mulf %352, %353 : vector<8x8xf32>
    %355 = vector.extract_strided_slice %284 {offsets = [24, 64], sizes = [8, 32], strides = [1, 1]} : vector<32x384xf32> to vector<8x32xf32>
    %356 = vector.extract_strided_slice %284 {offsets = [24, 192], sizes = [8, 32], strides = [1, 1]} : vector<32x384xf32> to vector<8x32xf32>
    %cst_144 = arith.constant dense<0.000000e+00> : vector<8x8xf32>
    %357 = tpu.matmul %355, %356, %cst_144 {dimension_numbers = #tpu.dot_dimension_numbers<[1], [1], [0], [0], [0, 0, 1, 0], [], []>} : vector<8x32xf32>, vector<8x32xf32>, vector<8x8xf32> -> vector<8x8xf32>
    %cst_145 = arith.constant 2.500000e-01 : f32
    %358 = vector.broadcast %cst_145 : f32 to vector<8x8xf32>
    %359 = arith.mulf %357, %358 : vector<8x8xf32>
    %360 = vector.extract_strided_slice %284 {offsets = [24, 96], sizes = [8, 32], strides = [1, 1]} : vector<32x384xf32> to vector<8x32xf32>
    %361 = vector.extract_strided_slice %284 {offsets = [24, 224], sizes = [8, 32], strides = [1, 1]} : vector<32x384xf32> to vector<8x32xf32>
    %cst_146 = arith.constant dense<0.000000e+00> : vector<8x8xf32>
    %362 = tpu.matmul %360, %361, %cst_146 {dimension_numbers = #tpu.dot_dimension_numbers<[1], [1], [0], [0], [0, 0, 1, 0], [], []>} : vector<8x32xf32>, vector<8x32xf32>, vector<8x8xf32> -> vector<8x8xf32>
    %cst_147 = arith.constant 2.500000e-01 : f32
    %363 = vector.broadcast %cst_147 : f32 to vector<8x8xf32>
    %364 = arith.mulf %362, %363 : vector<8x8xf32>
    %365 = tpu.concatenate %289, %294, %299, %304, %309, %314, %319, %324, %329, %334, %339, %344, %349, %354, %359, %364 in 0 : vector<8x8xf32>, vector<8x8xf32>, vector<8x8xf32>, vector<8x8xf32>, vector<8x8xf32>, vector<8x8xf32>, vector<8x8xf32>, vector<8x8xf32>, vector<8x8xf32>, vector<8x8xf32>, vector<8x8xf32>, vector<8x8xf32>, vector<8x8xf32>, vector<8x8xf32>, vector<8x8xf32>, vector<8x8xf32> -> vector<128x8xf32>
    %366 = vector.broadcast %5 : vector<1x8xf32> to vector<128x8xf32>
    %367 = arith.addf %365, %366 : vector<128x8xf32>
    %cst_148 = arith.constant dense<0xFF800000> : vector<128xf32>
    %368 = vector.multi_reduction <maximumf>, %367, %cst_148 [1] : vector<128x8xf32> to vector<128xf32>
    %369 = vector.shape_cast %368 : vector<128xf32> to vector<128x1xf32>
    %370 = vector.broadcast %369 : vector<128x1xf32> to vector<128x8xf32>
    %371 = arith.subf %367, %370 : vector<128x8xf32>
    %372 = math.exp %371 : vector<128x8xf32>
    %cst_149 = arith.constant dense<0.000000e+00> : vector<128xf32>
    %373 = vector.multi_reduction <add>, %372, %cst_149 [1] : vector<128x8xf32> to vector<128xf32>
    %374 = vector.shape_cast %373 : vector<128xf32> to vector<128x1xf32>
    %375 = tpu.reciprocal %374 {approx = true} : vector<128x1xf32> -> vector<128x1xf32>
    %376 = vector.broadcast %375 : vector<128x1xf32> to vector<128x8xf32>
    %377 = arith.mulf %372, %376 : vector<128x8xf32>
    %378 = vector.extract_strided_slice %284 {offsets = [0, 256], sizes = [8, 32], strides = [1, 1]} : vector<32x384xf32> to vector<8x32xf32>
    %379 = vector.extract_strided_slice %377 {offsets = [0, 0], sizes = [8, 8], strides = [1, 1]} : vector<128x8xf32> to vector<8x8xf32>
    %cst_150 = arith.constant dense<0.000000e+00> : vector<8x32xf32>
    %380 = tpu.matmul %379, %378, %cst_150 {dimension_numbers = #tpu.dot_dimension_numbers<[1], [0], [0], [1], [0, 0, 1, 1], [], []>} : vector<8x8xf32>, vector<8x32xf32>, vector<8x32xf32> -> vector<8x32xf32>
    %381 = vector.extract_strided_slice %284 {offsets = [0, 288], sizes = [8, 32], strides = [1, 1]} : vector<32x384xf32> to vector<8x32xf32>
    %382 = vector.extract_strided_slice %377 {offsets = [8, 0], sizes = [8, 8], strides = [1, 1]} : vector<128x8xf32> to vector<8x8xf32>
    %cst_151 = arith.constant dense<0.000000e+00> : vector<8x32xf32>
    %383 = tpu.matmul %382, %381, %cst_151 {dimension_numbers = #tpu.dot_dimension_numbers<[1], [0], [0], [1], [0, 0, 1, 1], [], []>} : vector<8x8xf32>, vector<8x32xf32>, vector<8x32xf32> -> vector<8x32xf32>
    %384 = vector.extract_strided_slice %284 {offsets = [0, 320], sizes = [8, 32], strides = [1, 1]} : vector<32x384xf32> to vector<8x32xf32>
    %385 = vector.extract_strided_slice %377 {offsets = [16, 0], sizes = [8, 8], strides = [1, 1]} : vector<128x8xf32> to vector<8x8xf32>
    %cst_152 = arith.constant dense<0.000000e+00> : vector<8x32xf32>
    %386 = tpu.matmul %385, %384, %cst_152 {dimension_numbers = #tpu.dot_dimension_numbers<[1], [0], [0], [1], [0, 0, 1, 1], [], []>} : vector<8x8xf32>, vector<8x32xf32>, vector<8x32xf32> -> vector<8x32xf32>
    %387 = vector.extract_strided_slice %284 {offsets = [0, 352], sizes = [8, 32], strides = [1, 1]} : vector<32x384xf32> to vector<8x32xf32>
    %388 = vector.extract_strided_slice %377 {offsets = [24, 0], sizes = [8, 8], strides = [1, 1]} : vector<128x8xf32> to vector<8x8xf32>
    %cst_153 = arith.constant dense<0.000000e+00> : vector<8x32xf32>
    %389 = tpu.matmul %388, %387, %cst_153 {dimension_numbers = #tpu.dot_dimension_numbers<[1], [0], [0], [1], [0, 0, 1, 1], [], []>} : vector<8x8xf32>, vector<8x32xf32>, vector<8x32xf32> -> vector<8x32xf32>
    %390 = tpu.concatenate %380, %383, %386, %389 in 1 : vector<8x32xf32>, vector<8x32xf32>, vector<8x32xf32>, vector<8x32xf32> -> vector<8x128xf32>
    %391 = vector.extract_strided_slice %284 {offsets = [8, 256], sizes = [8, 32], strides = [1, 1]} : vector<32x384xf32> to vector<8x32xf32>
    %392 = vector.extract_strided_slice %377 {offsets = [32, 0], sizes = [8, 8], strides = [1, 1]} : vector<128x8xf32> to vector<8x8xf32>
    %cst_154 = arith.constant dense<0.000000e+00> : vector<8x32xf32>
    %393 = tpu.matmul %392, %391, %cst_154 {dimension_numbers = #tpu.dot_dimension_numbers<[1], [0], [0], [1], [0, 0, 1, 1], [], []>} : vector<8x8xf32>, vector<8x32xf32>, vector<8x32xf32> -> vector<8x32xf32>
    %394 = vector.extract_strided_slice %284 {offsets = [8, 288], sizes = [8, 32], strides = [1, 1]} : vector<32x384xf32> to vector<8x32xf32>
    %395 = vector.extract_strided_slice %377 {offsets = [40, 0], sizes = [8, 8], strides = [1, 1]} : vector<128x8xf32> to vector<8x8xf32>
    %cst_155 = arith.constant dense<0.000000e+00> : vector<8x32xf32>
    %396 = tpu.matmul %395, %394, %cst_155 {dimension_numbers = #tpu.dot_dimension_numbers<[1], [0], [0], [1], [0, 0, 1, 1], [], []>} : vector<8x8xf32>, vector<8x32xf32>, vector<8x32xf32> -> vector<8x32xf32>
    %397 = vector.extract_strided_slice %284 {offsets = [8, 320], sizes = [8, 32], strides = [1, 1]} : vector<32x384xf32> to vector<8x32xf32>
    %398 = vector.extract_strided_slice %377 {offsets = [48, 0], sizes = [8, 8], strides = [1, 1]} : vector<128x8xf32> to vector<8x8xf32>
    %cst_156 = arith.constant dense<0.000000e+00> : vector<8x32xf32>
    %399 = tpu.matmul %398, %397, %cst_156 {dimension_numbers = #tpu.dot_dimension_numbers<[1], [0], [0], [1], [0, 0, 1, 1], [], []>} : vector<8x8xf32>, vector<8x32xf32>, vector<8x32xf32> -> vector<8x32xf32>
    %400 = vector.extract_strided_slice %284 {offsets = [8, 352], sizes = [8, 32], strides = [1, 1]} : vector<32x384xf32> to vector<8x32xf32>
    %401 = vector.extract_strided_slice %377 {offsets = [56, 0], sizes = [8, 8], strides = [1, 1]} : vector<128x8xf32> to vector<8x8xf32>
    %cst_157 = arith.constant dense<0.000000e+00> : vector<8x32xf32>
    %402 = tpu.matmul %401, %400, %cst_157 {dimension_numbers = #tpu.dot_dimension_numbers<[1], [0], [0], [1], [0, 0, 1, 1], [], []>} : vector<8x8xf32>, vector<8x32xf32>, vector<8x32xf32> -> vector<8x32xf32>
    %403 = tpu.concatenate %393, %396, %399, %402 in 1 : vector<8x32xf32>, vector<8x32xf32>, vector<8x32xf32>, vector<8x32xf32> -> vector<8x128xf32>
    %404 = vector.extract_strided_slice %284 {offsets = [16, 256], sizes = [8, 32], strides = [1, 1]} : vector<32x384xf32> to vector<8x32xf32>
    %405 = vector.extract_strided_slice %377 {offsets = [64, 0], sizes = [8, 8], strides = [1, 1]} : vector<128x8xf32> to vector<8x8xf32>
    %cst_158 = arith.constant dense<0.000000e+00> : vector<8x32xf32>
    %406 = tpu.matmul %405, %404, %cst_158 {dimension_numbers = #tpu.dot_dimension_numbers<[1], [0], [0], [1], [0, 0, 1, 1], [], []>} : vector<8x8xf32>, vector<8x32xf32>, vector<8x32xf32> -> vector<8x32xf32>
    %407 = vector.extract_strided_slice %284 {offsets = [16, 288], sizes = [8, 32], strides = [1, 1]} : vector<32x384xf32> to vector<8x32xf32>
    %408 = vector.extract_strided_slice %377 {offsets = [72, 0], sizes = [8, 8], strides = [1, 1]} : vector<128x8xf32> to vector<8x8xf32>
    %cst_159 = arith.constant dense<0.000000e+00> : vector<8x32xf32>
    %409 = tpu.matmul %408, %407, %cst_159 {dimension_numbers = #tpu.dot_dimension_numbers<[1], [0], [0], [1], [0, 0, 1, 1], [], []>} : vector<8x8xf32>, vector<8x32xf32>, vector<8x32xf32> -> vector<8x32xf32>
    %410 = vector.extract_strided_slice %284 {offsets = [16, 320], sizes = [8, 32], strides = [1, 1]} : vector<32x384xf32> to vector<8x32xf32>
    %411 = vector.extract_strided_slice %377 {offsets = [80, 0], sizes = [8, 8], strides = [1, 1]} : vector<128x8xf32> to vector<8x8xf32>
    %cst_160 = arith.constant dense<0.000000e+00> : vector<8x32xf32>
    %412 = tpu.matmul %411, %410, %cst_160 {dimension_numbers = #tpu.dot_dimension_numbers<[1], [0], [0], [1], [0, 0, 1, 1], [], []>} : vector<8x8xf32>, vector<8x32xf32>, vector<8x32xf32> -> vector<8x32xf32>
    %413 = vector.extract_strided_slice %284 {offsets = [16, 352], sizes = [8, 32], strides = [1, 1]} : vector<32x384xf32> to vector<8x32xf32>
    %414 = vector.extract_strided_slice %377 {offsets = [88, 0], sizes = [8, 8], strides = [1, 1]} : vector<128x8xf32> to vector<8x8xf32>
    %cst_161 = arith.constant dense<0.000000e+00> : vector<8x32xf32>
    %415 = tpu.matmul %414, %413, %cst_161 {dimension_numbers = #tpu.dot_dimension_numbers<[1], [0], [0], [1], [0, 0, 1, 1], [], []>} : vector<8x8xf32>, vector<8x32xf32>, vector<8x32xf32> -> vector<8x32xf32>
    %416 = tpu.concatenate %406, %409, %412, %415 in 1 : vector<8x32xf32>, vector<8x32xf32>, vector<8x32xf32>, vector<8x32xf32> -> vector<8x128xf32>
    %417 = vector.extract_strided_slice %284 {offsets = [24, 256], sizes = [8, 32], strides = [1, 1]} : vector<32x384xf32> to vector<8x32xf32>
    %418 = vector.extract_strided_slice %377 {offsets = [96, 0], sizes = [8, 8], strides = [1, 1]} : vector<128x8xf32> to vector<8x8xf32>
    %cst_162 = arith.constant dense<0.000000e+00> : vector<8x32xf32>
    %419 = tpu.matmul %418, %417, %cst_162 {dimension_numbers = #tpu.dot_dimension_numbers<[1], [0], [0], [1], [0, 0, 1, 1], [], []>} : vector<8x8xf32>, vector<8x32xf32>, vector<8x32xf32> -> vector<8x32xf32>
    %420 = vector.extract_strided_slice %284 {offsets = [24, 288], sizes = [8, 32], strides = [1, 1]} : vector<32x384xf32> to vector<8x32xf32>
    %421 = vector.extract_strided_slice %377 {offsets = [104, 0], sizes = [8, 8], strides = [1, 1]} : vector<128x8xf32> to vector<8x8xf32>
    %cst_163 = arith.constant dense<0.000000e+00> : vector<8x32xf32>
    %422 = tpu.matmul %421, %420, %cst_163 {dimension_numbers = #tpu.dot_dimension_numbers<[1], [0], [0], [1], [0, 0, 1, 1], [], []>} : vector<8x8xf32>, vector<8x32xf32>, vector<8x32xf32> -> vector<8x32xf32>
    %423 = vector.extract_strided_slice %284 {offsets = [24, 320], sizes = [8, 32], strides = [1, 1]} : vector<32x384xf32> to vector<8x32xf32>
    %424 = vector.extract_strided_slice %377 {offsets = [112, 0], sizes = [8, 8], strides = [1, 1]} : vector<128x8xf32> to vector<8x8xf32>
    %cst_164 = arith.constant dense<0.000000e+00> : vector<8x32xf32>
    %425 = tpu.matmul %424, %423, %cst_164 {dimension_numbers = #tpu.dot_dimension_numbers<[1], [0], [0], [1], [0, 0, 1, 1], [], []>} : vector<8x8xf32>, vector<8x32xf32>, vector<8x32xf32> -> vector<8x32xf32>
    %426 = vector.extract_strided_slice %284 {offsets = [24, 352], sizes = [8, 32], strides = [1, 1]} : vector<32x384xf32> to vector<8x32xf32>
    %427 = vector.extract_strided_slice %377 {offsets = [120, 0], sizes = [8, 8], strides = [1, 1]} : vector<128x8xf32> to vector<8x8xf32>
    %cst_165 = arith.constant dense<0.000000e+00> : vector<8x32xf32>
    %428 = tpu.matmul %427, %426, %cst_165 {dimension_numbers = #tpu.dot_dimension_numbers<[1], [0], [0], [1], [0, 0, 1, 1], [], []>} : vector<8x8xf32>, vector<8x32xf32>, vector<8x32xf32> -> vector<8x32xf32>
    %429 = tpu.concatenate %419, %422, %425, %428 in 1 : vector<8x32xf32>, vector<8x32xf32>, vector<8x32xf32>, vector<8x32xf32> -> vector<8x128xf32>
    %430 = tpu.concatenate %390, %403, %416, %429 in 0 : vector<8x128xf32>, vector<8x128xf32>, vector<8x128xf32>, vector<8x128xf32> -> vector<32x128xf32>
    %c1_166 = arith.constant 1 : index
    %c0_167 = arith.constant 0 : index
    %c0_168 = arith.constant 0 : index
    %431 = vector.load %arg7[%c1_166, %c0_167, %c0_168] : memref<2x128x128xf32, #tpu.memory_space<vmem>>, vector<1x128x128xf32>
    %432 = vector.shape_cast %431 : vector<1x128x128xf32> to vector<128x128xf32>
    %cst_169 = arith.constant dense<0.000000e+00> : vector<32x128xf32>
    %433 = tpu.matmul %430, %432, %cst_169 {dimension_numbers = #tpu.dot_dimension_numbers<[1], [0], [0], [1], [0, 0, 1, 1], [], []>} : vector<32x128xf32>, vector<128x128xf32>, vector<32x128xf32> -> vector<32x128xf32>
    %434 = arith.addf %249, %433 : vector<32x128xf32>
    %c1_170 = arith.constant 1 : index
    %c0_171 = arith.constant 0 : index
    %c0_172 = arith.constant 0 : index
    %435 = vector.load %arg8[%c1_170, %c0_171, %c0_172] : memref<2x1x128xf32, #tpu.memory_space<vmem>>, vector<1x1x128xf32>
    %436 = vector.shape_cast %435 : vector<1x1x128xf32> to vector<1x128xf32>
    %437 = vector.broadcast %436 : vector<1x128xf32> to vector<32x128xf32>
    %438 = arith.addf %434, %437 : vector<32x128xf32>
    %cst_173 = arith.constant dense<0.000000e+00> : vector<32xf32>
    %439 = vector.multi_reduction <add>, %438, %cst_173 [1] : vector<32x128xf32> to vector<32xf32>
    %440 = vector.shape_cast %439 : vector<32xf32> to vector<32x1xf32>
    %441 = arith.mulf %438, %438 : vector<32x128xf32>
    %cst_174 = arith.constant dense<0.000000e+00> : vector<32xf32>
    %442 = vector.multi_reduction <add>, %441, %cst_174 [1] : vector<32x128xf32> to vector<32xf32>
    %443 = vector.shape_cast %442 : vector<32xf32> to vector<32x1xf32>
    %cst_175 = arith.constant 1.562500e-02 : f32
    %444 = vector.broadcast %cst_175 : f32 to vector<32x1xf32>
    %445 = arith.mulf %440, %444 : vector<32x1xf32>
    %cst_176 = arith.constant 1.562500e-02 : f32
    %446 = vector.broadcast %cst_176 : f32 to vector<32x1xf32>
    %447 = arith.mulf %443, %446 : vector<32x1xf32>
    %448 = arith.mulf %445, %445 : vector<32x1xf32>
    %449 = arith.subf %447, %448 : vector<32x1xf32>
    %450 = vector.broadcast %445 : vector<32x1xf32> to vector<32x128xf32>
    %451 = arith.subf %438, %450 : vector<32x128xf32>
    %cst_177 = arith.constant 9.99999997E-7 : f32
    %452 = vector.broadcast %cst_177 : f32 to vector<32x1xf32>
    %453 = arith.addf %449, %452 : vector<32x1xf32>
    %454 = math.rsqrt %453 : vector<32x1xf32>
    %455 = vector.broadcast %454 : vector<32x1xf32> to vector<32x128xf32>
    %456 = arith.mulf %451, %455 : vector<32x128xf32>
    %457 = vector.broadcast %254 : vector<1x128xf32> to vector<32x128xf32>
    %458 = arith.mulf %456, %457 : vector<32x128xf32>
    %459 = vector.broadcast %255 : vector<1x128xf32> to vector<32x128xf32>
    %460 = arith.addf %458, %459 : vector<32x128xf32>
    %c1_178 = arith.constant 1 : index
    %c0_179 = arith.constant 0 : index
    %c0_180 = arith.constant 0 : index
    %461 = vector.load %arg9[%c1_178, %c0_179, %c0_180] : memref<2x128x128xf32, #tpu.memory_space<vmem>>, vector<1x128x128xf32>
    %462 = vector.shape_cast %461 : vector<1x128x128xf32> to vector<128x128xf32>
    %cst_181 = arith.constant dense<0.000000e+00> : vector<32x128xf32>
    %463 = tpu.matmul %460, %462, %cst_181 {dimension_numbers = #tpu.dot_dimension_numbers<[1], [0], [0], [1], [0, 0, 1, 1], [], []>} : vector<32x128xf32>, vector<128x128xf32>, vector<32x128xf32> -> vector<32x128xf32>
    %c1_182 = arith.constant 1 : index
    %c0_183 = arith.constant 0 : index
    %c0_184 = arith.constant 0 : index
    %464 = vector.load %arg10[%c1_182, %c0_183, %c0_184] : memref<2x1x128xf32, #tpu.memory_space<vmem>>, vector<1x1x128xf32>
    %465 = vector.shape_cast %464 : vector<1x1x128xf32> to vector<1x128xf32>
    %466 = vector.broadcast %465 : vector<1x128xf32> to vector<32x128xf32>
    %467 = arith.addf %463, %466 : vector<32x128xf32>
    %468 = arith.mulf %467, %467 : vector<32x128xf32>
    %469 = arith.mulf %467, %468 : vector<32x128xf32>
    %cst_185 = arith.constant 4.471500e-02 : f32
    %470 = vector.broadcast %cst_185 : f32 to vector<32x128xf32>
    %471 = arith.mulf %470, %469 : vector<32x128xf32>
    %472 = arith.addf %467, %471 : vector<32x128xf32>
    %cst_186 = arith.constant 0.797884583 : f32
    %473 = vector.broadcast %cst_186 : f32 to vector<32x128xf32>
    %474 = arith.mulf %473, %472 : vector<32x128xf32>
    %475 = math.tanh %474 : vector<32x128xf32>
    %cst_187 = arith.constant 1.000000e+00 : f32
    %476 = vector.broadcast %cst_187 : f32 to vector<32x128xf32>
    %477 = arith.addf %476, %475 : vector<32x128xf32>
    %cst_188 = arith.constant 5.000000e-01 : f32
    %478 = vector.broadcast %cst_188 : f32 to vector<32x128xf32>
    %479 = arith.mulf %478, %477 : vector<32x128xf32>
    %480 = arith.mulf %467, %479 : vector<32x128xf32>
    %c1_189 = arith.constant 1 : index
    %c0_190 = arith.constant 0 : index
    %c0_191 = arith.constant 0 : index
    %481 = vector.load %arg11[%c1_189, %c0_190, %c0_191] : memref<2x128x128xf32, #tpu.memory_space<vmem>>, vector<1x128x128xf32>
    %482 = vector.shape_cast %481 : vector<1x128x128xf32> to vector<128x128xf32>
    %cst_192 = arith.constant dense<0.000000e+00> : vector<32x128xf32>
    %483 = tpu.matmul %480, %482, %cst_192 {dimension_numbers = #tpu.dot_dimension_numbers<[1], [0], [0], [1], [0, 0, 1, 1], [], []>} : vector<32x128xf32>, vector<128x128xf32>, vector<32x128xf32> -> vector<32x128xf32>
    %484 = arith.addf %438, %483 : vector<32x128xf32>
    %c1_193 = arith.constant 1 : index
    %c0_194 = arith.constant 0 : index
    %c0_195 = arith.constant 0 : index
    %485 = vector.load %arg12[%c1_193, %c0_194, %c0_195] : memref<2x1x128xf32, #tpu.memory_space<vmem>>, vector<1x1x128xf32>
    %486 = vector.shape_cast %485 : vector<1x1x128xf32> to vector<1x128xf32>
    %487 = vector.broadcast %486 : vector<1x128xf32> to vector<32x128xf32>
    %488 = arith.addf %484, %487 : vector<32x128xf32>
    %489 = vector.extract_strided_slice %488 {offsets = [0, 0], sizes = [1, 128], strides = [1, 1]} : vector<32x128xf32> to vector<1x128xf32>
    %490 = vector.extract_strided_slice %488 {offsets = [8, 0], sizes = [1, 128], strides = [1, 1]} : vector<32x128xf32> to vector<1x128xf32>
    %491 = vector.extract_strided_slice %488 {offsets = [16, 0], sizes = [1, 128], strides = [1, 1]} : vector<32x128xf32> to vector<1x128xf32>
    %492 = vector.extract_strided_slice %488 {offsets = [24, 0], sizes = [1, 128], strides = [1, 1]} : vector<32x128xf32> to vector<1x128xf32>
    %493 = tpu.concatenate %489, %490, %491, %492 in 0 : vector<1x128xf32>, vector<1x128xf32>, vector<1x128xf32>, vector<1x128xf32> -> vector<4x128xf32>
    %c0_196 = arith.constant 0 : index
    %c0_197 = arith.constant 0 : index
    %494 = vector.load %arg13[%c0_196, %c0_197] : memref<2x128xf32, #tpu.memory_space<vmem>>, vector<1x128xf32>
    %c1_198 = arith.constant 1 : index
    %c0_199 = arith.constant 0 : index
    %495 = vector.load %arg13[%c1_198, %c0_199] : memref<2x128xf32, #tpu.memory_space<vmem>>, vector<1x128xf32>
    %cst_200 = arith.constant dense<0.000000e+00> : vector<4xf32>
    %496 = vector.multi_reduction <add>, %493, %cst_200 [1] : vector<4x128xf32> to vector<4xf32>
    %497 = vector.shape_cast %496 : vector<4xf32> to vector<4x1xf32>
    %498 = arith.mulf %493, %493 : vector<4x128xf32>
    %cst_201 = arith.constant dense<0.000000e+00> : vector<4xf32>
    %499 = vector.multi_reduction <add>, %498, %cst_201 [1] : vector<4x128xf32> to vector<4xf32>
    %500 = vector.shape_cast %499 : vector<4xf32> to vector<4x1xf32>
    %cst_202 = arith.constant 1.562500e-02 : f32
    %501 = vector.broadcast %cst_202 : f32 to vector<4x1xf32>
    %502 = arith.mulf %497, %501 : vector<4x1xf32>
    %cst_203 = arith.constant 1.562500e-02 : f32
    %503 = vector.broadcast %cst_203 : f32 to vector<4x1xf32>
    %504 = arith.mulf %500, %503 : vector<4x1xf32>
    %505 = arith.mulf %502, %502 : vector<4x1xf32>
    %506 = arith.subf %504, %505 : vector<4x1xf32>
    %507 = vector.broadcast %502 : vector<4x1xf32> to vector<4x128xf32>
    %508 = arith.subf %493, %507 : vector<4x128xf32>
    %cst_204 = arith.constant 9.99999997E-7 : f32
    %509 = vector.broadcast %cst_204 : f32 to vector<4x1xf32>
    %510 = arith.addf %506, %509 : vector<4x1xf32>
    %511 = math.rsqrt %510 : vector<4x1xf32>
    %512 = vector.broadcast %511 : vector<4x1xf32> to vector<4x128xf32>
    %513 = arith.mulf %508, %512 : vector<4x128xf32>
    %514 = vector.broadcast %494 : vector<1x128xf32> to vector<4x128xf32>
    %515 = arith.mulf %513, %514 : vector<4x128xf32>
    %516 = vector.broadcast %495 : vector<1x128xf32> to vector<4x128xf32>
    %517 = arith.addf %515, %516 : vector<4x128xf32>
    %c0_205 = arith.constant 0 : index
    %c0_206 = arith.constant 0 : index
    %518 = vector.load %arg14[%c0_205, %c0_206] : memref<128x128xf32, #tpu.memory_space<vmem>>, vector<128x128xf32>
    %cst_207 = arith.constant dense<0.000000e+00> : vector<4x128xf32>
    %519 = tpu.matmul %517, %518, %cst_207 {dimension_numbers = #tpu.dot_dimension_numbers<[1], [0], [0], [1], [0, 0, 1, 1], [], []>} : vector<4x128xf32>, vector<128x128xf32>, vector<4x128xf32> -> vector<4x128xf32>
    %c0_208 = arith.constant 0 : index
    %c0_209 = arith.constant 0 : index
    %520 = vector.load %arg15[%c0_208, %c0_209] : memref<1x128xf32, #tpu.memory_space<vmem>>, vector<1x128xf32>
    %521 = vector.broadcast %520 : vector<1x128xf32> to vector<4x128xf32>
    %522 = arith.addf %519, %521 : vector<4x128xf32>
    %523 = arith.mulf %522, %522 : vector<4x128xf32>
    %524 = arith.mulf %522, %523 : vector<4x128xf32>
    %cst_210 = arith.constant 4.471500e-02 : f32
    %525 = vector.broadcast %cst_210 : f32 to vector<4x128xf32>
    %526 = arith.mulf %525, %524 : vector<4x128xf32>
    %527 = arith.addf %522, %526 : vector<4x128xf32>
    %cst_211 = arith.constant 0.797884583 : f32
    %528 = vector.broadcast %cst_211 : f32 to vector<4x128xf32>
    %529 = arith.mulf %528, %527 : vector<4x128xf32>
    %530 = math.tanh %529 : vector<4x128xf32>
    %cst_212 = arith.constant 1.000000e+00 : f32
    %531 = vector.broadcast %cst_212 : f32 to vector<4x128xf32>
    %532 = arith.addf %531, %530 : vector<4x128xf32>
    %cst_213 = arith.constant 5.000000e-01 : f32
    %533 = vector.broadcast %cst_213 : f32 to vector<4x128xf32>
    %534 = arith.mulf %533, %532 : vector<4x128xf32>
    %535 = arith.mulf %522, %534 : vector<4x128xf32>
    %c0_214 = arith.constant 0 : index
    %c0_215 = arith.constant 0 : index
    %536 = vector.load %arg16[%c0_214, %c0_215] : memref<128x128xf32, #tpu.memory_space<vmem>>, vector<128x128xf32>
    %cst_216 = arith.constant dense<0.000000e+00> : vector<4x128xf32>
    %537 = tpu.matmul %535, %536, %cst_216 {dimension_numbers = #tpu.dot_dimension_numbers<[1], [0], [0], [1], [0, 0, 1, 1], [], []>} : vector<4x128xf32>, vector<128x128xf32>, vector<4x128xf32> -> vector<4x128xf32>
    %c0_217 = arith.constant 0 : index
    %c0_218 = arith.constant 0 : index
    %538 = vector.load %arg17[%c0_217, %c0_218] : memref<1x128xf32, #tpu.memory_space<vmem>>, vector<1x128xf32>
    %539 = vector.broadcast %538 : vector<1x128xf32> to vector<4x128xf32>
    %540 = arith.addf %537, %539 : vector<4x128xf32>
    %c0_219 = arith.constant 0 : index
    %c0_220 = arith.constant 0 : index
    %541 = vector.load %arg18[%c0_219, %c0_220] : memref<4x128xf32, #tpu.memory_space<vmem>>, vector<4x128xf32>
    tpu.vector_store %arg18[%c0_219, %c0_220], %540 {strides = array<i32>} : memref<4x128xf32, #tpu.memory_space<vmem>>, vector<4x128xf32>,
    return
  }
  func.func @transform_0(%arg0: i32) -> (i32, i32) {
    %c0_i32 = arith.constant 0 : i32
    %c0_i32_0 = arith.constant 0 : i32
    %c0_i32_1 = arith.constant 0 : i32
    return %c0_i32, %c0_i32_0 : i32, i32
  }
  func.func @transform_1(%arg0: i32) -> (i32, i32) {
    %c0_i32 = arith.constant 0 : i32
    %c0_i32_0 = arith.constant 0 : i32
    %c0_i32_1 = arith.constant 0 : i32
    return %c0_i32, %c0_i32_0 : i32, i32
  }
  func.func @transform_2(%arg0: i32) -> (i32, i32) {
    %c0_i32 = arith.constant 0 : i32
    %c0_i32_0 = arith.constant 0 : i32
    %c0_i32_1 = arith.constant 0 : i32
    return %c0_i32, %c0_i32_0 : i32, i32
  }
  func.func @transform_3(%arg0: i32) -> (i32, i32, i32) {
    %c0_i32 = arith.constant 0 : i32
    %c0_i32_0 = arith.constant 0 : i32
    %c0_i32_1 = arith.constant 0 : i32
    %c0_i32_2 = arith.constant 0 : i32
    return %c0_i32, %c0_i32_0, %c0_i32_1 : i32, i32, i32
  }
  func.func @transform_4(%arg0: i32) -> (i32, i32, i32) {
    %c0_i32 = arith.constant 0 : i32
    %c0_i32_0 = arith.constant 0 : i32
    %c0_i32_1 = arith.constant 0 : i32
    %c0_i32_2 = arith.constant 0 : i32
    return %c0_i32, %c0_i32_0, %c0_i32_1 : i32, i32, i32
  }
  func.func @transform_5(%arg0: i32) -> (i32, i32, i32) {
    %c0_i32 = arith.constant 0 : i32
    %c0_i32_0 = arith.constant 0 : i32
    %c0_i32_1 = arith.constant 0 : i32
    %c0_i32_2 = arith.constant 0 : i32
    return %c0_i32, %c0_i32_0, %c0_i32_1 : i32, i32, i32
  }
  func.func @transform_6(%arg0: i32) -> (i32, i32, i32) {
    %c0_i32 = arith.constant 0 : i32
    %c0_i32_0 = arith.constant 0 : i32
    %c0_i32_1 = arith.constant 0 : i32
    %c0_i32_2 = arith.constant 0 : i32
    return %c0_i32, %c0_i32_0, %c0_i32_1 : i32, i32, i32
  }
  func.func @transform_7(%arg0: i32) -> (i32, i32, i32) {
    %c0_i32 = arith.constant 0 : i32
    %c0_i32_0 = arith.constant 0 : i32
    %c0_i32_1 = arith.constant 0 : i32
    %c0_i32_2 = arith.constant 0 : i32
    return %c0_i32, %c0_i32_0, %c0_i32_1 : i32, i32, i32
  }
  func.func @transform_8(%arg0: i32) -> (i32, i32, i32) {
    %c0_i32 = arith.constant 0 : i32
    %c0_i32_0 = arith.constant 0 : i32
    %c0_i32_1 = arith.constant 0 : i32
    %c0_i32_2 = arith.constant 0 : i32
    return %c0_i32, %c0_i32_0, %c0_i32_1 : i32, i32, i32
  }
  func.func @transform_9(%arg0: i32) -> (i32, i32, i32) {
    %c0_i32 = arith.constant 0 : i32
    %c0_i32_0 = arith.constant 0 : i32
    %c0_i32_1 = arith.constant 0 : i32
    %c0_i32_2 = arith.constant 0 : i32
    return %c0_i32, %c0_i32_0, %c0_i32_1 : i32, i32, i32
  }
  func.func @transform_10(%arg0: i32) -> (i32, i32, i32) {
    %c0_i32 = arith.constant 0 : i32
    %c0_i32_0 = arith.constant 0 : i32
    %c0_i32_1 = arith.constant 0 : i32
    %c0_i32_2 = arith.constant 0 : i32
    return %c0_i32, %c0_i32_0, %c0_i32_1 : i32, i32, i32
  }
  func.func @transform_11(%arg0: i32) -> (i32, i32, i32) {
    %c0_i32 = arith.constant 0 : i32
    %c0_i32_0 = arith.constant 0 : i32
    %c0_i32_1 = arith.constant 0 : i32
    %c0_i32_2 = arith.constant 0 : i32
    return %c0_i32, %c0_i32_0, %c0_i32_1 : i32, i32, i32
  }
  func.func @transform_12(%arg0: i32) -> (i32, i32) {
    %c0_i32 = arith.constant 0 : i32
    %c0_i32_0 = arith.constant 0 : i32
    %c0_i32_1 = arith.constant 0 : i32
    return %c0_i32, %c0_i32_0 : i32, i32
  }
  func.func @transform_13(%arg0: i32) -> (i32, i32) {
    %c0_i32 = arith.constant 0 : i32
    %c0_i32_0 = arith.constant 0 : i32
    %c0_i32_1 = arith.constant 0 : i32
    return %c0_i32, %c0_i32_0 : i32, i32
  }
  func.func @transform_14(%arg0: i32) -> (i32, i32) {
    %c0_i32 = arith.constant 0 : i32
    %c0_i32_0 = arith.constant 0 : i32
    %c0_i32_1 = arith.constant 0 : i32
    return %c0_i32, %c0_i32_0 : i32, i32
  }
  func.func @transform_15(%arg0: i32) -> (i32, i32) {
    %c0_i32 = arith.constant 0 : i32
    %c0_i32_0 = arith.constant 0 : i32
    %c0_i32_1 = arith.constant 0 : i32
    return %c0_i32, %c0_i32_0 : i32, i32
  }
  func.func @transform_16(%arg0: i32) -> (i32, i32) {
    %c0_i32 = arith.constant 0 : i32
    %c0_i32_0 = arith.constant 0 : i32
    %c0_i32_1 = arith.constant 0 : i32
    return %c0_i32, %c0_i32_0 : i32, i32
  }
  func.func @transform_17(%arg0: i32) -> (i32, i32) {
    %c0_i32 = arith.constant 0 : i32
    %c0_i32_0 = arith.constant 0 : i32
    %c0_i32_1 = arith.constant 0 : i32
    return %c0_i32, %c0_i32_0 : i32, i32
  }
}

</mosaic_0001>

<bundles_post_ra>
// kernel: one_head_net_forward.1
= control target key start
LH: loop header
LB: loop body
LE: loop exit
PB: predicated region body
PF: predicated region fallthrough
CT: control target
= control target key end

     0   :  { %vm9700_vm0 = vmmov 0   ;;  %vm747_vm1 = vcmask 261120   ;;  %s9701_s19 = smov 64   ;;  %s9703_s21 = smov 32   ;;  %vm2020_vm3 = vcmask 64512   ;;  %vm2512_vm4 = vcmask 523264   ;;  %s11973_s2 = inlined_call_operand.vmem [shape: f32[768,128], index: 2, kind: input, shape index: {}]   ;;  %s11974_s0 = inlined_call_operand.vmem [shape: f32[32,768], index: 0, kind: input, shape index: {}]   ;;  %s11975_s4 = inlined_call_operand.vmem [shape: f32[2,128,384], index: 4, kind: input, shape index: {}]   ;;  %s11976_s1 = inlined_call_operand.vmem [shape: f32[32,128], index: 1, kind: input, shape index: {}]   ;;  %s11977_s3 = inlined_call_operand.vmem [shape: f32[2,4,128], index: 3, kind: input, shape index: {}]   ;;  %s11978_s5 = inlined_call_operand.vmem [shape: f32[2,1,384], index: 5, kind: input, shape index: {}]   ;;  %s11979_s6 = inlined_call_operand.vmem [shape: f32[2,128,128], index: 6, kind: input, shape index: {}]   ;;  %s11980_s7 = inlined_call_operand.vmem [shape: f32[2,1,128], index: 7, kind: input, shape index: {}]   ;;  %s11981_s8 = inlined_call_operand.vmem [shape: f32[2,128,128], index: 8, kind: input, shape index: {}]   ;;  %s11982_s10 = inlined_call_operand.vmem [shape: f32[2,128,128], index: 10, kind: input, shape index: {}]   ;;  %s11983_s9 = inlined_call_operand.vmem [shape: f32[2,1,128], index: 9, kind: input, shape index: {}]   ;;  %s11984_s11 = inlined_call_operand.vmem [shape: f32[2,1,128], index: 11, kind: input, shape index: {}]   ;;  %s11985_s13 = inlined_call_operand.vmem [shape: f32[128,128], index: 13, kind: input, shape index: {}]   ;;  %s11986_s15 = inlined_call_operand.vmem [shape: f32[128,128], index: 15, kind: input, shape index: {}]   ;;  %s11987_s12 = inlined_call_operand.vmem [shape: f32[2,128], index: 12, kind: input, shape index: {}]   ;;  %s11988_s14 = inlined_call_operand.vmem [shape: f32[1,128], index: 14, kind: input, shape index: {}]   ;;  %s11989_s16 = inlined_call_operand.vmem [shape: f32[1,128], index: 16, kind: input, shape index: {}]   ;;  %s11990_s17 = inlined_call_operand.vmem [shape: f32[4,128], index: 17, kind: output, shape index: {}]  }
   0x1   :  { %11993 = sst [smem:[#allocation2_spill]] %s11973_s2  ;;  %vm2514_vm5 = vcmask 785408   ;;  %vm7397_vm6 = vcmask 1040384   ;;  %vm7399_vm7 = vcmask 1041408   ;;  %vm7401_vm8 = vcmask 1042432  }
   0x2   :  { %11994 = sst [smem:[#allocation3_spill]] %s11974_s0  ;;  %s11995_s26 = sld [smem:[#allocation2_spill]]  ;;  %vm7405_vm9 = vcmask 1043456  }
   0x3   :  { %s11996_s20 = sld [smem:[#allocation3_spill]]  ;;  %s9702_s0 = smov 96  }
   0x8   :  { %v100_v0 = vld [vmem:[%s11995_s26 + $0x80] sm:$0xff]  ;;  %v101_v1 = vld [vmem:[%s11995_s26 + $0x88] sm:$0xff]  ;;  %v102_v11 = vld [vmem:[%s11995_s26 + $0x90] sm:$0xff] }
   0x9   :  { %v84_v2 = vld [vmem:[%s11995_s26] sm:$0xff]  ;;  %v8986_v3 = vpack.c.bf16 %v101_v1, %v100_v0  ;;  %v85_v4 = vld [vmem:[%s11995_s26 + $0x8] sm:$0xff]  ;;  %v103_v13 = vld [vmem:[%s11995_s26 + $0x98] sm:$0xff] }
   0xa   :  { %v132_v5 = vld [vmem:[%s11995_s26 + $0x180] sm:$0xff]  ;;  %v133_v6 = vld [vmem:[%s11995_s26 + $0x188] sm:$0xff]  ;;  %v8988_v7 = vpack.c.bf16 %v85_v4, %v84_v2  ;;  %v86_v14 = vld [vmem:[%s11995_s26 + $0x10] sm:$0xff]  ;;  %v8990_v16 = vpack.c.bf16 %v103_v13, %v102_v11 }
   0xb   :  { %v9018_v8 = vpack.c.bf16 %v133_v6, %v132_v5  ;;  %v116_v9 = vld [vmem:[%s11995_s26 + $0x100] sm:$0xff]  ;;  %v117_v10 = vld [vmem:[%s11995_s26 + $0x108] sm:$0xff]  ;;  %8987 = vmatprep.subr.bf16.mxu0 %v8986_v3  ;;  %v87_v15 = vld [vmem:[%s11995_s26 + $0x18] sm:$0xff] }
   0xc   :  { %v9020_v12 = vpack.c.bf16 %v117_v10, %v116_v9  ;;  %8989 = vmatpush3.bf16.msra.mxu0 %v8988_v7  ;;  %v8992_v17 = vpack.c.bf16 %v87_v15, %v86_v14  ;;  %v134_v18 = vld [vmem:[%s11995_s26 + $0x190] sm:$0xff]  ;;  %v135_v19 = vld [vmem:[%s11995_s26 + $0x198] sm:$0xff]  ;;  %v104_v23 = vld [vmem:[%s11995_s26 + $0xa0] sm:$0xff] }
   0xd   :  { %9019 = vmatprep.subr.bf16.mxu1 %v9018_v8  ;;  %v118_v20 = vld [vmem:[%s11995_s26 + $0x110] sm:$0xff]  ;;  %v9022_v21 = vpack.c.bf16 %v135_v19, %v134_v18  ;;  %v119_v22 = vld [vmem:[%s11995_s26 + $0x118] sm:$0xff]  ;;  %v105_v24 = vld [vmem:[%s11995_s26 + $0xa8] sm:$0xff]  ;;  %8991 = vmatprep.subr.bf16.mxu0 %v8990_v16 }
   0xe   :  { %9021 = vmatpush3.bf16.msra.mxu1 %v9020_v12  ;;  %v9024_v25 = vpack.c.bf16 %v119_v22, %v118_v20  ;;  %v8994_v26 = vpack.c.bf16 %v105_v24, %v104_v23  ;;  %v88_v27 = vld [vmem:[%s11995_s26 + $0x20] sm:$0xff]  ;;  %v89_v28 = vld [vmem:[%s11995_s26 + $0x28] sm:$0xff]  ;;  %v106_v35 = vld [vmem:[%s11995_s26 + $0xb0] sm:$0xff] }
   0xf   :  { %v136_v29 = vld [vmem:[%s11995_s26 + $0x1a0] sm:$0xff]  ;;  %9023 = vmatprep.subr.bf16.mxu1 %v9022_v21  ;;  %v137_v30 = vld [vmem:[%s11995_s26 + $0x1a8] sm:$0xff]  ;;  %v8996_v33 = vpack.c.bf16 %v89_v28, %v88_v27  ;;  %v107_v36 = vld [vmem:[%s11995_s26 + $0xb8] sm:$0xff] }
  0x10   :  { %v120_v31 = vld [vmem:[%s11995_s26 + $0x120] sm:$0xff]  ;;  %v121_v32 = vld [vmem:[%s11995_s26 + $0x128] sm:$0xff]  ;;  %8993 = vmatpush3.bf16.msra.mxu0 %v8992_v17  ;;  %v9026_v34 = vpack.c.bf16 %v137_v30, %v136_v29  ;;  %v90_v37 = vld [vmem:[%s11995_s26 + $0x30] sm:$0xff]  ;;  %v8998_v39 = vpack.c.bf16 %v107_v36, %v106_v35 }
  0x11   :  { %8995 = vmatprep.subr.bf16.mxu0 %v8994_v26  ;;  %v9028_v38 = vpack.c.bf16 %v121_v32, %v120_v31  ;;  %v91_v40 = vld [vmem:[%s11995_s26 + $0x38] sm:$0xff]  ;;  %v138_v41 = vld [vmem:[%s11995_s26 + $0x1b0] sm:$0xff]  ;;  %v108_v46 = vld [vmem:[%s11995_s26 + $0xc0] sm:$0xff] }
  0x12   :  { %9025 = vmatpush3.bf16.msra.mxu1 %v9024_v25  ;;  %v139_v42 = vld [vmem:[%s11995_s26 + $0x1b8] sm:$0xff]  ;;  %v122_v44 = vld [vmem:[%s11995_s26 + $0x130] sm:$0xff]  ;;  %v109_v47 = vld [vmem:[%s11995_s26 + $0xc8] sm:$0xff]  ;;  %v9000_v48 = vpack.c.bf16 %v91_v40, %v90_v37 }
  0x13   :  { %9027 = vmatprep.subr.bf16.mxu1 %v9026_v34  ;;  %v9030_v43 = vpack.c.bf16 %v139_v42, %v138_v41  ;;  %v123_v45 = vld [vmem:[%s11995_s26 + $0x138] sm:$0xff]  ;;  %v140_v49 = vld [vmem:[%s11995_s26 + $0x1c0] sm:$0xff]  ;;  %v141_v50 = vld [vmem:[%s11995_s26 + $0x1c8] sm:$0xff]  ;;  %v9002_v52 = vpack.c.bf16 %v109_v47, %v108_v46 }
  0x14   :  { %8997 = vmatpush3.bf16.msra.mxu0 %v8996_v33  ;;  %v9032_v51 = vpack.c.bf16 %v123_v45, %v122_v44  ;;  %v92_v53 = vld [vmem:[%s11995_s26 + $0x40] sm:$0xff]  ;;  %v93_v54 = vld [vmem:[%s11995_s26 + $0x48] sm:$0xff]  ;;  %v9034_v56 = vpack.c.bf16 %v141_v50, %v140_v49  ;;  %v110_v58 = vld [vmem:[%s11995_s26 + $0xd0] sm:$0xff] }
  0x15   :  { %8999 = vmatprep.subr.bf16.mxu0 %v8998_v39  ;;  %v124_v55 = vld [vmem:[%s11995_s26 + $0x140] sm:$0xff]  ;;  %v125_v57 = vld [vmem:[%s11995_s26 + $0x148] sm:$0xff]  ;;  %v111_v59 = vld [vmem:[%s11995_s26 + $0xd8] sm:$0xff]  ;;  %v9004_v62 = vpack.c.bf16 %v93_v54, %v92_v53 }
  0x16   :  { %9029 = vmatpush3.bf16.msra.mxu1 %v9028_v38  ;;  %v142_v60 = vld [vmem:[%s11995_s26 + $0x1d0] sm:$0xff]  ;;  %v143_v61 = vld [vmem:[%s11995_s26 + $0x1d8] sm:$0xff]  ;;  %v9036_v63 = vpack.c.bf16 %v125_v57, %v124_v55  ;;  %v9006_v0 = vpack.c.bf16 %v111_v59, %v110_v58  ;;  %v112_v6 = vld [vmem:[%s11995_s26 + $0xe0] sm:$0xff] }
  0x17   :  { %9031 = vmatprep.subr.bf16.mxu1 %v9030_v43  ;;  %v94_v1 = vld [vmem:[%s11995_s26 + $0x50] sm:$0xff]  ;;  %v95_v2 = vld [vmem:[%s11995_s26 + $0x58] sm:$0xff]  ;;  %v9038_v4 = vpack.c.bf16 %v143_v61, %v142_v60  ;;  %v113_v7 = vld [vmem:[%s11995_s26 + $0xe8] sm:$0xff] }
  0x18   :  { %9001 = vmatpush3.bf16.msra.mxu0 %v9000_v48  ;;  %v126_v3 = vld [vmem:[%s11995_s26 + $0x150] sm:$0xff]  ;;  %v127_v5 = vld [vmem:[%s11995_s26 + $0x158] sm:$0xff]  ;;  %v144_v8 = vld [vmem:[%s11995_s26 + $0x1e0] sm:$0xff]  ;;  %v9008_v10 = vpack.c.bf16 %v95_v2, %v94_v1  ;;  %v9010_v14 = vpack.c.bf16 %v113_v7, %v112_v6 }
  0x19   :  { %9003 = vmatprep.subr.bf16.mxu0 %v9002_v52  ;;  %v145_v9 = vld [vmem:[%s11995_s26 + $0x1e8] sm:$0xff]  ;;  %v96_v11 = vld [vmem:[%s11995_s26 + $0x60] sm:$0xff]  ;;  %v9040_v13 = vpack.c.bf16 %v127_v5, %v126_v3  ;;  %v114_v19 = vld [vmem:[%s11995_s26 + $0xf0] sm:$0xff] }
  0x1a   :  { %9033 = vmatpush3.bf16.msra.mxu1 %v9032_v51  ;;  %v61_v12 = vld [vmem:[%s11996_s20 + $0x8] sm:$0xff]  ;;  %v128_v16 = vld [vmem:[%s11995_s26 + $0x160] sm:$0xff]  ;;  %v9042_v18 = vpack.c.bf16 %v145_v9, %v144_v8  ;;  %v115_v20 = vld [vmem:[%s11995_s26 + $0xf8] sm:$0xff] }
  0x1b   :  { %9035 = vmatprep.subr.bf16.mxu1 %v9034_v56  ;;  %v97_v15 = vld [vmem:[%s11995_s26 + $0x68] sm:$0xff]  ;;  %248 = vmatprep.mubr.f32.mxu0 %v61_v12  ;;  %v63_v21 = vld [vmem:[%s11996_s20 + $0x18] sm:$0xff]  ;;  %v146_v22 = vld [vmem:[%s11995_s26 + $0x1f0] sm:$0xff]  ;;  %v9014_v26 = vpack.c.bf16 %v115_v20, %v114_v19 }
  0x1c   :  { %9005 = vmatpush3.bf16.msra.mxu0 %v9004_v62  ;;  %v129_v17 = vld [vmem:[%s11995_s26 + $0x168] sm:$0xff]  ;;  %v147_v23 = vld [vmem:[%s11995_s26 + $0x1f8] sm:$0xff]  ;;  %333 = vmatprep.mubr.f32.mxu1 %v63_v21  ;;  %v9012_v24 = vpack.c.bf16 %v97_v15, %v96_v11  ;;  %v98_v27 = vld [vmem:[%s11995_s26 + $0x70] sm:$0xff] }
  0x1d   :  { %9007 = vmatprep.subr.bf16.mxu0 %v9006_v0  ;;  %v9044_v25 = vpack.c.bf16 %v129_v17, %v128_v16  ;;  %v99_v28 = vld [vmem:[%s11995_s26 + $0x78] sm:$0xff]  ;;  %v130_v29 = vld [vmem:[%s11995_s26 + $0x170] sm:$0xff]  ;;  %v9046_v30 = vpack.c.bf16 %v147_v23, %v146_v22  ;;  %v164_v32 = vld [vmem:[%s11995_s26 + $0x280] sm:$0xff] }
  0x1e   :  { %9037 = vmatpush3.bf16.msra.mxu1 %v9036_v63  ;;  %v131_v31 = vld [vmem:[%s11995_s26 + $0x178] sm:$0xff]  ;;  %v165_v33 = vld [vmem:[%s11995_s26 + $0x288] sm:$0xff]  ;;  %v9016_v34 = vpack.c.bf16 %v99_v28, %v98_v27  ;;  %v148_v37 = vld [vmem:[%s11995_s26 + $0x200] sm:$0xff] }
  0x1f   :  { %9039 = vmatprep.subr.bf16.mxu1 %v9038_v4  ;;  %v9048_v35 = vpack.c.bf16 %v131_v31, %v130_v29  ;;  %v9050_v36 = vpack.c.bf16 %v165_v33, %v164_v32  ;;  %v149_v38 = vld [vmem:[%s11995_s26 + $0x208] sm:$0xff]  ;;  %v166_v39 = vld [vmem:[%s11995_s26 + $0x290] sm:$0xff]  ;;  %v167_v40 = vld [vmem:[%s11995_s26 + $0x298] sm:$0xff] }
  0x20   :  { %9009 = vmatpush3.bf16.msra.mxu0 %v9008_v10  ;;  %v60_v41 = vld [vmem:[%s11996_s20] sm:$0xff]  ;;  %v9052_v42 = vpack.c.bf16 %v149_v38, %v148_v37  ;;  %v62_v43 = vld [vmem:[%s11996_s20 + $0x10] sm:$0xff]  ;;  %v9054_v44 = vpack.c.bf16 %v167_v40, %v166_v39  ;;  %v151_v46 = vld [vmem:[%s11995_s26 + $0x218] sm:$0xff] }
  0x21   :  { %9011 = vmatprep.subr.bf16.mxu0 %v9010_v14  ;;  %v150_v45 = vld [vmem:[%s11995_s26 + $0x210] sm:$0xff]  ;;  %v168_v47 = vld [vmem:[%s11995_s26 + $0x2a0] sm:$0xff]  ;;  %v169_v48 = vld [vmem:[%s11995_s26 + $0x2a8] sm:$0xff] }
  0x22   :  { %9041 = vmatpush3.bf16.msra.mxu1 %v9040_v13  ;;  %v67_v49 = vld [vmem:[%s11996_s20 + $0x38] sm:$0xff]  ;;  %v69_v50 = vld [vmem:[%s11996_s20 + $0x48] sm:$0xff]  ;;  %v9056_v51 = vpack.c.bf16 %v151_v46, %v150_v45  ;;  %v66_v52 = vld [vmem:[%s11996_s20 + $0x30] sm:$0xff]  ;;  %v9058_v53 = vpack.c.bf16 %v169_v48, %v168_v47 }
  0x23   :  { %9043 = vmatprep.subr.bf16.mxu1 %v9042_v18  ;;  %v152_v54 = vld [vmem:[%s11995_s26 + $0x220] sm:$0xff]  ;;  %v153_v55 = vld [vmem:[%s11995_s26 + $0x228] sm:$0xff]  ;;  %v170_v57 = vld [vmem:[%s11995_s26 + $0x2b0] sm:$0xff] }
  0x24   :  { %9013 = vmatpush3.bf16.msra.mxu0 %v9012_v24  ;;  %v68_v56 = vld [vmem:[%s11996_s20 + $0x40] sm:$0xff]  ;;  %v171_v58 = vld [vmem:[%s11995_s26 + $0x2b8] sm:$0xff]  ;;  %v73_v59 = vld [vmem:[%s11996_s20 + $0x68] sm:$0xff]  ;;  %v9060_v61 = vpack.c.bf16 %v153_v55, %v152_v54 }
  0x25   :  { %9015 = vmatprep.subr.bf16.mxu0 %v9014_v26  ;;  %v75_v60 = vld [vmem:[%s11996_s20 + $0x78] sm:$0xff]  ;;  %v72_v62 = vld [vmem:[%s11996_s20 + $0x60] sm:$0xff]  ;;  %v9062_v63 = vpack.c.bf16 %v171_v58, %v170_v57  ;;  %v154_v0 = vld [vmem:[%s11995_s26 + $0x230] sm:$0xff] }
  0x26   :  { %9045 = vmatpush3.bf16.msra.mxu1 %v9044_v25  ;;  %v155_v1 = vld [vmem:[%s11995_s26 + $0x238] sm:$0xff]  ;;  %v74_v2 = vld [vmem:[%s11996_s20 + $0x70] sm:$0xff]  ;;  %v172_v3 = vld [vmem:[%s11995_s26 + $0x2c0] sm:$0xff] }
  0x27   :  { %9047 = vmatprep.subr.bf16.mxu1 %v9046_v30  ;;  %v173_v4 = vld [vmem:[%s11995_s26 + $0x2c8] sm:$0xff]  ;;  %v79_v5 = vld [vmem:[%s11996_s20 + $0x98] sm:$0xff]  ;;  %v9064_v7 = vpack.c.bf16 %v155_v1, %v154_v0  ;;  %v78_v8 = vld [vmem:[%s11996_s20 + $0x90] sm:$0xff] }
  0x28   :  { %9017 = vmatpush3.bf16.msra.mxu0 %v9016_v34  ;;  %v81_v6 = vld [vmem:[%s11996_s20 + $0xa8] sm:$0xff]  ;;  %v9066_v9 = vpack.c.bf16 %v173_v4, %v172_v3  ;;  %v156_v10 = vld [vmem:[%s11995_s26 + $0x240] sm:$0xff]  ;;  %v174_v13 = vld [vmem:[%s11995_s26 + $0x2d0] sm:$0xff] }
  0x29   :  { %9051 = vmatprep.subr.bf16.mxu0 %v9050_v36  ;;  %v157_v11 = vld [vmem:[%s11995_s26 + $0x248] sm:$0xff]  ;;  %v80_v12 = vld [vmem:[%s11996_s20 + $0xa0] sm:$0xff]  ;;  %v175_v14 = vld [vmem:[%s11995_s26 + $0x2d8] sm:$0xff] }
  0x2a   :  { %9049 = vmatpush3.bf16.msra.mxu1 %v9048_v35  ;;  %v65_v15 = vld [vmem:[%s11996_s20 + $0x28] sm:$0xff]  ;;  %v9068_v16 = vpack.c.bf16 %v157_v11, %v156_v10  ;;  %v9070_v17 = vpack.c.bf16 %v175_v14, %v174_v13  ;;  %v158_v18 = vld [vmem:[%s11995_s26 + $0x250] sm:$0xff]  ;;  %v159_v19 = vld [vmem:[%s11995_s26 + $0x258] sm:$0xff] }
  0x2b   :  { %249 = vmatmul.mubr.f32.vlgmr.msra.gmra.mrb[0].mxu0 %v60_v41  ;;  %v176_v20 = vld [vmem:[%s11995_s26 + $0x2e0] sm:$0xff]  ;;  %v177_v21 = vld [vmem:[%s11995_s26 + $0x2e8] sm:$0xff]  ;;  %v9072_v22 = vpack.c.bf16 %v159_v19, %v158_v18  ;;  %v178_v26 = vld [vmem:[%s11995_s26 + $0x2f0] sm:$0xff] }
  0x2c   :  { %9053 = vmatpush3.bf16.msra.mxu0 %v9052_v42  ;;  %253 = vmatprep.mubr.f32.mxu0 %v67_v49  ;;  %v9074_v23 = vpack.c.bf16 %v177_v21, %v176_v20  ;;  %v160_v24 = vld [vmem:[%s11995_s26 + $0x260] sm:$0xff]  ;;  %v161_v25 = vld [vmem:[%s11995_s26 + $0x268] sm:$0xff]  ;;  %v179_v27 = vld [vmem:[%s11995_s26 + $0x2f8] sm:$0xff] }
  0x2d   :  { %334 = vmatmul.mubr.f32.vlgmr.msra.gmra.mrb[0].mxu1 %v62_v43  ;;  %9055 = vmatprep.subr.bf16.mxu0 %v9054_v44  ;;  %v9076_v28 = vpack.c.bf16 %v161_v25, %v160_v24  ;;  %v9078_v29 = vpack.c.bf16 %v179_v27, %v178_v26  ;;  %v162_v30 = vld [vmem:[%s11995_s26 + $0x270] sm:$0xff]  ;;  %v163_v31 = vld [vmem:[%s11995_s26 + $0x278] sm:$0xff]  ;;  %v64_v33 = vld [vmem:[%s11996_s20 + $0x20] sm:$0xff] }
  0x2e   :  { %338 = vmatprep.mubr.f32.mxu1 %v69_v50  ;;  %v9080_v32 = vpack.c.bf16 %v163_v31, %v162_v30  ;;  %v71_v34 = vld [vmem:[%s11996_s20 + $0x58] sm:$0xff]  ;;  %v70_v35 = vld [vmem:[%s11996_s20 + $0x50] sm:$0xff]  ;;  %v77_v36 = vld [vmem:[%s11996_s20 + $0x88] sm:$0xff] }
  0x2f   :  { %254 = vmatmul.mubr.f32.gmra.mrb[2].mxu0 %v66_v52  ;;  %v76_v37 = vld [vmem:[%s11996_s20 + $0x80] sm:$0xff]  ;;  %v83_v38 = vld [vmem:[%s11996_s20 + $0xb8] sm:$0xff]  ;;  %v82_v39 = vld [vmem:[%s11996_s20 + $0xb0] sm:$0xff] }
  0x30   :  { %9057 = vmatpush3.bf16.msra.mxu0 %v9056_v51  ;;  %258 = vmatprep.mubr.f32.mxu0 %v73_v59  ;;  %v509_v40 = vld [vmem:[%s11975_s4 + $0x8] sm:$0xff]  ;;  %v512_v41 = vld [vmem:[%s11975_s4 + $0x20] sm:$0xff]  ;;  %v511_v44 = vld [vmem:[%s11975_s4 + $0x18] sm:$0xff] }
  0x31   :  { %339 = vmatmul.mubr.f32.gmra.mrb[2].mxu1 %v68_v56  ;;  %9059 = vmatprep.subr.bf16.mxu0 %v9058_v53  ;;  %v508_v42 = vld [vmem:[%s11975_s4] sm:$0xff]  ;;  %v9082_v43 = vpack.c.bf16 %v512_v41, %v509_v40  ;;  %v515_v45 = vld [vmem:[%s11975_s4 + $0x38] sm:$0xff]  ;;  %v518_v46 = vld [vmem:[%s11975_s4 + $0x50] sm:$0xff] }
  0x32   :  { %343 = vmatprep.mubr.f32.mxu1 %v75_v60  ;;  %v9084_v47 = vpack.c.bf16 %v511_v44, %v508_v42  ;;  %v9086_v48 = vpack.c.bf16 %v518_v46, %v515_v45  ;;  %v514_v49 = vld [vmem:[%s11975_s4 + $0x30] sm:$0xff]  ;;  %v517_v50 = vld [vmem:[%s11975_s4 + $0x48] sm:$0xff]  ;;  %v180_v53 = vld [vmem:[%s11976_s1] sm:$0xff] }
  0x33   :  { %259 = vmatmul.mubr.f32.gmra.mrb[4].mxu0 %v72_v62  ;;  %9083 = vmatprep.subr.bf16.mxu1 %v9082_v43  ;;  %v9088_v51 = vpack.c.bf16 %v517_v50, %v514_v49  ;;  %v521_v43 = vld [vmem:[%s11975_s4 + $0x68] sm:$0xff]  ;;  %v524_v44 = vld [vmem:[%s11975_s4 + $0x80] sm:$0xff]  ;;  %v527_v50 = vld [vmem:[%s11975_s4 + $0x98] sm:$0xff] }
  0x34   :  { %9061 = vmatpush3.bf16.msra.mxu0 %v9060_v61  ;;  %263 = vmatprep.mubr.f32.mxu0 %v79_v5  ;;  %v181_v61 = vld [vmem:[%s11976_s1 + $0x8] sm:$0xff]  ;;  %v9090_v46 = vpack.c.bf16 %v524_v44, %v521_v43 }
  0x35   :  { %344 = vmatmul.mubr.f32.gmra.mrb[4].mxu1 %v74_v2  ;;  %9063 = vmatprep.subr.bf16.mxu0 %v9062_v63 }
  0x36   :  { %348 = vmatprep.mubr.f32.mxu1 %v81_v6  ;;  %9085 = vmatpush1.bf16.msra.mxu1 %v9084_v47  ;;  %v182_v6 = vld [vmem:[%s11976_s1 + $0x10] sm:$0xff]  ;;  %v520_v47 = vld [vmem:[%s11975_s4 + $0x60] sm:$0xff] }
  0x37   :  { %264 = vmatmul.mubr.f32.gmra.mrb[6].mxu0 %v78_v8  ;;  %9087 = vmatprep.subr.bf16.mxu1 %v9086_v48  ;;  %v523_v48 = vld [vmem:[%s11975_s4 + $0x78] sm:$0xff] }
  0x38   :  { %9065 = vmatpush3.bf16.msra.mxu0 %v9064_v7  ;;  %418 = vmatprep.mubr.f32.mxu0 %v65_v15  ;;  %v183_v15 = vld [vmem:[%s11976_s1 + $0x18] sm:$0xff]  ;;  %v9092_v49 = vpack.c.bf16 %v523_v48, %v520_v47 }
  0x39   :  { %349 = vmatmul.mubr.f32.gmra.mrb[6].mxu1 %v80_v12  ;;  %9067 = vmatprep.subr.bf16.mxu0 %v9066_v9 }
  0x3a   :  { %9089 = vmatpush1.bf16.msra.mxu1 %v9088_v51  ;;  %v530_v51 = vld [vmem:[%s11975_s4 + $0xb0] sm:$0xff] }
  0x3b   :  { %9091 = vmatprep.subr.bf16.mxu1 %v9090_v46 }
  0x3c   :  { %9069 = vmatpush3.bf16.msra.mxu0 %v9068_v16 }
  0x3d   :  { %9071 = vmatprep.subr.bf16.mxu0 %v9070_v17 }
  0x3e   :  { %9093 = vmatpush1.bf16.msra.mxu1 %v9092_v49 }
  0x40   :  { %9073 = vmatpush3.bf16.msra.mxu0 %v9072_v22 }
  0x41   :  { %9075 = vmatprep.subr.bf16.mxu0 %v9074_v23 }
  0x44   :  { %9077 = vmatpush3.bf16.msra.mxu0 %v9076_v28 }
  0x45   :  { %9079 = vmatprep.subr.bf16.mxu0 %v9078_v29 }
  0x48   :  { %9081 = vmatpush3.bf16.msra.mxu0 %v9080_v32 }
  0x4b   :  { %419 = vmatmul.mubr.f32.vlgmr.msra.gmra.mrb[8].mxu0 %v64_v33 }
  0x4c   :  { %423 = vmatprep.mubr.f32.mxu0 %v71_v34 }
  0x4f   :  { %424 = vmatmul.mubr.f32.gmra.mrb[10].mxu0 %v70_v35 }
  0x50   :  { %428 = vmatprep.mubr.f32.mxu0 %v77_v36 }
  0x53   :  { %429 = vmatmul.mubr.f32.gmra.mrb[12].mxu0 %v76_v37 }
  0x54   :  { %433 = vmatprep.mubr.f32.mxu0 %v83_v38 }
  0x57   :  { %434 = vmatmul.mubr.f32.gmra.mrb[14].mxu0 %v82_v39 }
  0xfe   :  { %v7870_v52 = vpop.f32.mrb[0].mxu0 }
  0xff   :  { %v7871_v54 = vpop.f32.mrb[1].mxu0 }
 0x100   :  { %v7914_v55 = vpop.f32.mrb[0].mxu1  ;;  %v7872_v56 = vadd.f32 %v7871_v54, %v7870_v52  ;;  %v9094_v52 = vpack.c.bf16 %v530_v51, %v527_v50  ;;  %v529_v54 = vld [vmem:[%s11975_s4 + $0xa8] sm:$0xff] }
 0x101   :  { %v7915_v57 = vpop.f32.mrb[1].mxu1 }
 0x102   :  { %v7916_v58 = vadd.f32 %v7915_v57, %v7914_v55  ;;  %v251_v59 = vadd.f32 %v7872_v56, %v180_v53  ;;  %v7873_v60 = vpop.f32.mrb[2].mxu0  ;;  %v526_v53 = vld [vmem:[%s11975_s4 + $0x90] sm:$0xff]  ;;  %9095 = vmatprep.subr.bf16.mxu1 %v9094_v52  ;;  %v533_v56 = vld [vmem:[%s11975_s4 + $0xc8] sm:$0xff]  ;;  %v536_v57 = vld [vmem:[%s11975_s4 + $0xe0] sm:$0xff] }
 0x103   :  { %v7874_v62 = vpop.f32.mrb[3].mxu0  ;;  %v9096_v55 = vpack.c.bf16 %v529_v54, %v526_v53  ;;  %v439_v53 = vld [vmem:[%s11977_s3] sm:$0xf] }
 0x104   :  { %v7917_v63 = vpop.f32.mrb[2].mxu1  ;;  %v336_v0 = vadd.f32 %v7916_v58, %v251_v59  ;;  %v7875_v1 = vadd.f32 %v7874_v62, %v7873_v60  ;;  %v9098_v58 = vpack.c.bf16 %v536_v57, %v533_v56  ;;  %v532_v59 = vld [vmem:[%s11975_s4 + $0xc0] sm:$0xff]  ;;  %v535_v60 = vld [vmem:[%s11975_s4 + $0xd8] sm:$0xff] }
 0x105   :  { %v7918_v2 = vpop.f32.mrb[3].mxu1  ;;  %9097 = vmatpush1.bf16.msra.mxu1 %v9096_v55  ;;  %v539_v62 = vld [vmem:[%s11975_s4 + $0xf8] sm:$0xff] }
 0x106   :  { %v7919_v3 = vadd.f32 %v7918_v2, %v7917_v63  ;;  %v256_v4 = vadd.f32 %v7875_v1, %v181_v61  ;;  %v7876_v5 = vpop.f32.mrb[4].mxu0  ;;  %v9100_v61 = vpack.c.bf16 %v535_v60, %v532_v59  ;;  %9099 = vmatprep.subr.bf16.mxu1 %v9098_v58  ;;  %v542_v63 = vld [vmem:[%s11975_s4 + $0x110] sm:$0xff]  ;;  %v541_v2 = vld [vmem:[%s11975_s4 + $0x108] sm:$0xff] }
 0x107   :  { %v7877_v7 = vpop.f32.mrb[5].mxu0  ;;  %v538_v1 = vld [vmem:[%s11975_s4 + $0xf0] sm:$0xff] }
 0x108   :  { %v7920_v8 = vpop.f32.mrb[4].mxu1  ;;  %v341_v9 = vadd.f32 %v7919_v3, %v256_v4  ;;  %v7878_v10 = vadd.f32 %v7877_v7, %v7876_v5  ;;  %v9104_v3 = vpack.c.bf16 %v541_v2, %v538_v1  ;;  %v545_v4 = vld [vmem:[%s11975_s4 + $0x128] sm:$0xff]  ;;  %v548_v5 = vld [vmem:[%s11975_s4 + $0x140] sm:$0xff] }
 0x109   :  { %v7921_v11 = vpop.f32.mrb[5].mxu1  ;;  %9101 = vmatpush1.bf16.msra.mxu1 %v9100_v61  ;;  %v544_v7 = vld [vmem:[%s11975_s4 + $0x120] sm:$0xff] }
 0x10a   :  { %v7922_v12 = vadd.f32 %v7921_v11, %v7920_v8  ;;  %v261_v13 = vadd.f32 %v7878_v10, %v182_v6  ;;  %v7879_v14 = vpop.f32.mrb[6].mxu0  ;;  %v9106_v6 = vpack.c.bf16 %v548_v5, %v545_v4  ;;  %v547_v8 = vld [vmem:[%s11975_s4 + $0x138] sm:$0xff]  ;;  %v554_v11 = vld [vmem:[%s11975_s4 + $0x170] sm:$0xff] }
 0x10b   :  { %v7880_v16 = vpop.f32.mrb[7].mxu0  ;;  %v551_v10 = vld [vmem:[%s11975_s4 + $0x158] sm:$0xff] }
 0x10c   :  { %v7923_v17 = vpop.f32.mrb[6].mxu1  ;;  %v346_v18 = vadd.f32 %v7922_v12, %v261_v13  ;;  %v7881_v19 = vadd.f32 %v7880_v16, %v7879_v14  ;;  %v9110_v12 = vpack.c.bf16 %v554_v11, %v551_v10  ;;  %v550_v13 = vld [vmem:[%s11975_s4 + $0x150] sm:$0xff]  ;;  %v553_v14 = vld [vmem:[%s11975_s4 + $0x168] sm:$0xff] }
 0x10d   :  { %v7924_v20 = vpop.f32.mrb[7].mxu1  ;;  %v510_v16 = vld [vmem:[%s11975_s4 + $0x10] sm:$0xff] }
 0x10e   :  { %v7925_v21 = vadd.f32 %v7924_v20, %v7923_v17  ;;  %v266_v22 = vadd.f32 %v7881_v19, %v183_v15  ;;  %v9112_v15 = vpack.c.bf16 %v553_v14, %v550_v13  ;;  %v513_v17 = vld [vmem:[%s11975_s4 + $0x28] sm:$0xff]  ;;  %v528_v14 = vld [vmem:[%s11975_s4 + $0xa0] sm:$0xff] }
 0x10f   :  { %v9114_v19 = vpack.c.bf16 %v513_v17, %v510_v16 }
 0x110   :  { %v351_v23 = vadd.f32 %v7925_v21, %v266_v22 }
 0x11e   :  { %v7958_v24 = vpop.f32.mrb[8].mxu0 }
 0x11f   :  { %v7959_v25 = vpop.f32.mrb[9].mxu0 }
 0x120   :  { %v7960_v26 = vadd.f32 %v7959_v25, %v7958_v24 }
 0x122   :  { %v10192_v27 = vadd.f32 %v7960_v26, %v336_v0  ;;  %v7961_v28 = vpop.f32.mrb[10].mxu0  ;;  %v9102_v0 = vpack.c.bf16 %v542_v63, %v539_v62  ;;  %v516_v62 = vld [vmem:[%s11975_s4 + $0x40] sm:$0xff]  ;;  %v519_v63 = vld [vmem:[%s11975_s4 + $0x58] sm:$0xff] }
 0x123   :  { %v7962_v29 = vpop.f32.mrb[11].mxu0  ;;  %v9118_v4 = vpack.c.bf16 %v519_v63, %v516_v62 }
 0x124   :  { %v7963_v30 = vadd.f32 %v7962_v29, %v7961_v28  ;;  %440 = vadd.xlane.f32.xlu0 %v10192_v27  ;;  %v448_v33 = vmul.f32 %v10192_v27, %v10192_v27  ;;  %9103 = vmatprep.subr.bf16.mxu1 %v9102_v0 }
 0x125   :  { %9105 = vmatpush1.bf16.msra.mxu1 %v9104_v3 }
 0x126   :  { %v10195_v31 = vadd.f32 %v7963_v30, %v341_v9  ;;  %v7964_v32 = vpop.f32.mrb[12].mxu0  ;;  %v9108_v9 = vpack.c.bf16 %v547_v8, %v544_v7  ;;  %9107 = vmatprep.subr.bf16.mxu1 %v9106_v6  ;;  %v522_v6 = vld [vmem:[%s11975_s4 + $0x70] sm:$0xff]  ;;  %v525_v7 = vld [vmem:[%s11975_s4 + $0x88] sm:$0xff] }
 0x127   :  { %v7965_v34 = vpop.f32.mrb[13].mxu0 }
 0x128   :  { %v7966_v35 = vadd.f32 %v7965_v34, %v7964_v32  ;;  %442 = vadd.xlane.f32.xlu1 %v10195_v31  ;;  %452 = vadd.xlane.f32.xlu0 %v448_v33  ;;  %v449_v38 = vmul.f32 %v10195_v31, %v10195_v31  ;;  %v56_v32 = vlaneseq }
 0x129   :  { %9109 = vmatpush1.bf16.msra.mxu1 %v9108_v9 }
 0x12a   :  { %v10200_v36 = vadd.f32 %v7966_v35, %v346_v18  ;;  %v7967_v37 = vpop.f32.mrb[14].mxu0  ;;  %9111 = vmatprep.subr.bf16.mxu1 %v9110_v12  ;;  %v9699_v18 = vmov 0.0   ;;  %v9122_v12 = vpack.c.bf16 %v525_v7, %v522_v6 }
 0x12b   :  { %v7968_v39 = vpop.f32.mrb[15].mxu0  ;;  %637 = vmatprep.mubr.f32.mxu1 %v9699_v18  ;;  %8330 = vmatprep.subr.mxu0 %v9699_v18 }
 0x12c   :  { %v7969_v40 = vadd.f32 %v7968_v39, %v7967_v37  ;;  %454 = vadd.xlane.f32.xlu1 %v449_v38  ;;  %444 = vadd.xlane.f32.xlu0 %v10200_v36  ;;  %v450_v42 = vmul.f32 %v10200_v36, %v10200_v36 }
 0x12d   :  { %9113 = vmatpush1.bf16.msra.mxu1 %v9112_v15  ;;  %v531_v15 = vld [vmem:[%s11975_s4 + $0xb8] sm:$0xff]  ;;  %8332 = vmatprep.mubr.msk.f32.mxu0 %vm9700_vm0, %v9699_v18 }
 0x12e   :  { %v10205_v41 = vadd.f32 %v7969_v40, %v351_v23  ;;  %9115 = vmatprep.subr.bf16.mxu1 %v9114_v19 }
 0x130   :  { %456 = vadd.xlane.f32.xlu1 %v450_v42  ;;  %446 = vadd.xlane.f32.xlu0 %v10205_v41  ;;  %v451_v45 = vmul.f32 %v10205_v41, %v10205_v41  ;;  %v10293_v42 = vshrl.u32 %v56_v32, 7 }
 0x132   :  { %v10296_v49 = vsub.s32 0, %v10293_v42  ;;  %v10302_v54 = vsub.s32 1, %v10293_v42  ;;  %v10395_v62 = vsub.s32 2, %v10293_v42 }
 0x134   :  { %458 = vadd.xlane.f32.xlu1 %v451_v45  ;;  %v495_v57 = vrot.slane %v439_v53, %v10296_v49  ;;  %v503_v61 = vrot.slane %v439_v53, %v10302_v54 }
 0x1b1   :  { %v441_v20 = vpop.xlane.xlu0 %440 }
 0x1b2   :  { %v460_v21 = vmul.f32 0.015625, %v441_v20 }
 0x1b4   :  { %v468_v24 = vmul.f32 %v460_v21, %v460_v21  ;;  %v476_v56 = vsub.f32 %v10192_v27, %v460_v21  ;;  %v9126_v21 = vpack.c.bf16 %v531_v15, %v528_v14 }
 0x1b5   :  { %v443_v22 = vpop.xlane.xlu1 %442  ;;  %v453_v23 = vpop.xlane.xlu0 %452 }
 0x1b6   :  { %v461_v25 = vmul.f32 0.015625, %v443_v22  ;;  %v464_v26 = vmul.f32 0.015625, %v453_v23  ;;  %v534_v23 = vld [vmem:[%s11975_s4 + $0xd0] sm:$0xff] }
 0x1b8   :  { %v472_v28 = vsub.f32 %v464_v26, %v468_v24  ;;  %v469_v33 = vmul.f32 %v461_v25, %v461_v25  ;;  %v477_v0 = vsub.f32 %v10195_v31, %v461_v25  ;;  %v537_v24 = vld [vmem:[%s11975_s4 + $0xe8] sm:$0xff] }
 0x1b9   :  { %v455_v29 = vpop.xlane.xlu1 %454  ;;  %v445_v30 = vpop.xlane.xlu0 %444 }
 0x1ba   :  { %v480_v34 = vadd.f32 1e-06, %v472_v28  ;;  %v465_v35 = vmul.f32 0.015625, %v455_v29  ;;  %v462_v37 = vmul.f32 0.015625, %v445_v30  ;;  %v9130_v28 = vpack.c.bf16 %v537_v24, %v534_v23  ;;  %v540_v29 = vld [vmem:[%s11975_s4 + $0x100] sm:$0xff]  ;;  %v543_v30 = vld [vmem:[%s11975_s4 + $0x118] sm:$0xff] }
 0x1bc   :  { %9517 = vrsqrt.f32 %v480_v34  ;;  %v473_v38 = vsub.f32 %v465_v35, %v469_v33  ;;  %v470_v44 = vmul.f32 %v462_v37, %v462_v37  ;;  %v478_v8 = vsub.f32 %v10200_v36, %v462_v37  ;;  %v546_v34 = vld [vmem:[%s11975_s4 + $0x130] sm:$0xff]  ;;  %v549_v35 = vld [vmem:[%s11975_s4 + $0x148] sm:$0xff] }
 0x1bd   :  { %v457_v39 = vpop.xlane.xlu1 %456  ;;  %v447_v40 = vpop.xlane.xlu0 %446  ;;  %v9134_v33 = vpack.c.bf16 %v543_v30, %v540_v29  ;;  %v9138_v37 = vpack.c.bf16 %v549_v35, %v546_v34 }
 0x1be   :  { %v481_v43 = vadd.f32 1e-06, %v473_v38  ;;  %v466_v45 = vmul.f32 0.015625, %v457_v39  ;;  %v463_v46 = vmul.f32 0.015625, %v447_v40  ;;  %v552_v38 = vld [vmem:[%s11975_s4 + $0x160] sm:$0xff]  ;;  %v555_v39 = vld [vmem:[%s11975_s4 + $0x178] sm:$0xff] }
 0x1bf   :  { %v9142_v40 = vpack.c.bf16 %v555_v39, %v552_v38 }
 0x1c0   :  { %9519 = vrsqrt.f32 %v481_v43  ;;  %v474_v47 = vsub.f32 %v466_v45, %v470_v44  ;;  %v471_v51 = vmul.f32 %v463_v46, %v463_v46  ;;  %v479_v16 = vsub.f32 %v10205_v41, %v463_v46  ;;  %v556_v43 = vld [vmem:[%s11978_s5] sm:$0x7] }
 0x1c1   :  { %v459_v48 = vpop.xlane.xlu1 %458  ;;  %v561_v44 = vrot.slane %v556_v43, %v10296_v49  ;;  %v565_v45 = vrot.slane %v556_v43, %v10302_v54 }
 0x1c2   :  { %v482_v50 = vadd.f32 1e-06, %v474_v47  ;;  %v467_v52 = vmul.f32 0.015625, %v459_v48 }
 0x1c4   :  { %9521 = vrsqrt.f32 %v482_v50  ;;  %v475_v55 = vsub.f32 %v467_v52, %v471_v51 }
 0x1c6   :  { %v9518_v58 = vpop.eup %9517  ;;  %v483_v59 = vadd.f32 1e-06, %v475_v55 }
 0x1c7   :  { %v488_v60 = vmul.f32 %v9518_v58, %v476_v56 }
 0x1c8   :  { %9523 = vrsqrt.f32 %v483_v59 }
 0x1c9   :  { %v496_v1 = vmul.f32 %v495_v57, %v488_v60 }
 0x1ca   :  { %v9520_v2 = vpop.eup %9519 }
 0x1cb   :  { %v504_v3 = vadd.f32 %v503_v61, %v496_v1  ;;  %v489_v5 = vmul.f32 %v9520_v2, %v477_v0  ;;  %v569_v2 = vrot.slane %v556_v43, %v10395_v62 }
 0x1cd   :  { %638 = vmatmul.mubr.f32.vlgmr.msra.gmra.mrb[8].mxu1 %v504_v3  ;;  %v497_v9 = vmul.f32 %v495_v57, %v489_v5 }
 0x1ce   :  { %v9522_v10 = vpop.eup %9521  ;;  %9117 = vmatpush3.bf16.msra.mxu1 %v9114_v19  ;;  %643 = vmatprep.mubr.f32.mxu1 %v9699_v18 }
 0x1cf   :  { %9119 = vmatprep.subr.bf16.mxu1 %v9118_v4  ;;  %v505_v11 = vadd.f32 %v503_v61, %v497_v9  ;;  %v490_v13 = vmul.f32 %v9522_v10, %v478_v8 }
 0x1d1   :  { %644 = vmatmul.mubr.f32.gmra.mrb[10].mxu1 %v505_v11  ;;  %v498_v17 = vmul.f32 %v495_v57, %v490_v13 }
 0x1d2   :  { %v9524_v20 = vpop.eup %9523  ;;  %9121 = vmatpush3.bf16.msra.mxu1 %v9118_v4  ;;  %649 = vmatprep.mubr.f32.mxu1 %v9699_v18 }
 0x1d3   :  { %9123 = vmatprep.subr.bf16.mxu1 %v9122_v12  ;;  %v506_v19 = vadd.f32 %v503_v61, %v498_v17  ;;  %v491_v22 = vmul.f32 %v9524_v20, %v479_v16 }
 0x1d5   :  { %650 = vmatmul.mubr.f32.gmra.mrb[12].mxu1 %v506_v19  ;;  %v499_v25 = vmul.f32 %v495_v57, %v491_v22 }
 0x1d6   :  { %9125 = vmatpush3.bf16.msra.mxu1 %v9122_v12  ;;  %655 = vmatprep.mubr.f32.mxu1 %v9699_v18 }
 0x1d7   :  { %9127 = vmatprep.subr.bf16.mxu1 %v9126_v21  ;;  %v507_v26 = vadd.f32 %v503_v61, %v499_v25 }
 0x1d9   :  { %656 = vmatmul.mubr.f32.gmra.mrb[14].mxu1 %v507_v26 }
 0x1da   :  { %9129 = vmatpush3.bf16.msra.mxu1 %v9126_v21  ;;  %8324 = vmatprep.mubr.f32.mxu1 %v504_v3 }
 0x1db   :  { %9131 = vmatprep.subr.bf16.mxu1 %v9130_v28 }
 0x1de   :  { %9133 = vmatpush3.bf16.msra.mxu1 %v9130_v28 }
 0x1df   :  { %9135 = vmatprep.subr.bf16.mxu1 %v9134_v33 }
 0x1e2   :  { %9137 = vmatpush3.bf16.msra.mxu1 %v9134_v33 }
 0x1e3   :  { %9139 = vmatprep.subr.bf16.mxu1 %v9138_v37 }
 0x1e6   :  { %9141 = vmatpush3.bf16.msra.mxu1 %v9138_v37 }
 0x1e7   :  { %9143 = vmatprep.subr.bf16.mxu1 %v9142_v40 }
 0x1ea   :  { %9145 = vmatpush3.bf16.msra.mxu1 %v9142_v40 }
 0x1eb   :  { %8340 = vmatprep.subr.mxu1 %v9699_v18 }
 0x1ed   :  { %8325 = vmatmul.mubr.f32.vlgmr.msra.gmra.mrb[16].mxu1 %v505_v11 }
 0x1ee   :  { %8327 = vmatprep.mubr.f32.mxu1 %v506_v19 }
 0x1f1   :  { %8328 = vmatmul.mubr.f32.gmra.mrb[18].mxu1 %v507_v26 }
 0x1f2   :  { %8342 = vmatprep.mubr.msk.f32.mxu1 %vm9700_vm0, %v9699_v18 }
 0x2a0   :  { %v639_v46 = vpop.f32.mrb[8].mxu1 }
 0x2a1   :  { %v640_v47 = vadd.f32 %v639_v46, %v561_v44  ;;  %v641_v48 = vpop.f32.mrb[9].mxu1 }
 0x2a2   :  { %v642_v50 = vadd.f32 %v641_v48, %v565_v45 }
 0x2a3   :  { %904 = vrot.lane.b32.xlu1 %v640_v47, %s9701_s19 }
 0x2a4   :  { %v645_v51 = vpop.f32.mrb[10].mxu1  ;;  %906 = vrot.lane.b32.xlu0 %v642_v50, %s9701_s19  ;;  %8331 = vmatpush3.xpose.msk.msra.mxu0 %vm747_vm1, %v642_v50 }
 0x2a5   :  { %v647_v52 = vpop.f32.mrb[11].mxu1  ;;  %8335 = vmatprep.subr.mxu0 %v9699_v18  ;;  %v646_v59 = vadd.f32 %v645_v51, %v561_v44 }
 0x2a6   :  { %v10374_v56 = vadd.f32 %v647_v52, %v565_v45 }
 0x2a7   :  { %827 = vrot.lane.b32.xlu1 %v642_v50, %s9702_s0  ;;  %8333 = vmatmul.mubr.msk.f32.vlgmr.msra.gmra.mrb[16].mxu0 %vm747_vm1, %v640_v47 }
 0x2a8   :  { %825 = vrot.lane.b32.xlu0 %v640_v47, %s9702_s0  ;;  %v651_v53 = vpop.f32.mrb[12].mxu1  ;;  %8337 = vmatprep.mubr.msk.f32.mxu0 %vm9700_vm0, %v9699_v18 }
 0x2a9   :  { %v653_v55 = vpop.f32.mrb[13].mxu1  ;;  %v10384_v60 = vadd.f32 %v651_v53, %v561_v44 }
 0x2aa   :  { %v654_v61 = vadd.f32 %v653_v55, %v565_v45 }
 0x2ab   :  { %985 = vrot.lane.b32.xlu1 %v642_v50, %s9703_s21 }
 0x2ac   :  { %1141 = vrot.lane.b32.xlu0 %v10374_v56, %s9702_s0  ;;  %v657_v57 = vpop.f32.mrb[14].mxu1 }
 0x2ad   :  { %v659_v58 = vpop.f32.mrb[15].mxu1  ;;  %v10412_v7 = vadd.f32 %v657_v57, %v561_v44  ;;  %v57_v44 = vand.u32 127, %v56_v32 }
 0x2ae   :  { %v10398_v1 = vadd.f32 %v659_v58, %v565_v45  ;;  %v9704_v45 = vmov -1e+30  }
 0x2af   :  { %983 = vrot.lane.b32.xlu1 %v640_v47, %s9703_s21  ;;  %vm58_vm2 = vcmp.lt.s32.totalorder %v57_v44, 5 }
 0x2b0   :  { %1220 = vrot.lane.b32.xlu0 %v10374_v56, %s9701_s19  ;;  %v10525_v46 = vsel %vm58_vm2, 0.0, %v9704_v45 }
 0x2b3   :  { %1139 = vrot.lane.b32.xlu1 %v646_v59, %s9702_s0 }
 0x2b4   :  { %1218 = vrot.lane.b32.xlu0 %v646_v59, %s9701_s19 }
 0x2b7   :  { %1299 = vrot.lane.b32.xlu1 %v10374_v56, %s9703_s21 }
 0x2b8   :  { %1532 = vrot.lane.b32.xlu0 %v10384_v60, %s9701_s19 }
 0x2bb   :  { %1297 = vrot.lane.b32.xlu1 %v646_v59, %s9703_s21 }
 0x2bc   :  { %1455 = vrot.lane.b32.xlu0 %v654_v61, %s9702_s0 }
 0x2bf   :  { %1453 = vrot.lane.b32.xlu1 %v10384_v60, %s9702_s0 }
 0x2c0   :  { %v8326_v63 = vpop.f32.mrb[16].mxu1  ;;  %1534 = vrot.lane.b32.xlu0 %v654_v61, %s9701_s19 }
 0x2c1   :  { %v728_v0 = vpop.f32.mrb[17].mxu1  ;;  %v10418_v8 = vadd.f32 %v8326_v63, %v569_v2 }
 0x2c2   :  { %v10428_v9 = vadd.f32 %v728_v0, %v569_v2 }
 0x2c3   :  { %1611 = vrot.lane.b32.xlu1 %v10384_v60, %s9703_s21 }
 0x2c4   :  { %v8329_v3 = vpop.f32.mrb[18].mxu1  ;;  %1769 = vrot.lane.b32.xlu0 %v10398_v1, %s9702_s0 }
 0x2c5   :  { %v10405_v4 = vadd.f32 %v8329_v3, %v569_v2  ;;  %v738_v5 = vpop.f32.mrb[19].mxu1 }
 0x2c6   :  { %v10407_v6 = vadd.f32 %v738_v5, %v569_v2 }
 0x2c7   :  { %1613 = vrot.lane.b32.xlu1 %v654_v61, %s9703_s21 }
 0x2c8   :  { %1848 = vrot.lane.b32.xlu0 %v10398_v1, %s9701_s19 }
 0x2cb   :  { %1767 = vrot.lane.b32.xlu1 %v10412_v7, %s9702_s0 }
 0x2cc   :  { %1846 = vrot.lane.b32.xlu0 %v10412_v7, %s9701_s19 }
 0x2cf   :  { %1927 = vrot.lane.b32.xlu1 %v10398_v1, %s9703_s21 }
 0x2d0   :  { %2590 = vrot.lane.b32.xlu0 %v10418_v8, %s9702_s0 }
 0x2d3   :  { %1925 = vrot.lane.b32.xlu1 %v10412_v7, %s9703_s21 }
 0x2d4   :  { %2742 = vrot.lane.b32.xlu0 %v10418_v8, %s9703_s21 }
 0x2d7   :  { %2666 = vrot.lane.b32.xlu1 %v10418_v8, %s9701_s19 }
 0x2d8   :  { %2271 = vrot.lane.b32.xlu0 %v10428_v9, %s9702_s0 }
 0x2db   :  { %2347 = vrot.lane.b32.xlu1 %v10428_v9, %s9701_s19 }
 0x2dc   :  { %2423 = vrot.lane.b32.xlu0 %v10428_v9, %s9703_s21 }
 0x315   :  { %v905_v10 = vpop.permute.xlu1 %904 }
 0x316   :  { %v907_v11 = vpop.permute.xlu0 %906 }
 0x317   :  { %8341 = vmatpush3.xpose.msk.msra.mxu1 %vm747_vm1, %v907_v11 }
 0x318   :  { %8345 = vmatprep.subr.mxu1 %v9699_v18 }
 0x319   :  { %v828_v12 = vpop.permute.xlu1 %827 }
 0x31a   :  { %8336 = vmatpush3.xpose.msk.msra.mxu0 %vm747_vm1, %v828_v12  ;;  %8343 = vmatmul.mubr.msk.f32.vlgmr.msra.gmra.mrb[20].mxu1 %vm747_vm1, %v905_v10  ;;  %v826_v13 = vpop.permute.xlu0 %825 }
 0x31b   :  { %8347 = vmatprep.mubr.msk.f32.mxu1 %vm9700_vm0, %v9699_v18  ;;  %8360 = vmatprep.subr.mxu0 %v9699_v18 }
 0x31d   :  { %v986_v14 = vpop.permute.xlu1 %985  ;;  %8338 = vmatmul.mubr.msk.f32.vlgmr.msra.gmra.mrb[18].mxu0 %vm747_vm1, %v826_v13 }
 0x31e   :  { %8346 = vmatpush3.xpose.msk.msra.mxu1 %vm747_vm1, %v986_v14  ;;  %v1142_v15 = vpop.permute.xlu0 %1141  ;;  %8362 = vmatprep.mubr.msk.f32.mxu0 %vm9700_vm0, %v9699_v18 }
 0x31f   :  { %8350 = vmatprep.subr.mxu1 %v9699_v18 }
 0x321   :  { %v984_v16 = vpop.permute.xlu1 %983 }
 0x322   :  { %8348 = vmatmul.mubr.msk.f32.vlgmr.msra.gmra.mrb[22].mxu1 %vm747_vm1, %v984_v16  ;;  %v1221_v17 = vpop.permute.xlu0 %1220 }
 0x323   :  { %8351 = vmatpush3.xpose.msk.msra.mxu1 %vm747_vm1, %v10374_v56  ;;  %8361 = vmatpush3.xpose.msk.msra.mxu0 %vm747_vm1, %v1221_v17 }
 0x324   :  { %8352 = vmatprep.mubr.msk.f32.mxu1 %vm9700_vm0, %v9699_v18  ;;  %8355 = vmatprep.subr.mxu1 %v9699_v18 }
 0x325   :  { %v1140_v20 = vpop.permute.xlu1 %1139  ;;  %8370 = vmatprep.subr.mxu0 %v9699_v18 }
 0x326   :  { %8353 = vmatmul.mubr.msk.f32.vlgmr.msra.gmra.mrb[24].mxu1 %vm747_vm1, %v646_v59  ;;  %v1219_v19 = vpop.permute.xlu0 %1218 }
 0x327   :  { %8356 = vmatpush3.xpose.msk.msra.mxu1 %vm747_vm1, %v1142_v15  ;;  %8363 = vmatmul.mubr.msk.f32.vlgmr.msra.gmra.mrb[20].mxu0 %vm747_vm1, %v1219_v19 }
 0x328   :  { %8371 = vmatpush3.xpose.msk.msra.mxu0 %vm747_vm1, %v654_v61  ;;  %8357 = vmatprep.mubr.msk.f32.mxu1 %vm9700_vm0, %v9699_v18 }
 0x329   :  { %v1300_v21 = vpop.permute.xlu1 %1299  ;;  %8365 = vmatprep.subr.mxu1 %v9699_v18  ;;  %8372 = vmatprep.mubr.msk.f32.mxu0 %vm9700_vm0, %v9699_v18 }
 0x32a   :  { %8358 = vmatmul.mubr.msk.f32.vlgmr.msra.gmra.mrb[26].mxu1 %vm747_vm1, %v1140_v20  ;;  %v1533_v22 = vpop.permute.xlu0 %1532  ;;  %8380 = vmatprep.subr.mxu0 %v9699_v18 }
 0x32b   :  { %8366 = vmatpush3.xpose.msk.msra.mxu1 %vm747_vm1, %v1300_v21  ;;  %8373 = vmatmul.mubr.msk.f32.vlgmr.msra.gmra.mrb[22].mxu0 %vm747_vm1, %v10384_v60 }
 0x32c   :  { %8367 = vmatprep.mubr.msk.f32.mxu1 %vm9700_vm0, %v9699_v18  ;;  %8375 = vmatprep.subr.mxu1 %v9699_v18 }
 0x32d   :  { %v1298_v23 = vpop.permute.xlu1 %1297  ;;  %8382 = vmatprep.mubr.msk.f32.mxu0 %vm9700_vm0, %v9699_v18 }
 0x32e   :  { %8368 = vmatmul.mubr.msk.f32.vlgmr.msra.gmra.mrb[28].mxu1 %vm747_vm1, %v1298_v23  ;;  %v1456_v24 = vpop.permute.xlu0 %1455 }
 0x32f   :  { %8376 = vmatpush3.xpose.msk.msra.mxu1 %vm747_vm1, %v1456_v24  ;;  %8377 = vmatprep.mubr.msk.f32.mxu1 %vm9700_vm0, %v9699_v18 }
 0x330   :  { %8385 = vmatprep.subr.mxu1 %v9699_v18 }
 0x331   :  { %v1454_v25 = vpop.permute.xlu1 %1453 }
 0x332   :  { %8378 = vmatmul.mubr.msk.f32.vlgmr.msra.gmra.mrb[30].mxu1 %vm747_vm1, %v1454_v25  ;;  %v1535_v26 = vpop.permute.xlu0 %1534 }
 0x333   :  { %8381 = vmatpush3.xpose.msk.msra.mxu0 %vm747_vm1, %v1535_v26  ;;  %8387 = vmatprep.mubr.msk.f32.mxu1 %vm9700_vm0, %v9699_v18 }
 0x334   :  { %8390 = vmatprep.subr.mxu0 %v9699_v18 }
 0x335   :  { %v1612_v28 = vpop.permute.xlu1 %1611 }
 0x336   :  { %8383 = vmatmul.mubr.msk.f32.vlgmr.msra.gmra.mrb[24].mxu0 %vm747_vm1, %v1533_v22  ;;  %v1770_v29 = vpop.permute.xlu0 %1769 }
 0x337   :  { %8391 = vmatpush3.xpose.msk.msra.mxu0 %vm747_vm1, %v10398_v1  ;;  %8392 = vmatprep.mubr.msk.f32.mxu0 %vm9700_vm0, %v9699_v18 }
 0x338   :  { %8400 = vmatprep.subr.mxu0 %v9699_v18 }
 0x339   :  { %v1614_v30 = vpop.permute.xlu1 %1613 }
 0x33a   :  { %8386 = vmatpush3.xpose.msk.msra.mxu1 %vm747_vm1, %v1614_v30  ;;  %8393 = vmatmul.mubr.msk.f32.vlgmr.msra.gmra.mrb[26].mxu0 %vm747_vm1, %v10412_v7  ;;  %v1849_v33 = vpop.permute.xlu0 %1848 }
 0x33b   :  { %8401 = vmatpush3.xpose.msk.msra.mxu0 %vm747_vm1, %v1849_v33  ;;  %8395 = vmatprep.subr.mxu1 %v9699_v18 }
 0x33c   :  { %8402 = vmatprep.mubr.msk.f32.mxu0 %vm9700_vm0, %v9699_v18  ;;  %8410 = vmatprep.subr.mxu0 %v9699_v18 }
 0x33d   :  { %v1768_v34 = vpop.permute.xlu1 %1767  ;;  %8388 = vmatmul.mubr.msk.f32.vlgmr.msra.gmra.mrb[32].mxu1 %vm747_vm1, %v1612_v28 }
 0x33e   :  { %8396 = vmatpush3.xpose.msk.msra.mxu1 %vm747_vm1, %v1770_v29  ;;  %v1847_v35 = vpop.permute.xlu0 %1846  ;;  %8397 = vmatprep.mubr.msk.f32.mxu1 %vm9700_vm0, %v9699_v18 }
 0x33f   :  { %8403 = vmatmul.mubr.msk.f32.vlgmr.msra.gmra.mrb[28].mxu0 %vm747_vm1, %v1847_v35  ;;  %8405 = vmatprep.subr.mxu1 %v9699_v18 }
 0x340   :  { %8411 = vmatpush3.msra.mxu0 %v10428_v9  ;;  %8412 = vmatprep.mubr.msk.f32.mxu0 %vm9700_vm0, %v9699_v18 }
 0x341   :  { %v1928_v37 = vpop.permute.xlu1 %1927  ;;  %8398 = vmatmul.mubr.msk.f32.vlgmr.msra.gmra.mrb[34].mxu1 %vm747_vm1, %v1768_v34  ;;  %8420 = vmatprep.subr.mxu0 %v9699_v18 }
 0x342   :  { %8406 = vmatpush3.xpose.msk.msra.mxu1 %vm747_vm1, %v1928_v37  ;;  %v10513_v38 = vpop.permute.xlu0 %2590  ;;  %8407 = vmatprep.mubr.msk.f32.mxu1 %vm9700_vm0, %v9699_v18 }
 0x343   :  { %8415 = vmatprep.subr.mxu1 %v9699_v18 }
 0x345   :  { %v1926_v39 = vpop.permute.xlu1 %1925 }
 0x346   :  { %8408 = vmatmul.mubr.msk.f32.vlgmr.msra.gmra.mrb[36].mxu1 %vm747_vm1, %v1926_v39  ;;  %v10519_v40 = vpop.permute.xlu0 %2742 }
 0x347   :  { %8417 = vmatprep.mubr.msk.f32.mxu1 %vm9700_vm0, %v9699_v18 }
 0x34a   :  { %v2272_v43 = vpop.permute.xlu0 %2271 }
 0x34b   :  { %8416 = vmatpush3.msra.mxu1 %v2272_v43 }
 0x34c   :  { %8425 = vmatprep.subr.mxu1 %v9699_v18 }
 0x37a   :  { %v820_v47 = vpop.f32.mrb[16].mxu0 }
 0x37b   :  { %v824_v48 = vmul.f32 0.25, %v820_v47  ;;  %v8334_v50 = vpop.f32.mrb[17].mxu0 }
 0x37d   :  { %v10528_v51 = vadd.f32 %v824_v48, %v10525_v46 }
 0x37f   :  { %v2021_v52 = vsel %vm2020_vm3, %v10528_v51, -inf }
 0x380   :  { %2022 = vmax.xlane.f32.xlu0 %v2021_v52 }
 0x3ed   :  { %v978_v53 = vpop.f32.mrb[20].mxu1 }
 0x3ee   :  { %v982_v55 = vmul.f32 0.25, %v978_v53  ;;  %v8344_v56 = vpop.f32.mrb[21].mxu1 }
 0x3f0   :  { %v899_v57 = vpop.f32.mrb[18].mxu0  ;;  %v10533_v32 = vadd.f32 %v982_v55, %v10525_v46 }
 0x3f1   :  { %v903_v58 = vmul.f32 0.25, %v899_v57  ;;  %v8339_v59 = vpop.f32.mrb[19].mxu0 }
 0x3f2   :  { %v2027_v60 = vsel %vm2020_vm3, %v10533_v32, -inf }
 0x3f3   :  { %2028 = vmax.xlane.f32.xlu0 %v2027_v60  ;;  %v10538_v61 = vadd.f32 %v903_v58, %v10525_v46 }
 0x3f5   :  { %v1057_v63 = vpop.f32.mrb[22].mxu1  ;;  %v2024_v0 = vsel %vm2020_vm3, %v10538_v61, -inf }
 0x3f6   :  { %v1061_v1 = vmul.f32 0.25, %v1057_v63  ;;  %v8349_v2 = vpop.f32.mrb[23].mxu1  ;;  %2025 = vmax.xlane.f32.xlu1 %v2024_v0 }
 0x3f8   :  { %v10543_v3 = vadd.f32 %v1061_v1, %v10525_v46 }
 0x3f9   :  { %v1134_v5 = vpop.f32.mrb[24].mxu1 }
 0x3fa   :  { %v8354_v7 = vpop.f32.mrb[25].mxu1  ;;  %v1292_v9 = vpop.f32.mrb[20].mxu0  ;;  %v2030_v10 = vsel %vm2020_vm3, %v10543_v3, -inf  ;;  %v1138_v11 = vmul.f32 0.25, %v1134_v5 }
 0x3fb   :  { %v1296_v12 = vmul.f32 0.25, %v1292_v9  ;;  %2031 = vmax.xlane.f32.xlu0 %v2030_v10  ;;  %v8364_v13 = vpop.f32.mrb[21].mxu0 }
 0x3fc   :  { %v10553_v23 = vadd.f32 %v1138_v11, %v10525_v46 }
 0x3fd   :  { %v1213_v14 = vpop.f32.mrb[26].mxu1  ;;  %v10548_v15 = vadd.f32 %v1296_v12, %v10525_v46 }
 0x3fe   :  { %v1217_v16 = vmul.f32 0.25, %v1213_v14  ;;  %v8359_v17 = vpop.f32.mrb[27].mxu1  ;;  %v1448_v20 = vpop.f32.mrb[22].mxu0  ;;  %v2033_v30 = vsel %vm2020_vm3, %v10553_v23, -inf }
 0x3ff   :  { %v1452_v19 = vmul.f32 0.25, %v1448_v20  ;;  %v8374_v21 = vpop.f32.mrb[23].mxu0  ;;  %v2039_v22 = vsel %vm2020_vm3, %v10548_v15, -inf  ;;  %v10596_v14 = vpop.permute.xlu0 %2423 }
 0x400   :  { %2040 = vmax.xlane.f32.xlu0 %v2039_v22  ;;  %v10556_v24 = vadd.f32 %v1217_v16, %v10525_v46 }
 0x401   :  { %v1371_v25 = vpop.f32.mrb[28].mxu1  ;;  %v10563_v33 = vadd.f32 %v1452_v19, %v10525_v46 }
 0x402   :  { %v1375_v26 = vmul.f32 0.25, %v1371_v25  ;;  %v8369_v28 = vpop.f32.mrb[29].mxu1  ;;  %v2036_v29 = vsel %vm2020_vm3, %v10556_v24, -inf }
 0x403   :  { %2037 = vmax.xlane.f32.xlu1 %v2036_v29  ;;  %v2045_v44 = vsel %vm2020_vm3, %v10563_v33, -inf }
 0x404   :  { %2034 = vmax.xlane.f32.xlu0 %v2033_v30  ;;  %v10566_v34 = vadd.f32 %v1375_v26, %v10525_v46 }
 0x405   :  { %v1527_v35 = vpop.f32.mrb[30].mxu1 }
 0x406   :  { %v1531_v37 = vmul.f32 0.25, %v1527_v35  ;;  %v8379_v39 = vpop.f32.mrb[31].mxu1  ;;  %v2042_v43 = vsel %vm2020_vm3, %v10566_v34, -inf }
 0x407   :  { %2043 = vmax.xlane.f32.xlu1 %v2042_v43  ;;  %v10618_v39 = vpop.permute.xlu1 %2666 }
 0x408   :  { %2046 = vmax.xlane.f32.xlu0 %v2045_v44  ;;  %v10573_v45 = vadd.f32 %v1531_v37, %v10525_v46 }
 0x409   :  { %v1606_v47 = vpop.f32.mrb[24].mxu0 }
 0x40a   :  { %v1610_v48 = vmul.f32 0.25, %v1606_v47  ;;  %v8384_v50 = vpop.f32.mrb[25].mxu0  ;;  %v2048_v52 = vsel %vm2020_vm3, %v10573_v45, -inf }
 0x40b   :  { %2049 = vmax.xlane.f32.xlu1 %v2048_v52  ;;  %v10620_v43 = vpop.permute.xlu1 %2347 }
 0x40c   :  { %v10578_v53 = vadd.f32 %v1610_v48, %v10525_v46 }
 0x40d   :  { %v1762_v55 = vpop.f32.mrb[26].mxu0  ;;  %v2023_v16 = vpop.xlane.xlu0 %2022 }
 0x40e   :  { %v1766_v56 = vmul.f32 0.25, %v1762_v55  ;;  %v8394_v57 = vpop.f32.mrb[27].mxu0  ;;  %v2051_v58 = vsel %vm2020_vm3, %v10578_v53, -inf  ;;  %v2069_v17 = vsub.f32 %v10528_v51, %v2023_v16 }
 0x40f   :  { %2052 = vmax.xlane.f32.xlu0 %v2051_v58 }
 0x410   :  { %v1685_v59 = vpop.f32.mrb[32].mxu1  ;;  %v10583_v60 = vadd.f32 %v1766_v56, %v10525_v46  ;;  %v2085_v19 = vmul.f32 1.442695, %v2069_v17 }
 0x411   :  { %v8389_v63 = vpop.f32.mrb[33].mxu1  ;;  %v1689_v20 = vmul.f32 0.25, %v1685_v59 }
 0x412   :  { %v1920_v0 = vpop.f32.mrb[28].mxu0  ;;  %v2057_v1 = vsel %vm2020_vm3, %v10583_v60, -inf  ;;  %9525 = vpow2.f32 %v2085_v19 }
 0x413   :  { %v1924_v2 = vmul.f32 0.25, %v1920_v0  ;;  %2058 = vmax.xlane.f32.xlu0 %v2057_v1  ;;  %v8404_v5 = vpop.f32.mrb[29].mxu0  ;;  %v10600_v22 = vadd.f32 %v1689_v20, %v10525_v46 }
 0x414   :  { %v1841_v7 = vpop.f32.mrb[34].mxu1 }
 0x415   :  { %v8399_v9 = vpop.f32.mrb[35].mxu1  ;;  %v10588_v10 = vadd.f32 %v1924_v2, %v10525_v46  ;;  %v1845_v21 = vmul.f32 0.25, %v1841_v7  ;;  %v2054_v26 = vsel %vm2020_vm3, %v10600_v22, -inf }
 0x417   :  { %v2063_v11 = vsel %vm2020_vm3, %v10588_v10, -inf  ;;  %v10605_v28 = vadd.f32 %v1845_v21, %v10525_v46 }
 0x418   :  { %2064 = vmax.xlane.f32.xlu0 %v2063_v11 }
 0x419   :  { %v1999_v12 = vpop.f32.mrb[36].mxu1  ;;  %v2060_v29 = vsel %vm2020_vm3, %v10605_v28, -inf }
 0x41a   :  { %v8409_v13 = vpop.f32.mrb[37].mxu1  ;;  %v2003_v25 = vmul.f32 0.25, %v1999_v12 }
 0x41c   :  { %2983 = vrot.lane.b32.xlu1 %v10407_v6, %s9701_s19  ;;  %v10610_v51 = vadd.f32 %v2003_v25, %v10525_v46  ;;  %v10614_v35 = vpop.eup %9525 }
 0x41d   :  { %v2117_v37 = vsel %vm2020_vm3, %v10614_v35, 0.0 }
 0x41e   :  { %v2066_v30 = vsel %vm2020_vm3, %v10610_v51, -inf }
 0x42e   :  { %2907 = vrot.lane.b32.xlu0 %v10407_v6, %s9702_s0 }
 0x440   :  { %2055 = vmax.xlane.f32.xlu1 %v2054_v26 }
 0x444   :  { %2061 = vmax.xlane.f32.xlu1 %v2060_v29 }
 0x448   :  { %2067 = vmax.xlane.f32.xlu1 %v2066_v30 }
 0x44d   :  { %2118 = vadd.xlane.f32.xlu0 %v2117_v37 }
 0x480   :  { %v2029_v44 = vpop.xlane.xlu0 %2028 }
 0x481   :  { %v2071_v47 = vsub.f32 %v10533_v32, %v2029_v44 }
 0x483   :  { %v2089_v48 = vmul.f32 1.442695, %v2071_v47  ;;  %v2026_v50 = vpop.xlane.xlu1 %2025 }
 0x484   :  { %v2070_v52 = vsub.f32 %v10538_v61, %v2026_v50 }
 0x485   :  { %9527 = vpow2.f32 %v2089_v48 }
 0x486   :  { %v2087_v55 = vmul.f32 1.442695, %v2070_v52 }
 0x488   :  { %9529 = vpow2.f32 %v2087_v55  ;;  %v2032_v56 = vpop.xlane.xlu0 %2031 }
 0x489   :  { %v2072_v57 = vsub.f32 %v10543_v3, %v2032_v56 }
 0x48b   :  { %v2091_v58 = vmul.f32 1.442695, %v2072_v57 }
 0x48d   :  { %9531 = vpow2.f32 %v2091_v58  ;;  %v2041_v59 = vpop.xlane.xlu0 %2040 }
 0x48e   :  { %v2075_v63 = vsub.f32 %v10548_v15, %v2041_v59 }
 0x48f   :  { %v10626_v0 = vpop.eup %9527 }
 0x490   :  { %v2097_v1 = vmul.f32 1.442695, %v2075_v63  ;;  %v2123_v32 = vsel %vm2020_vm3, %v10626_v0, 0.0  ;;  %v2038_v21 = vpop.xlane.xlu1 %2037 }
 0x491   :  { %2124 = vadd.xlane.f32.xlu0 %v2123_v32  ;;  %v2035_v2 = vpop.xlane.xlu0 %2034  ;;  %v2074_v25 = vsub.f32 %v10556_v24, %v2038_v21 }
 0x492   :  { %v10630_v61 = vpop.eup %9529  ;;  %9533 = vpow2.f32 %v2097_v1  ;;  %v2073_v5 = vsub.f32 %v10553_v23, %v2035_v2 }
 0x493   :  { %v2120_v3 = vsel %vm2020_vm3, %v10630_v61, 0.0  ;;  %v2095_v29 = vmul.f32 1.442695, %v2074_v25 }
 0x494   :  { %v2093_v7 = vmul.f32 1.442695, %v2073_v5  ;;  %2121 = vadd.xlane.f32.xlu1 %v2120_v3  ;;  %v2044_v37 = vpop.xlane.xlu1 %2043 }
 0x495   :  { %v2047_v9 = vpop.xlane.xlu0 %2046  ;;  %v2076_v44 = vsub.f32 %v10566_v34, %v2044_v37 }
 0x496   :  { %9535 = vpow2.f32 %v2093_v7  ;;  %v2077_v15 = vsub.f32 %v10563_v33, %v2047_v9 }
 0x497   :  { %v10636_v11 = vpop.eup %9531  ;;  %v2099_v52 = vmul.f32 1.442695, %v2076_v44 }
 0x498   :  { %v2101_v12 = vmul.f32 1.442695, %v2077_v15  ;;  %v2126_v13 = vsel %vm2020_vm3, %v10636_v11, 0.0  ;;  %v2050_v50 = vpop.xlane.xlu1 %2049 }
 0x499   :  { %2127 = vadd.xlane.f32.xlu1 %v2126_v13  ;;  %v2078_v24 = vsub.f32 %v10573_v45, %v2050_v50 }
 0x49a   :  { %9537 = vpow2.f32 %v2101_v12 }
 0x49b   :  { %9539 = vpow2.f32 %v2095_v29  ;;  %v2103_v59 = vmul.f32 1.442695, %v2078_v24 }
 0x49c   :  { %v10640_v16 = vpop.eup %9533  ;;  %v2053_v26 = vpop.xlane.xlu0 %2052 }
 0x49d   :  { %v2135_v23 = vsel %vm2020_vm3, %v10640_v16, 0.0  ;;  %v2079_v30 = vsub.f32 %v10578_v53, %v2053_v26  ;;  %v10661_v57 = vpop.permute.xlu1 %2983 }
 0x49e   :  { %2136 = vadd.xlane.f32.xlu0 %v2135_v23 }
 0x49f   :  { %v2105_v47 = vmul.f32 1.442695, %v2079_v30 }
 0x4a0   :  { %v10644_v17 = vpop.eup %9535  ;;  %v2059_v48 = vpop.xlane.xlu0 %2058 }
 0x4a1   :  { %v2129_v20 = vsel %vm2020_vm3, %v10644_v17, 0.0  ;;  %9541 = vpow2.f32 %v2105_v47  ;;  %v2081_v55 = vsub.f32 %v10583_v60, %v2059_v48 }
 0x4a2   :  { %2130 = vadd.xlane.f32.xlu0 %v2129_v20  ;;  %9543 = vpow2.f32 %v2099_v52 }
 0x4a3   :  { %v2109_v56 = vmul.f32 1.442695, %v2081_v55 }
 0x4a4   :  { %v10648_v33 = vpop.eup %9537 }
 0x4a5   :  { %v2141_v19 = vsel %vm2020_vm3, %v10648_v33, 0.0  ;;  %v2065_v53 = vpop.xlane.xlu0 %2064  ;;  %v10663_v58 = vpop.eup %9539  ;;  %9545 = vpow2.f32 %v2109_v56 }
 0x4a6   :  { %2142 = vadd.xlane.f32.xlu0 %v2141_v19  ;;  %v2083_v34 = vsub.f32 %v10588_v10, %v2065_v53  ;;  %v2132_v1 = vsel %vm2020_vm3, %v10663_v58, 0.0  ;;  %9547 = vpow2.f32 %v2103_v59 }
 0x4a8   :  { %v2113_v60 = vmul.f32 1.442695, %v2083_v34 }
 0x4a9   :  { %v10680_v23 = vpop.permute.xlu0 %2907 }
 0x4aa   :  { %3224 = vrot.lane.b32.xlu1 %v10405_v4, %s9702_s0  ;;  %9549 = vpow2.f32 %v2113_v60 }
 0x4ab   :  { %v10668_v32 = vpop.eup %9541 }
 0x4ac   :  { %v2147_v5 = vsel %vm2020_vm3, %v10668_v32, 0.0  ;;  %v10673_v3 = vpop.eup %9543 }
 0x4ad   :  { %v2138_v12 = vsel %vm2020_vm3, %v10673_v3, 0.0 }
 0x4af   :  { %v10678_v13 = vpop.eup %9545 }
 0x4b0   :  { %v10685_v19 = vpop.eup %9547 }
 0x4b1   :  { %v2144_v25 = vsel %vm2020_vm3, %v10685_v19, 0.0 }
 0x4b4   :  { %v10689_v26 = vpop.eup %9549 }
 0x4b5   :  { %v2159_v30 = vsel %vm2020_vm3, %v10689_v26, 0.0 }
 0x4bc   :  { %3059 = vrot.lane.b32.xlu0 %v10407_v6, %s9703_s21 }
 0x4cd   :  { %v2056_v63 = vpop.xlane.xlu1 %2055 }
 0x4ce   :  { %2133 = vadd.xlane.f32.xlu1 %v2132_v1  ;;  %v2080_v45 = vsub.f32 %v10600_v22, %v2056_v63 }
 0x4d0   :  { %v2107_v10 = vmul.f32 1.442695, %v2080_v45 }
 0x4d1   :  { %v2062_v2 = vpop.xlane.xlu1 %2061 }
 0x4d2   :  { %v2082_v7 = vsub.f32 %v10605_v28, %v2062_v2  ;;  %2148 = vadd.xlane.f32.xlu1 %v2147_v5  ;;  %v2153_v28 = vsel %vm2020_vm3, %v10678_v13, 0.0 }
 0x4d4   :  { %v2111_v9 = vmul.f32 1.442695, %v2082_v7 }
 0x4d5   :  { %v2068_v15 = vpop.xlane.xlu1 %2067 }
 0x4d6   :  { %9551 = vpow2.f32 %v2111_v9  ;;  %v2084_v22 = vsub.f32 %v10610_v51, %v2068_v15  ;;  %2139 = vadd.xlane.f32.xlu1 %v2138_v12 }
 0x4d7   :  { %9553 = vpow2.f32 %v2107_v10 }
 0x4d8   :  { %v2115_v20 = vmul.f32 1.442695, %v2084_v22 }
 0x4da   :  { %2154 = vadd.xlane.f32.xlu1 %v2153_v28  ;;  %v2119_v21 = vpop.xlane.xlu0 %2118 }
 0x4db   :  { %9555 = vrcp.f32 %v2119_v21 }
 0x4dc   :  { %9557 = vpow2.f32 %v2115_v20 }
 0x4de   :  { %2145 = vadd.xlane.f32.xlu1 %v2144_v25 }
 0x4e0   :  { %v10691_v29 = vpop.eup %9551 }
 0x4e1   :  { %v2156_v51 = vsel %vm2020_vm3, %v10691_v29, 0.0  ;;  %v10697_v37 = vpop.eup %9553 }
 0x4e2   :  { %2157 = vadd.xlane.f32.xlu0 %v2156_v51  ;;  %2160 = vadd.xlane.f32.xlu1 %v2159_v30  ;;  %v2150_v47 = vsel %vm2020_vm3, %v10697_v37, 0.0 }
 0x4e5   :  { %v9556_v44 = vpop.eup %9555 }
 0x4e6   :  { %v10701_v48 = vpop.eup %9557  ;;  %2151 = vadd.xlane.f32.xlu1 %v2150_v47  ;;  %v2181_v50 = vmul.f32 %v9556_v44, %v10614_v35 }
 0x4e7   :  { %v2162_v52 = vsel %vm2020_vm3, %v10701_v48, 0.0 }
 0x4e8   :  { %8413 = vmatmul.mubr.msk.f32.vlgmr.msra.gmra.mrb[30].mxu0 %vm2020_vm3, %v2181_v50 }
 0x4e9   :  { %8421 = vmatpush3.msra.mxu0 %v10620_v43  ;;  %8422 = vmatprep.mubr.msk.f32.mxu0 %vm9700_vm0, %v9699_v18 }
 0x4ea   :  { %2163 = vadd.xlane.f32.xlu1 %v2162_v52  ;;  %8430 = vmatprep.subr.mxu0 %v9699_v18 }
 0x4f8   :  { %3300 = vrot.lane.b32.xlu0 %v10405_v4, %s9701_s19 }
 0x4fb   :  { %3376 = vrot.lane.b32.xlu1 %v10405_v4, %s9703_s21 }
 0x51e   :  { %v2125_v35 = vpop.xlane.xlu0 %2124 }
 0x51f   :  { %9559 = vrcp.f32 %v2125_v35 }
 0x521   :  { %v2122_v55 = vpop.xlane.xlu1 %2121 }
 0x522   :  { %9561 = vrcp.f32 %v2122_v55 }
 0x526   :  { %v2128_v43 = vpop.xlane.xlu1 %2127 }
 0x527   :  { %9563 = vrcp.f32 %v2128_v43 }
 0x529   :  { %v9560_v24 = vpop.eup %9559 }
 0x52a   :  { %v2183_v56 = vmul.f32 %v9560_v24, %v10626_v0 }
 0x52b   :  { %v2137_v53 = vpop.xlane.xlu0 %2136 }
 0x52c   :  { %v9562_v59 = vpop.eup %9561  ;;  %8423 = vmatmul.mubr.msk.f32.vlgmr.msra.gmra.mrb[32].mxu0 %vm2020_vm3, %v2183_v56  ;;  %v3467_v56 = vld [vmem:[%s11979_s6] sm:$0xff] }
 0x52d   :  { %8431 = vmatpush3.msra.mxu0 %v10418_v8  ;;  %v2182_v34 = vmul.f32 %v9562_v59, %v10630_v61  ;;  %8432 = vmatprep.mubr.msk.f32.mxu0 %vm9700_vm0, %v9699_v18 }
 0x52e   :  { %8440 = vmatprep.subr.mxu0 %v9699_v18 }
 0x52f   :  { %8418 = vmatmul.mubr.msk.f32.vlgmr.msra.gmra.mrb[38].mxu1 %vm2020_vm3, %v2182_v34  ;;  %v2131_v63 = vpop.xlane.xlu0 %2130  ;;  %v3470_v34 = vld [vmem:[%s11979_s6 + $0x18] sm:$0xff] }
 0x530   :  { %8426 = vmatpush3.msra.mxu1 %v10596_v14  ;;  %9565 = vrcp.f32 %v2131_v63  ;;  %8427 = vmatprep.mubr.msk.f32.mxu1 %vm9700_vm0, %v9699_v18 }
 0x531   :  { %v9564_v0 = vpop.eup %9563  ;;  %8435 = vmatprep.subr.mxu1 %v9699_v18  ;;  %9567 = vrcp.f32 %v2137_v53  ;;  %v3468_v53 = vld [vmem:[%s11979_s6 + $0x8] sm:$0xff] }
 0x532   :  { %v2184_v8 = vmul.f32 %v9564_v0, %v10636_v11  ;;  %v9146_v59 = vpack.c.bf16 %v3468_v53, %v3467_v56  ;;  %v3471_v0 = vld [vmem:[%s11979_s6 + $0x20] sm:$0xff] }
 0x533   :  { %v2143_v61 = vpop.xlane.xlu0 %2142 }
 0x534   :  { %8428 = vmatmul.mubr.msk.f32.vlgmr.msra.gmra.mrb[40].mxu1 %vm2020_vm3, %v2184_v8  ;;  %9569 = vrcp.f32 %v2143_v61  ;;  %v3472_v8 = vld [vmem:[%s11979_s6 + $0x28] sm:$0xff] }
 0x535   :  { %8436 = vmatpush3.msra.mxu1 %v10513_v38  ;;  %8437 = vmatprep.mubr.msk.f32.mxu1 %vm9700_vm0, %v9699_v18 }
 0x536   :  { %8445 = vmatprep.subr.mxu1 %v9699_v18 }
 0x537   :  { %v3060_v7 = vpop.permute.xlu0 %3059 }
 0x53a   :  { %v9566_v14 = vpop.eup %9565 }
 0x53b   :  { %v2185_v1 = vmul.f32 %v9566_v14, %v10644_v17  ;;  %v9568_v60 = vpop.eup %9567  ;;  %v9154_v14 = vpack.c.bf16 %v3472_v8, %v3471_v0 }
 0x53c   :  { %v2187_v38 = vmul.f32 %v9568_v60, %v10640_v16  ;;  %v3473_v60 = vld [vmem:[%s11979_s6 + $0x30] sm:$0xff] }
 0x53d   :  { %8433 = vmatmul.mubr.msk.f32.vlgmr.msra.gmra.mrb[34].mxu0 %vm2020_vm3, %v2185_v1 }
 0x53e   :  { %8441 = vmatpush3.msra.mxu0 %v10618_v39  ;;  %8442 = vmatprep.mubr.msk.f32.mxu0 %vm9700_vm0, %v9699_v18  ;;  %v9570_v11 = vpop.eup %9569  ;;  %v3225_v39 = vpop.permute.xlu1 %3224 }
 0x53f   :  { %8450 = vmatprep.subr.mxu0 %v9699_v18  ;;  %v2189_v17 = vmul.f32 %v9570_v11, %v10648_v33 }
 0x541   :  { %8443 = vmatmul.mubr.msk.f32.vlgmr.msra.gmra.mrb[36].mxu0 %vm2020_vm3, %v2187_v38  ;;  %v3474_v38 = vld [vmem:[%s11979_s6 + $0x38] sm:$0xff] }
 0x542   :  { %8451 = vmatpush3.msra.mxu0 %v10407_v6  ;;  %8452 = vmatprep.mubr.msk.f32.mxu0 %vm9700_vm0, %v9699_v18 }
 0x543   :  { %8460 = vmatprep.subr.mxu0 %v9699_v18 }
 0x545   :  { %8453 = vmatmul.mubr.msk.f32.vlgmr.msra.gmra.mrb[38].mxu0 %vm2020_vm3, %v2189_v17  ;;  %v9158_v17 = vpack.c.bf16 %v3474_v38, %v3473_v60 }
 0x546   :  { %8461 = vmatpush3.msra.mxu0 %v10661_v57  ;;  %8462 = vmatprep.mubr.msk.f32.mxu0 %vm9700_vm0, %v9699_v18 }
 0x547   :  { %8470 = vmatprep.subr.mxu0 %v9699_v18 }
 0x55b   :  { %v2134_v16 = vpop.xlane.xlu1 %2133 }
 0x55c   :  { %9571 = vrcp.f32 %v2134_v16 }
 0x55f   :  { %v2149_v6 = vpop.xlane.xlu1 %2148 }
 0x560   :  { %9573 = vrcp.f32 %v2149_v6  ;;  %v3475_v6 = vld [vmem:[%s11979_s6 + $0x40] sm:$0xff] }
 0x563   :  { %v2140_v45 = vpop.xlane.xlu1 %2139 }
 0x564   :  { %9575 = vrcp.f32 %v2140_v45  ;;  %v3476_v45 = vld [vmem:[%s11979_s6 + $0x48] sm:$0xff] }
 0x566   :  { %v9572_v2 = vpop.eup %9571 }
 0x567   :  { %v2155_v5 = vpop.xlane.xlu1 %2154  ;;  %v2186_v33 = vmul.f32 %v9572_v2, %v10663_v58 }
 0x568   :  { %9577 = vrcp.f32 %v2155_v5  ;;  %v9162_v5 = vpack.c.bf16 %v3476_v45, %v3475_v6 }
 0x569   :  { %8438 = vmatmul.mubr.msk.f32.vlgmr.msra.gmra.mrb[42].mxu1 %vm2020_vm3, %v2186_v33 }
 0x56a   :  { %v9574_v57 = vpop.eup %9573  ;;  %8446 = vmatpush3.msra.mxu1 %v10519_v40  ;;  %8447 = vmatprep.mubr.msk.f32.mxu1 %vm9700_vm0, %v9699_v18 }
 0x56b   :  { %v2146_v10 = vpop.xlane.xlu1 %2145  ;;  %v2191_v9 = vmul.f32 %v9574_v57, %v10668_v32  ;;  %8455 = vmatprep.subr.mxu1 %v9699_v18  ;;  %v3477_v57 = vld [vmem:[%s11979_s6 + $0x50] sm:$0xff] }
 0x56c   :  { %9579 = vrcp.f32 %v2146_v10 }
 0x56d   :  { %8463 = vmatmul.mubr.msk.f32.vlgmr.msra.gmra.mrb[40].mxu0 %vm2020_vm3, %v2191_v9  ;;  %v3479_v9 = vld [vmem:[%s11979_s6 + $0x60] sm:$0xff] }
 0x56e   :  { %v9576_v15 = vpop.eup %9575  ;;  %8471 = vmatpush3.msra.mxu0 %v10405_v4  ;;  %8472 = vmatprep.mubr.msk.f32.mxu0 %vm9700_vm0, %v9699_v18 }
 0x56f   :  { %v2161_v58 = vpop.xlane.xlu1 %2160  ;;  %v2158_v40 = vpop.xlane.xlu0 %2157  ;;  %v2188_v12 = vmul.f32 %v9576_v15, %v10673_v3  ;;  %8480 = vmatprep.subr.mxu0 %v9699_v18  ;;  %v3480_v15 = vld [vmem:[%s11979_s6 + $0x68] sm:$0xff] }
 0x570   :  { %9581 = vrcp.f32 %v2161_v58  ;;  %v9170_v58 = vpack.c.bf16 %v3480_v15, %v3479_v9 }
 0x571   :  { %8448 = vmatmul.mubr.msk.f32.vlgmr.msra.gmra.mrb[44].mxu1 %vm2020_vm3, %v2188_v12  ;;  %v3482_v12 = vld [vmem:[%s11979_s6 + $0x78] sm:$0xff] }
 0x572   :  { %v9578_v32 = vpop.eup %9577  ;;  %8456 = vmatpush3.msra.mxu1 %v10680_v23  ;;  %8457 = vmatprep.mubr.msk.f32.mxu1 %vm9700_vm0, %v9699_v18 }
 0x573   :  { %v2152_v22 = vpop.xlane.xlu1 %2151  ;;  %v3301_v4 = vpop.permute.xlu0 %3300  ;;  %v2193_v20 = vmul.f32 %v9578_v32, %v10678_v13  ;;  %8465 = vmatprep.subr.mxu1 %v9699_v18 }
 0x574   :  { %9583 = vrcp.f32 %v2152_v22 }
 0x575   :  { %8473 = vmatmul.mubr.msk.f32.vlgmr.msra.gmra.mrb[42].mxu0 %vm2020_vm3, %v2193_v20  ;;  %9585 = vrcp.f32 %v2158_v40  ;;  %v3481_v40 = vld [vmem:[%s11979_s6 + $0x70] sm:$0xff] }
 0x576   :  { %v9580_v3 = vpop.eup %9579  ;;  %8481 = vmatpush3.msra.mxu0 %v3301_v4  ;;  %8482 = vmatprep.mubr.msk.f32.mxu0 %vm9700_vm0, %v9699_v18  ;;  %v9174_v32 = vpack.c.bf16 %v3482_v12, %v3481_v40 }
 0x577   :  { %v2164_v28 = vpop.xlane.xlu1 %2163  ;;  %v2190_v23 = vmul.f32 %v9580_v3, %v10685_v19  ;;  %9147 = vmatprep.subr.bf16.mxu0 %v9146_v59 }
 0x578   :  { %9587 = vrcp.f32 %v2164_v28 }
 0x579   :  { %8458 = vmatmul.mubr.msk.f32.vlgmr.msra.gmra.mrb[46].mxu1 %vm2020_vm3, %v2190_v23 }
 0x57a   :  { %v9582_v21 = vpop.eup %9581  ;;  %8466 = vmatpush3.msra.mxu1 %v3060_v7  ;;  %8467 = vmatprep.mubr.msk.f32.mxu1 %vm9700_vm0, %v9699_v18  ;;  %v3478_v7 = vld [vmem:[%s11979_s6 + $0x58] sm:$0xff] }
 0x57b   :  { %v2195_v13 = vmul.f32 %v9582_v21, %v10689_v26  ;;  %8475 = vmatprep.subr.mxu1 %v9699_v18  ;;  %v3377_v26 = vpop.permute.xlu1 %3376  ;;  %v9166_v10 = vpack.c.bf16 %v3478_v7, %v3477_v57 }
 0x57d   :  { %8483 = vmatmul.mubr.msk.f32.vlgmr.msra.gmra.mrb[44].mxu0 %vm2020_vm3, %v2195_v13 }
 0x57e   :  { %v9584_v25 = vpop.eup %9583  ;;  %9149 = vmatpush3.bf16.msra.mxu0 %v9146_v59 }
 0x57f   :  { %v2192_v51 = vmul.f32 %v9584_v25, %v10697_v37  ;;  %v9586_v30 = vpop.eup %9585 }
 0x580   :  { %v2194_v19 = vmul.f32 %v9586_v30, %v10691_v29 }
 0x581   :  { %8468 = vmatmul.mubr.msk.f32.vlgmr.msra.gmra.mrb[48].mxu1 %vm2020_vm3, %v2192_v51 }
 0x582   :  { %8476 = vmatpush3.msra.mxu1 %v3225_v39  ;;  %8477 = vmatprep.mubr.msk.f32.mxu1 %vm9700_vm0, %v9699_v18  ;;  %v9588_v44 = vpop.eup %9587 }
 0x583   :  { %8485 = vmatprep.subr.mxu1 %v9699_v18  ;;  %v2196_v37 = vmul.f32 %v9588_v44, %v10701_v48  ;;  %v3469_v48 = vld [vmem:[%s11979_s6 + $0x10] sm:$0xff] }
 0x584   :  { %v9150_v63 = vpack.c.bf16 %v3470_v34, %v3469_v48 }
 0x585   :  { %8478 = vmatmul.mubr.msk.f32.vlgmr.msra.gmra.mrb[50].mxu1 %vm2020_vm3, %v2194_v19 }
 0x586   :  { %8486 = vmatpush3.msra.mxu1 %v3377_v26  ;;  %8487 = vmatprep.mubr.msk.f32.mxu1 %vm9700_vm0, %v9699_v18 }
 0x587   :  { %9151 = vmatprep.subr.bf16.mxu0 %v9150_v63 }
 0x588   :  { %9153 = vmatpush3.bf16.msra.mxu0 %v9150_v63 }
 0x589   :  { %8488 = vmatmul.mubr.msk.f32.vlgmr.msra.gmra.mrb[52].mxu1 %vm2020_vm3, %v2196_v37  ;;  %9155 = vmatprep.subr.bf16.mxu0 %v9154_v14 }
 0x58c   :  { %9157 = vmatpush3.bf16.msra.mxu0 %v9154_v14 }
 0x58d   :  { %9159 = vmatprep.subr.bf16.mxu0 %v9158_v17 }
 0x590   :  { %9161 = vmatpush3.bf16.msra.mxu0 %v9158_v17 }
 0x591   :  { %9163 = vmatprep.subr.bf16.mxu0 %v9162_v5 }
 0x594   :  { %9165 = vmatpush3.bf16.msra.mxu0 %v9162_v5 }
 0x595   :  { %9167 = vmatprep.subr.bf16.mxu0 %v9166_v10 }
 0x598   :  { %9169 = vmatpush3.bf16.msra.mxu0 %v9166_v10 }
 0x599   :  { %9171 = vmatprep.subr.bf16.mxu0 %v9170_v58 }
 0x59c   :  { %9173 = vmatpush3.bf16.msra.mxu0 %v9170_v58 }
 0x59d   :  { %9175 = vmatprep.subr.bf16.mxu0 %v9174_v32 }
 0x5a0   :  { %9177 = vmatpush3.bf16.msra.mxu0 %v9174_v32 }
 0x5bb   :  { %v10791_v47 = vpop.f32.mrb[30].mxu0 }
 0x5bc   :  { %v8414_v50 = vpop.f32.mrb[31].mxu0 }
 0x5ff   :  { %v2419_v52 = vpop.f32.mrb[32].mxu0 }
 0x600   :  { %v8424_v35 = vpop.f32.mrb[33].mxu0 }
 0x602   :  { %v2343_v55 = vpop.f32.mrb[38].mxu1 }
 0x603   :  { %v8419_v43 = vpop.f32.mrb[39].mxu1 }
 0x607   :  { %v2495_v29 = vpop.f32.mrb[40].mxu1 }
 0x608   :  { %v8429_v24 = vpop.f32.mrb[41].mxu1 }
 0x610   :  { %v10811_v61 = vpop.f32.mrb[34].mxu0 }
 0x611   :  { %v8434_v1 = vpop.f32.mrb[35].mxu0 }
 0x614   :  { %v2738_v11 = vpop.f32.mrb[36].mxu0 }
 0x615   :  { %v9462_v39 = vpack.i.bf16 %v2738_v11, %v2419_v52  ;;  %v8444_v16 = vpop.f32.mrb[37].mxu0 }
 0x617   :  { %9463 = vrot.lane.b32.xlu1 %v9462_v39, %s9701_s19 }
 0x618   :  { %v10826_v2 = vpop.f32.mrb[38].mxu0 }
 0x619   :  { %v8454_v33 = vpop.f32.mrb[39].mxu0 }
 0x63c   :  { %v2662_v22 = vpop.f32.mrb[42].mxu1 }
 0x63d   :  { %v9457_v4 = vpack.i.bf16 %v2662_v22, %v2343_v55  ;;  %v8439_v20 = vpop.f32.mrb[43].mxu1 }
 0x63f   :  { %9458 = vrot.lane.b32.xlu0 %v9457_v4, %s9703_s21 }
 0x640   :  { %v3055_v3 = vpop.f32.mrb[40].mxu0 }
 0x641   :  { %v8464_v28 = vpop.f32.mrb[41].mxu0 }
 0x644   :  { %v2814_v23 = vpop.f32.mrb[44].mxu1 }
 0x645   :  { %v9467_v21 = vpack.i.bf16 %v2814_v23, %v2495_v29  ;;  %v8449_v13 = vpop.f32.mrb[45].mxu1 }
 0x647   :  { %9468 = vrot.lane.b32.xlu0 %v9467_v21, %s9702_s0 }
 0x648   :  { %v3219_v25 = vpop.f32.mrb[42].mxu0 }
 0x649   :  { %v8474_v51 = vpop.f32.mrb[43].mxu0 }
 0x64a   :  { %v3653_v51 = vld [vmem:[%s11981_s8 + $0x10] sm:$0xff] }
 0x64c   :  { %v2979_v30 = vpop.f32.mrb[46].mxu1 }
 0x64d   :  { %v8459_v19 = vpop.f32.mrb[47].mxu1 }
 0x650   :  { %v3372_v44 = vpop.f32.mrb[44].mxu0 }
 0x651   :  { %v9477_v26 = vpack.i.bf16 %v3372_v44, %v3055_v3  ;;  %v8484_v37 = vpop.f32.mrb[45].mxu0 }
 0x653   :  { %9478 = vrot.lane.b32.xlu0 %v9477_v26, %s9701_s19 }
 0x654   :  { %v3131_v50 = vpop.f32.mrb[48].mxu1 }
 0x655   :  { %v8469_v52 = vpop.f32.mrb[49].mxu1 }
 0x656   :  { %v3656_v52 = vld [vmem:[%s11981_s8 + $0x28] sm:$0xff] }
 0x658   :  { %v3296_v35 = vpop.f32.mrb[50].mxu1 }
 0x659   :  { %v9472_v55 = vpack.i.bf16 %v3296_v35, %v2979_v30  ;;  %v8479_v43 = vpop.f32.mrb[51].mxu1  ;;  %v3654_v30 = vld [vmem:[%s11981_s8 + $0x18] sm:$0xff] }
 0x65a   :  { %v9182_v19 = vpack.c.bf16 %v3654_v30, %v3653_v51 }
 0x65b   :  { %9473 = vrot.lane.b32.xlu1 %v9472_v55, %s9703_s21 }
 0x65c   :  { %v3448_v29 = vpop.f32.mrb[52].mxu1 }
 0x65d   :  { %v9482_v24 = vpack.i.bf16 %v3448_v29, %v3131_v50  ;;  %v8489_v56 = vpop.f32.mrb[53].mxu1  ;;  %v3655_v50 = vld [vmem:[%s11981_s8 + $0x20] sm:$0xff] }
 0x65e   :  { %v9186_v55 = vpack.c.bf16 %v3656_v52, %v3655_v50 }
 0x65f   :  { %9483 = vrot.lane.b32.xlu1 %v9482_v24, %s9702_s0  ;;  %v3658_v24 = vld [vmem:[%s11981_s8 + $0x38] sm:$0xff] }
 0x689   :  { %v9464_v34 = vpop.permute.xlu1 %9463 }
 0x68a   :  { %v9466_v8 = vunpack.i.h.bf16 %v9464_v34  ;;  %v9465_v14 = vunpack.i.l.bf16 %v9464_v34 }
 0x6b1   :  { %v9459_v53 = vpop.permute.xlu0 %9458 }
 0x6b2   :  { %v9461_v48 = vunpack.i.h.bf16 %v9459_v53  ;;  %v9460_v59 = vunpack.i.l.bf16 %v9459_v53 }
 0x6b4   :  { %v2511_v63 = vsel %vm747_vm1, %v10791_v47, %v9460_v59  ;;  %v2830_v0 = vsel %vm747_vm1, %v10811_v61, %v9461_v48  ;;  %v3659_v48 = vld [vmem:[%s11981_s8 + $0x40] sm:$0xff]  ;;  %v3660_v59 = vld [vmem:[%s11981_s8 + $0x48] sm:$0xff] }
 0x6b5   :  { %v2513_v11 = vsel %vm2512_vm4, %v2511_v63, %v9465_v14  ;;  %v2831_v17 = vsel %vm2512_vm4, %v2830_v0, %v9466_v8  ;;  %v9194_v34 = vpack.c.bf16 %v3660_v59, %v3659_v48  ;;  %v3661_v63 = vld [vmem:[%s11981_s8 + $0x50] sm:$0xff]  ;;  %v3662_v0 = vld [vmem:[%s11981_s8 + $0x58] sm:$0xff]  ;;  %v3663_v14 = vld [vmem:[%s11981_s8 + $0x60] sm:$0xff] }
 0x6b6   :  { %v9198_v8 = vpack.c.bf16 %v3662_v0, %v3661_v63 }
 0x6b9   :  { %v9469_v1 = vpop.permute.xlu0 %9468 }
 0x6ba   :  { %v9471_v60 = vunpack.i.h.bf16 %v9469_v1  ;;  %v9470_v38 = vunpack.i.l.bf16 %v9469_v1  ;;  %v3664_v1 = vld [vmem:[%s11981_s8 + $0x68] sm:$0xff] }
 0x6bc   :  { %v2515_v39 = vsel %vm2514_vm5, %v2513_v11, %v9470_v38  ;;  %v2832_v16 = vsel %vm2514_vm5, %v2831_v17, %v9471_v60  ;;  %v9202_v60 = vpack.c.bf16 %v3664_v1, %v3663_v14  ;;  %v3665_v38 = vld [vmem:[%s11981_s8 + $0x70] sm:$0xff]  ;;  %v3666_v11 = vld [vmem:[%s11981_s8 + $0x78] sm:$0xff] }
 0x6bd   :  { %8522 = vmatprep.mubr.f32.mxu0 %v2515_v39  ;;  %v9206_v17 = vpack.c.bf16 %v3666_v11, %v3665_v38  ;;  %v3795_v11 = vld [vmem:[%s11982_s10] sm:$0xff] }
 0x6be   :  { %8523 = vmatmul.mubr.f32.vlgmr.msra.gmra.mrb[46].mxu0 %v2832_v16 }
 0x6c5   :  { %v9479_v6 = vpop.permute.xlu0 %9478 }
 0x6c6   :  { %v9481_v57 = vunpack.i.h.bf16 %v9479_v6  ;;  %v9480_v7 = vunpack.i.l.bf16 %v9479_v6 }
 0x6cd   :  { %v9474_v47 = vpop.permute.xlu1 %9473 }
 0x6ce   :  { %v9476_v45 = vunpack.i.h.bf16 %v9474_v47  ;;  %v9475_v61 = vunpack.i.l.bf16 %v9474_v47 }
 0x6d0   :  { %v3147_v5 = vsel %vm747_vm1, %v10826_v2, %v9475_v61  ;;  %v3464_v33 = vsel %vm747_vm1, %v3219_v25, %v9476_v45  ;;  %v7679_v2 = vld [vmem:[%s11980_s7] ss:$0 sm:$0xff] }
 0x6d1   :  { %v9484_v10 = vpop.permute.xlu1 %9483  ;;  %v3148_v58 = vsel %vm2512_vm4, %v3147_v5, %v9480_v7  ;;  %v3465_v40 = vsel %vm2512_vm4, %v3464_v33, %v9481_v57 }
 0x6d2   :  { %v9486_v9 = vunpack.i.h.bf16 %v9484_v10  ;;  %v9485_v15 = vunpack.i.l.bf16 %v9484_v10 }
 0x6d4   :  { %v3149_v12 = vsel %vm2514_vm5, %v3148_v58, %v9485_v15  ;;  %v3466_v32 = vsel %vm2514_vm5, %v3465_v40, %v9486_v9  ;;  %v3645_v40 = vsub.s32 3, %v10293_v42 }
 0x6d5   :  { %8525 = vmatprep.mubr.f32.mxu0 %v3149_v12 }
 0x6d6   :  { %8526 = vmatmul.mubr.f32.gmra.mrb[48].mxu0 %v3466_v32  ;;  %v9697_v32 = vld [vmem:[%s11977_s3] sm:$0xf] }
 0x791   :  { %v8524_v22 = vpop.f32.mrb[46].mxu0 }
 0x792   :  { %v3569_v4 = vadd.f32 %v8524_v22, %v10195_v31  ;;  %v3549_v20 = vpop.f32.mrb[47].mxu0  ;;  %v3652_v31 = vld [vmem:[%s11981_s8 + $0x8] sm:$0xff]  ;;  %v3638_v22 = vrot.slane %v9697_v32, %v10395_v62 }
 0x793   :  { %v3568_v3 = vadd.f32 %v3549_v20, %v10192_v27  ;;  %v3651_v27 = vld [vmem:[%s11981_s8] sm:$0xff]  ;;  %v3646_v20 = vrot.slane %v9697_v32, %v3645_v40 }
 0x794   :  { %v10871_v28 = vadd.f32 %v7679_v2, %v3569_v4  ;;  %v9178_v25 = vpack.c.bf16 %v3652_v31, %v3651_v27 }
 0x795   :  { %v10873_v23 = vadd.f32 %v7679_v2, %v3568_v3 }
 0x796   :  { %3585 = vadd.xlane.f32.xlu1 %v10871_v28  ;;  %v3592_v13 = vmul.f32 %v10871_v28, %v10871_v28  ;;  %9179 = vmatprep.subr.bf16.mxu1 %v9178_v25 }
 0x797   :  { %3583 = vadd.xlane.f32.xlu0 %v10873_v23  ;;  %v3591_v21 = vmul.f32 %v10873_v23, %v10873_v23  ;;  %9181 = vmatpush3.bf16.msra.mxu1 %v9178_v25 }
 0x798   :  { %9183 = vmatprep.subr.bf16.mxu1 %v9182_v19 }
 0x79b   :  { %3595 = vadd.xlane.f32.xlu0 %v3591_v21  ;;  %9185 = vmatpush3.bf16.msra.mxu1 %v9182_v19 }
 0x79c   :  { %9187 = vmatprep.subr.bf16.mxu1 %v9186_v55 }
 0x79f   :  { %3597 = vadd.xlane.f32.xlu0 %v3592_v13  ;;  %9189 = vmatpush3.bf16.msra.mxu1 %v9186_v55 }
 0x7a9   :  { %v8527_v44 = vpop.f32.mrb[48].mxu0 }
 0x7aa   :  { %v3571_v26 = vadd.f32 %v8527_v44, %v10205_v41  ;;  %v3559_v37 = vpop.f32.mrb[49].mxu0  ;;  %v3657_v41 = vld [vmem:[%s11981_s8 + $0x30] sm:$0xff] }
 0x7ab   :  { %v3570_v35 = vadd.f32 %v3559_v37, %v10200_v36  ;;  %v9190_v36 = vpack.c.bf16 %v3658_v24, %v3657_v41 }
 0x7ac   :  { %v10901_v43 = vadd.f32 %v7679_v2, %v3571_v26 }
 0x7ad   :  { %v10903_v29 = vadd.f32 %v7679_v2, %v3570_v35  ;;  %9191 = vmatprep.subr.bf16.mxu1 %v9190_v36 }
 0x7ae   :  { %3589 = vadd.xlane.f32.xlu1 %v10901_v43  ;;  %v3594_v56 = vmul.f32 %v10901_v43, %v10901_v43  ;;  %9193 = vmatpush3.bf16.msra.mxu1 %v9190_v36 }
 0x7af   :  { %3587 = vadd.xlane.f32.xlu0 %v10903_v29  ;;  %v3593_v53 = vmul.f32 %v10903_v29, %v10903_v29  ;;  %9195 = vmatprep.subr.bf16.mxu1 %v9194_v34 }
 0x7b2   :  { %3601 = vadd.xlane.f32.xlu1 %v3594_v56  ;;  %9197 = vmatpush3.bf16.msra.mxu1 %v9194_v34 }
 0x7b3   :  { %3599 = vadd.xlane.f32.xlu0 %v3593_v53  ;;  %9199 = vmatprep.subr.bf16.mxu1 %v9198_v8 }
 0x7b6   :  { %9201 = vmatpush3.bf16.msra.mxu1 %v9198_v8 }
 0x7b7   :  { %9203 = vmatprep.subr.bf16.mxu1 %v9202_v60 }
 0x7ba   :  { %9205 = vmatpush3.bf16.msra.mxu1 %v9202_v60 }
 0x7bb   :  { %9207 = vmatprep.subr.bf16.mxu1 %v9206_v17 }
 0x7be   :  { %9209 = vmatpush3.bf16.msra.mxu1 %v9206_v17  ;;  %v3796_v17 = vld [vmem:[%s11982_s10 + $0x8] sm:$0xff] }
 0x823   :  { %v3586_v47 = vpop.xlane.xlu1 %3585 }
 0x824   :  { %v3584_v39 = vpop.xlane.xlu0 %3583  ;;  %v3604_v45 = vmul.f32 0.015625, %v3586_v47  ;;  %v3798_v47 = vld [vmem:[%s11982_s10 + $0x18] sm:$0xff] }
 0x825   :  { %v3603_v16 = vmul.f32 0.015625, %v3584_v39  ;;  %v9210_v39 = vpack.c.bf16 %v3796_v17, %v3795_v11 }
 0x826   :  { %v3612_v7 = vmul.f32 %v3604_v45, %v3604_v45  ;;  %v3620_v21 = vsub.f32 %v10871_v28, %v3604_v45  ;;  %v3799_v45 = vld [vmem:[%s11982_s10 + $0x20] sm:$0xff] }
 0x827   :  { %v3611_v61 = vmul.f32 %v3603_v16, %v3603_v16  ;;  %v3619_v12 = vsub.f32 %v10873_v23, %v3603_v16  ;;  %9211 = vmatprep.subr.bf16.mxu0 %v9210_v39  ;;  %v3797_v16 = vld [vmem:[%s11982_s10 + $0x10] sm:$0xff] }
 0x828   :  { %v3596_v6 = vpop.xlane.xlu0 %3595  ;;  %9213 = vmatpush3.bf16.msra.mxu0 %v9210_v39 }
 0x829   :  { %v3607_v5 = vmul.f32 0.015625, %v3596_v6  ;;  %v9214_v6 = vpack.c.bf16 %v3798_v47, %v3797_v16 }
 0x82b   :  { %v3615_v33 = vsub.f32 %v3607_v5, %v3611_v61  ;;  %9215 = vmatprep.subr.bf16.mxu0 %v9214_v6  ;;  %v3800_v61 = vld [vmem:[%s11982_s10 + $0x28] sm:$0xff] }
 0x82c   :  { %v3598_v57 = vpop.xlane.xlu0 %3597  ;;  %9217 = vmatpush3.bf16.msra.mxu0 %v9214_v6  ;;  %v9218_v5 = vpack.c.bf16 %v3800_v61, %v3799_v45 }
 0x82d   :  { %v3623_v10 = vadd.f32 1e-06, %v3615_v33  ;;  %v3608_v9 = vmul.f32 0.015625, %v3598_v57  ;;  %v3801_v33 = vld [vmem:[%s11982_s10 + $0x30] sm:$0xff]  ;;  %v3802_v57 = vld [vmem:[%s11982_s10 + $0x38] sm:$0xff] }
 0x82e   :  { %9219 = vmatprep.subr.bf16.mxu0 %v9218_v5 }
 0x82f   :  { %9589 = vrsqrt.f32 %v3623_v10  ;;  %v3616_v15 = vsub.f32 %v3608_v9, %v3612_v7  ;;  %v9222_v7 = vpack.c.bf16 %v3802_v57, %v3801_v33  ;;  %v3803_v10 = vld [vmem:[%s11982_s10 + $0x40] sm:$0xff]  ;;  %v3804_v9 = vld [vmem:[%s11982_s10 + $0x48] sm:$0xff] }
 0x830   :  { %9221 = vmatpush3.bf16.msra.mxu0 %v9218_v5 }
 0x831   :  { %v3624_v58 = vadd.f32 1e-06, %v3616_v15  ;;  %9223 = vmatprep.subr.bf16.mxu0 %v9222_v7  ;;  %v9226_v15 = vpack.c.bf16 %v3804_v9, %v3803_v10 }
 0x833   :  { %9591 = vrsqrt.f32 %v3624_v58  ;;  %v3805_v58 = vld [vmem:[%s11982_s10 + $0x50] sm:$0xff] }
 0x834   :  { %9225 = vmatpush3.bf16.msra.mxu0 %v9222_v7 }
 0x835   :  { %9227 = vmatprep.subr.bf16.mxu0 %v9226_v15 }
 0x838   :  { %9229 = vmatpush3.bf16.msra.mxu0 %v9226_v15 }
 0x839   :  { %v9590_v2 = vpop.eup %9589 }
 0x83a   :  { %v3631_v4 = vmul.f32 %v9590_v2, %v3619_v12  ;;  %v3806_v12 = vld [vmem:[%s11982_s10 + $0x58] sm:$0xff]  ;;  %v3808_v2 = vld [vmem:[%s11982_s10 + $0x68] sm:$0xff] }
 0x83b   :  { %v3590_v3 = vpop.xlane.xlu1 %3589  ;;  %v9230_v32 = vpack.c.bf16 %v3806_v12, %v3805_v58  ;;  %v7684_v12 = vld [vmem:[%s11975_s4 + $0x188] sm:$0xff] }
 0x83c   :  { %v3606_v13 = vmul.f32 0.015625, %v3590_v3  ;;  %v3588_v27 = vpop.xlane.xlu0 %3587  ;;  %v3639_v31 = vmul.f32 %v3638_v22, %v3631_v4  ;;  %v3810_v3 = vld [vmem:[%s11982_s10 + $0x78] sm:$0xff] }
 0x83d   :  { %v9592_v25 = vpop.eup %9591  ;;  %v3605_v51 = vmul.f32 0.015625, %v3588_v27  ;;  %9231 = vmatprep.subr.bf16.mxu0 %v9230_v32 }
 0x83e   :  { %v3647_v30 = vadd.f32 %v3646_v20, %v3639_v31  ;;  %v3632_v19 = vmul.f32 %v9592_v25, %v3620_v21  ;;  %v3614_v26 = vmul.f32 %v3606_v13, %v3606_v13  ;;  %v3622_v48 = vsub.f32 %v10901_v43, %v3606_v13  ;;  %9233 = vmatpush3.bf16.msra.mxu0 %v9230_v32  ;;  %v7680_v13 = vld [vmem:[%s11983_s9] ss:$0 sm:$0xff] }
 0x83f   :  { %v3602_v44 = vpop.xlane.xlu1 %3601  ;;  %v3613_v35 = vmul.f32 %v3605_v51, %v3605_v51  ;;  %v3621_v34 = vsub.f32 %v10903_v29, %v3605_v51  ;;  %v7687_v32 = vld [vmem:[%s11975_s4 + $0x1a0] sm:$0xff] }
 0x840   :  { %v3610_v37 = vmul.f32 0.015625, %v3602_v44  ;;  %8560 = vmatprep.mubr.f32.mxu1 %v3647_v30  ;;  %v3600_v50 = vpop.xlane.xlu0 %3599  ;;  %v3640_v52 = vmul.f32 %v3638_v22, %v3632_v19 }
 0x841   :  { %v3609_v55 = vmul.f32 0.015625, %v3600_v50 }
 0x842   :  { %v3618_v41 = vsub.f32 %v3610_v37, %v3614_v26  ;;  %v3648_v24 = vadd.f32 %v3646_v20, %v3640_v52 }
 0x843   :  { %v3617_v36 = vsub.f32 %v3609_v55, %v3613_v35 }
 0x844   :  { %v3626_v56 = vadd.f32 1e-06, %v3618_v41  ;;  %8561 = vmatmul.mubr.f32.vlgmr.msra.gmra.mrb[54].mxu1 %v3648_v24 }
 0x845   :  { %v3625_v53 = vadd.f32 1e-06, %v3617_v36 }
 0x846   :  { %9593 = vrsqrt.f32 %v3626_v56 }
 0x847   :  { %9595 = vrsqrt.f32 %v3625_v53 }
 0x850   :  { %v9594_v59 = vpop.eup %9593 }
 0x851   :  { %v9596_v63 = vpop.eup %9595  ;;  %v3634_v0 = vmul.f32 %v9594_v59, %v3622_v48 }
 0x852   :  { %v3633_v8 = vmul.f32 %v9596_v63, %v3621_v34 }
 0x853   :  { %v3642_v14 = vmul.f32 %v3638_v22, %v3634_v0 }
 0x854   :  { %v3641_v1 = vmul.f32 %v3638_v22, %v3633_v8  ;;  %v3807_v22 = vld [vmem:[%s11982_s10 + $0x60] sm:$0xff] }
 0x855   :  { %v3650_v38 = vadd.f32 %v3646_v20, %v3642_v14  ;;  %v9234_v4 = vpack.c.bf16 %v3808_v2, %v3807_v22  ;;  %v7683_v22 = vld [vmem:[%s11975_s4 + $0x180] sm:$0xff]  ;;  %v9242_v2 = vpack.c.bf16 %v7687_v32, %v7684_v12 }
 0x856   :  { %v3649_v60 = vadd.f32 %v3646_v20, %v3641_v1  ;;  %v3809_v20 = vld [vmem:[%s11982_s10 + $0x70] sm:$0xff] }
 0x857   :  { %9235 = vmatprep.subr.bf16.mxu0 %v9234_v4  ;;  %v9238_v21 = vpack.c.bf16 %v3810_v3, %v3809_v20  ;;  %v7690_v20 = vld [vmem:[%s11975_s4 + $0x1b8] sm:$0xff]  ;;  %v7693_v3 = vld [vmem:[%s11975_s4 + $0x1d0] sm:$0xff]  ;;  %9243 = vmatprep.subr.bf16.mxu1 %v9242_v2 }
 0x858   :  { %8563 = vmatprep.mubr.f32.mxu1 %v3649_v60  ;;  %9237 = vmatpush3.bf16.msra.mxu0 %v9234_v4  ;;  %v7686_v4 = vld [vmem:[%s11975_s4 + $0x198] sm:$0xff]  ;;  %v7717_v2 = vld [vmem:[%s11975_s4 + $0x290] sm:$0xff] }
 0x859   :  { %8564 = vmatmul.mubr.f32.gmra.mrb[56].mxu1 %v3650_v38  ;;  %9239 = vmatprep.subr.bf16.mxu0 %v9238_v21 }
 0x85a   :  { %4112 = vmatprep.mubr.f32.mxu1 %v9699_v18 }
 0x85c   :  { %9241 = vmatpush3.bf16.msra.mxu0 %v9238_v21  ;;  %v9244_v21 = vpack.c.bf16 %v7686_v4, %v7683_v22  ;;  %v7714_v22 = vld [vmem:[%s11975_s4 + $0x278] sm:$0xff]  ;;  %v7709_v4 = vld [vmem:[%s11975_s4 + $0x250] sm:$0xff] }
 0x85e   :  { %9245 = vmatpush1.bf16.msra.mxu1 %v9244_v21  ;;  %v7713_v21 = vld [vmem:[%s11975_s4 + $0x270] sm:$0xff] }
 0x917   :  { %v8562_v27 = vpop.f32.mrb[54].mxu1 }
 0x918   :  { %v3746_v31 = vadd.f32 %v8562_v27, %v7680_v13  ;;  %v3740_v25 = vpop.f32.mrb[55].mxu1  ;;  %v7685_v27 = vld [vmem:[%s11975_s4 + $0x190] sm:$0xff] }
 0x919   :  { %v3741_v51 = vadd.f32 %v7680_v13, %v3740_v25  ;;  %v7689_v25 = vld [vmem:[%s11975_s4 + $0x1b0] sm:$0xff] }
 0x91a   :  { %v3760_v30 = vmul.f32 %v3746_v31, %v3746_v31 }
 0x91b   :  { %v3759_v19 = vmul.f32 %v3741_v51, %v3741_v51 }
 0x91c   :  { %v3764_v44 = vmul.f32 %v3760_v30, %v3746_v31  ;;  %v7692_v30 = vld [vmem:[%s11975_s4 + $0x1c8] sm:$0xff] }
 0x91d   :  { %v3763_v26 = vmul.f32 %v3759_v19, %v3741_v51  ;;  %v9248_v19 = vpack.c.bf16 %v7692_v30, %v7689_v25  ;;  %v7720_v25 = vld [vmem:[%s11975_s4 + $0x2a8] sm:$0xff]  ;;  %v7715_v30 = vld [vmem:[%s11975_s4 + $0x280] sm:$0xff] }
 0x91e   :  { %v3768_v37 = vmul.f32 0.044715, %v3764_v44 }
 0x91f   :  { %v3767_v50 = vmul.f32 0.044715, %v3763_v26  ;;  %v7681_v26 = vld [vmem:[%s11984_s11] ss:$0 sm:$0xff] }
 0x920   :  { %v3772_v52 = vadd.f32 %v3768_v37, %v3746_v31 }
 0x921   :  { %v3771_v35 = vadd.f32 %v3767_v50, %v3741_v51 }
 0x922   :  { %v3776_v55 = vmul.f32 0.7978846, %v3772_v52 }
 0x923   :  { %v3775_v41 = vmul.f32 0.7978846, %v3771_v35 }
 0x924   :  { %9597 = vtanh.f32 %v3776_v55 }
 0x925   :  { %9599 = vtanh.f32 %v3775_v41 }
 0x92c   :  { %v8565_v24 = vpop.f32.mrb[56].mxu1 }
 0x92d   :  { %v3756_v36 = vadd.f32 %v8565_v24, %v7680_v13  ;;  %v3750_v56 = vpop.f32.mrb[57].mxu1 }
 0x92e   :  { %v9598_v53 = vpop.eup %9597  ;;  %v3751_v48 = vadd.f32 %v7680_v13, %v3750_v56  ;;  %v9246_v13 = vpack.c.bf16 %v7693_v3, %v7690_v20  ;;  %v9262_v20 = vpack.c.bf16 %v7717_v2, %v7714_v22  ;;  %v7712_v3 = vld [vmem:[%s11975_s4 + $0x268] sm:$0xff] }
 0x92f   :  { %v9600_v59 = vpop.eup %9599  ;;  %v3784_v34 = vadd.f32 1.0, %v9598_v53  ;;  %v3762_v63 = vmul.f32 %v3756_v36, %v3756_v36  ;;  %v7694_v53 = vld [vmem:[%s11975_s4 + $0x1d8] sm:$0xff] }
 0x930   :  { %v3761_v0 = vmul.f32 %v3751_v48, %v3751_v48  ;;  %v3783_v8 = vadd.f32 1.0, %v9600_v59  ;;  %9247 = vmatprep.subr.bf16.mxu1 %v9246_v13  ;;  %v7698_v59 = vld [vmem:[%s11975_s4 + $0x1f8] sm:$0xff]  ;;  %v7716_v13 = vld [vmem:[%s11975_s4 + $0x288] sm:$0xff] }
 0x931   :  { %v3788_v14 = vmul.f32 0.5, %v3784_v34  ;;  %v3766_v1 = vmul.f32 %v3762_v63, %v3756_v36  ;;  %9249 = vmatpush1.bf16.msra.mxu1 %v9248_v19 }
 0x932   :  { %v3765_v60 = vmul.f32 %v3761_v0, %v3751_v48  ;;  %v3787_v38 = vmul.f32 0.5, %v3783_v8 }
 0x933   :  { %v3770_v11 = vmul.f32 0.044715, %v3766_v1  ;;  %v3792_v16 = vmul.f32 %v3788_v14, %v3746_v31  ;;  %v7688_v31 = vld [vmem:[%s11975_s4 + $0x1a8] sm:$0xff] }
 0x934   :  { %v3769_v17 = vmul.f32 0.044715, %v3765_v60  ;;  %v3791_v39 = vmul.f32 %v3787_v38, %v3741_v51  ;;  %v9274_v51 = vpack.c.bf16 %v7688_v31, %v7685_v27  ;;  %v7702_v60 = vld [vmem:[%s11975_s4 + $0x218] sm:$0xff]  ;;  %v7705_v38 = vld [vmem:[%s11975_s4 + $0x230] sm:$0xff]  ;;  %v9290_v27 = vpack.c.bf16 %v7712_v3, %v7709_v4 }
 0x935   :  { %v3774_v47 = vadd.f32 %v3770_v11, %v3756_v36  ;;  %v7697_v11 = vld [vmem:[%s11975_s4 + $0x1f0] sm:$0xff]  ;;  %v9264_v31 = vpack.c.bf16 %v7716_v13, %v7713_v21 }
 0x936   :  { %v3773_v6 = vadd.f32 %v3769_v17, %v3751_v48  ;;  %8598 = vmatprep.mubr.f32.mxu0 %v3791_v39  ;;  %9275 = vmatprep.subr.bf16.mxu0 %v9274_v51  ;;  %v9254_v17 = vpack.c.bf16 %v7705_v38, %v7702_v60  ;;  %v7704_v39 = vld [vmem:[%s11975_s4 + $0x228] sm:$0xff] }
 0x937   :  { %v3778_v45 = vmul.f32 0.7978846, %v3774_v47  ;;  %8599 = vmatmul.mubr.f32.vlgmr.msra.gmra.mrb[50].mxu0 %v3792_v16 }
 0x938   :  { %v3777_v61 = vmul.f32 0.7978846, %v3773_v6  ;;  %9277 = vmatpush3.bf16.msra.mxu0 %v9274_v51  ;;  %v7723_v51 = vld [vmem:[%s11975_s4 + $0x2c0] sm:$0xff] }
 0x939   :  { %9601 = vtanh.f32 %v3778_v45  ;;  %v9266_v19 = vpack.c.bf16 %v7723_v51, %v7720_v25 }
 0x93a   :  { %9603 = vtanh.f32 %v3777_v61 }
 0x943   :  { %v9602_v5 = vpop.eup %9601 }
 0x944   :  { %v9604_v33 = vpop.eup %9603  ;;  %v3786_v57 = vadd.f32 1.0, %v9602_v5  ;;  %v7708_v5 = vld [vmem:[%s11975_s4 + $0x248] sm:$0xff] }
 0x945   :  { %v3785_v7 = vadd.f32 1.0, %v9604_v33  ;;  %v7711_v33 = vld [vmem:[%s11975_s4 + $0x260] sm:$0xff] }
 0x946   :  { %v3790_v10 = vmul.f32 0.5, %v3786_v57  ;;  %v7703_v57 = vld [vmem:[%s11975_s4 + $0x220] sm:$0xff] }
 0x947   :  { %v3789_v9 = vmul.f32 0.5, %v3785_v7  ;;  %v9258_v7 = vpack.c.bf16 %v7711_v33, %v7708_v5  ;;  %v7682_v33 = vld [vmem:[%s11977_s3 + $0x4] sm:$0xf] }
 0x948   :  { %v3794_v58 = vmul.f32 %v3790_v10, %v3756_v36  ;;  %v7691_v36 = vld [vmem:[%s11975_s4 + $0x1c0] sm:$0xff]  ;;  %v7706_v10 = vld [vmem:[%s11975_s4 + $0x238] sm:$0xff] }
 0x949   :  { %v3793_v15 = vmul.f32 %v3789_v9, %v3751_v48  ;;  %v7695_v48 = vld [vmem:[%s11975_s4 + $0x1e0] sm:$0xff]  ;;  %v9278_v63 = vpack.c.bf16 %v7694_v53, %v7691_v36  ;;  %v7724_v36 = vld [vmem:[%s11975_s4 + $0x2c8] sm:$0xff] }
 0x94a   :  { %v9252_v0 = vpack.c.bf16 %v7698_v59, %v7695_v48  ;;  %v7707_v9 = vld [vmem:[%s11975_s4 + $0x240] sm:$0xff]  ;;  %v7728_v53 = vld [vmem:[%s11975_s4 + $0x2e8] sm:$0xff] }
 0x94b   :  { %8601 = vmatprep.mubr.f32.mxu0 %v3793_v15  ;;  %9279 = vmatprep.subr.bf16.mxu0 %v9278_v63  ;;  %v7710_v15 = vld [vmem:[%s11975_s4 + $0x258] sm:$0xff] }
 0x94c   :  { %8602 = vmatmul.mubr.f32.gmra.mrb[52].mxu0 %v3794_v58  ;;  %v9286_v58 = vpack.c.bf16 %v7706_v10, %v7703_v57  ;;  %v9260_v12 = vpack.c.bf16 %v7710_v15, %v7707_v9  ;;  %v3976_v15 = vrot.slane %v7682_v33, %v10302_v54 }
 0x94d   :  { %9281 = vmatpush3.bf16.msra.mxu0 %v9278_v63  ;;  %v7730_v63 = vld [vmem:[%s11975_s4 + $0x2f8] sm:$0xff] }
 0xa0a   :  { %v8600_v44 = vpop.f32.mrb[50].mxu0 }
 0xa0b   :  { %v3877_v37 = vpop.f32.mrb[51].mxu0  ;;  %v3897_v50 = vadd.f32 %v8600_v44, %v10871_v28  ;;  %v7696_v28 = vld [vmem:[%s11975_s4 + $0x1e8] sm:$0xff]  ;;  %v7718_v44 = vld [vmem:[%s11975_s4 + $0x298] sm:$0xff] }
 0xa0c   :  { %v3896_v52 = vadd.f32 %v3877_v37, %v10873_v23  ;;  %v7699_v23 = vld [vmem:[%s11975_s4 + $0x200] sm:$0xff]  ;;  %v7722_v37 = vld [vmem:[%s11975_s4 + $0x2b8] sm:$0xff] }
 0xa0d   :  { %v11041_v55 = vadd.f32 %v7681_v26, %v3897_v50  ;;  %v9250_v56 = vpack.c.bf16 %v7699_v23, %v7696_v28  ;;  %v9294_v50 = vpack.c.bf16 %v7718_v44, %v7715_v30  ;;  %v7721_v28 = vld [vmem:[%s11975_s4 + $0x2b0] sm:$0xff] }
 0xa0e   :  { %v11039_v35 = vadd.f32 %v7681_v26, %v3896_v52  ;;  %v9298_v48 = vpack.c.bf16 %v7724_v36, %v7721_v28 }
 0xa0f   :  { %v3922_v24 = vmul.f32 %v11041_v55, %v11041_v55  ;;  %9251 = vmatprep.subr.bf16.mxu1 %v9250_v56  ;;  %v7725_v56 = vld [vmem:[%s11975_s4 + $0x2d0] sm:$0xff] }
 0xa10   :  { %3913 = vadd.xlane.f32.xlu0 %v11039_v35  ;;  %v3921_v41 = vmul.f32 %v11039_v35, %v11039_v35  ;;  %9253 = vmatpush1.bf16.msra.mxu1 %v9252_v0  ;;  %v9272_v59 = vpack.c.bf16 %v7728_v53, %v7725_v56 }
 0xa11   :  { %9255 = vmatprep.subr.bf16.mxu1 %v9254_v17 }
 0xa12   :  { %3925 = vadd.xlane.f32.xlu1 %v3921_v41  ;;  %v7726_v41 = vld [vmem:[%s11975_s4 + $0x2d8] sm:$0xff] }
 0xa14   :  { %3915 = vadd.xlane.f32.xlu0 %v11041_v55 }
 0xa16   :  { %3927 = vadd.xlane.f32.xlu1 %v3922_v24  ;;  %v7729_v24 = vld [vmem:[%s11975_s4 + $0x2f0] sm:$0xff] }
 0xa17   :  { %v9270_v23 = vpack.c.bf16 %v7729_v24, %v7726_v41 }
 0xa1f   :  { %v8603_v34 = vpop.f32.mrb[52].mxu0 }
 0xa20   :  { %v3887_v8 = vpop.f32.mrb[53].mxu0  ;;  %v3899_v14 = vadd.f32 %v8603_v34, %v10901_v43  ;;  %v7700_v43 = vld [vmem:[%s11975_s4 + $0x208] sm:$0xff]  ;;  %v7727_v34 = vld [vmem:[%s11975_s4 + $0x2e0] sm:$0xff] }
 0xa21   :  { %v3898_v1 = vadd.f32 %v3887_v8, %v10903_v29  ;;  %v7701_v29 = vld [vmem:[%s11975_s4 + $0x210] sm:$0xff]  ;;  %v9282_v47 = vpack.c.bf16 %v7700_v43, %v7697_v11  ;;  %v9302_v0 = vpack.c.bf16 %v7730_v63, %v7727_v34  ;;  %v7731_v63 = vld [vmem:[%s11978_s5 + $0x3] sm:$0x7] }
 0xa22   :  { %v9256_v6 = vpack.c.bf16 %v7704_v39, %v7701_v29  ;;  %v11089_v45 = vadd.f32 %v7681_v26, %v3899_v14 }
 0xa23   :  { %v11087_v16 = vadd.f32 %v7681_v26, %v3898_v1  ;;  %9283 = vmatprep.subr.bf16.mxu0 %v9282_v47  ;;  %v7719_v26 = vld [vmem:[%s11975_s4 + $0x2a0] sm:$0xff] }
 0xa24   :  { %9257 = vmatpush1.bf16.msra.mxu1 %v9256_v6  ;;  %9285 = vmatpush3.bf16.msra.mxu0 %v9282_v47  ;;  %v3924_v32 = vmul.f32 %v11089_v45, %v11089_v45  ;;  %v9268_v52 = vpack.c.bf16 %v7722_v37, %v7719_v26 }
 0xa25   :  { %3917 = vadd.xlane.f32.xlu0 %v11087_v16  ;;  %v3923_v61 = vmul.f32 %v11087_v16, %v11087_v16  ;;  %9259 = vmatprep.subr.bf16.mxu1 %v9258_v7  ;;  %v3968_v7 = vrot.slane %v7682_v33, %v10296_v49 }
 0xa26   :  { %9287 = vmatprep.subr.bf16.mxu0 %v9286_v58 }
 0xa27   :  { %3929 = vadd.xlane.f32.xlu1 %v3923_v61 }
 0xa28   :  { %9261 = vmatpush1.bf16.msra.mxu1 %v9260_v12  ;;  %9289 = vmatpush3.bf16.msra.mxu0 %v9286_v58 }
 0xa29   :  { %3919 = vadd.xlane.f32.xlu0 %v11089_v45  ;;  %9263 = vmatprep.subr.bf16.mxu1 %v9262_v20 }
 0xa2a   :  { %9291 = vmatprep.subr.bf16.mxu0 %v9290_v27 }
 0xa2b   :  { %3931 = vadd.xlane.f32.xlu1 %v3924_v32 }
 0xa2c   :  { %9265 = vmatpush1.bf16.msra.mxu1 %v9264_v31  ;;  %9293 = vmatpush3.bf16.msra.mxu0 %v9290_v27 }
 0xa2d   :  { %9267 = vmatprep.subr.bf16.mxu1 %v9266_v19  ;;  %9295 = vmatprep.subr.bf16.mxu0 %v9294_v50 }
 0xa30   :  { %9269 = vmatpush1.bf16.msra.mxu1 %v9268_v52  ;;  %9297 = vmatpush3.bf16.msra.mxu0 %v9294_v50 }
 0xa31   :  { %9271 = vmatprep.subr.bf16.mxu1 %v9270_v23  ;;  %9299 = vmatprep.subr.bf16.mxu0 %v9298_v48 }
 0xa34   :  { %9273 = vmatpush1.bf16.msra.mxu1 %v9272_v59  ;;  %9301 = vmatpush3.bf16.msra.mxu0 %v9298_v48 }
 0xa35   :  { %8642 = vmatprep.subr.mxu1 %v9699_v18  ;;  %9303 = vmatprep.subr.bf16.mxu0 %v9302_v0 }
 0xa38   :  { %9305 = vmatpush3.bf16.msra.mxu0 %v9302_v0  ;;  %v4036_v0 = vrot.slane %v7731_v63, %v10296_v49 }
 0xa39   :  { %8672 = vmatprep.subr.mxu0 %v9699_v18 }
 0xa9d   :  { %v3914_v8 = vpop.xlane.xlu0 %3913 }
 0xa9e   :  { %v3933_v14 = vmul.f32 0.015625, %v3914_v8  ;;  %v4040_v8 = vrot.slane %v7731_v63, %v10302_v54 }
 0xa9f   :  { %v3926_v1 = vpop.xlane.xlu1 %3925 }
 0xaa0   :  { %v3941_v60 = vmul.f32 %v3933_v14, %v3933_v14  ;;  %v3937_v38 = vmul.f32 0.015625, %v3926_v1  ;;  %v3949_v57 = vsub.f32 %v11039_v35, %v3933_v14 }
 0xaa1   :  { %v3916_v11 = vpop.xlane.xlu0 %3915 }
 0xaa2   :  { %v3945_v17 = vsub.f32 %v3937_v38, %v3941_v60  ;;  %v3934_v43 = vmul.f32 0.015625, %v3916_v11 }
 0xaa3   :  { %v3928_v29 = vpop.xlane.xlu1 %3927 }
 0xaa4   :  { %v3953_v39 = vadd.f32 1e-06, %v3945_v17  ;;  %v3942_v47 = vmul.f32 %v3934_v43, %v3934_v43  ;;  %v3938_v6 = vmul.f32 0.015625, %v3928_v29  ;;  %v3950_v2 = vsub.f32 %v11041_v55, %v3934_v43 }
 0xaa6   :  { %9605 = vrsqrt.f32 %v3953_v39  ;;  %v3946_v61 = vsub.f32 %v3938_v6, %v3942_v47 }
 0xaa8   :  { %v3954_v5 = vadd.f32 1e-06, %v3946_v61  ;;  %v4044_v61 = vrot.slane %v7731_v63, %v10395_v62 }
 0xaaa   :  { %9607 = vrsqrt.f32 %v3954_v5 }
 0xab0   :  { %v9606_v10 = vpop.eup %9605 }
 0xab1   :  { %v3961_v9 = vmul.f32 %v9606_v10, %v3949_v57 }
 0xab2   :  { %v3918_v58 = vpop.xlane.xlu0 %3917 }
 0xab3   :  { %v3935_v12 = vmul.f32 0.015625, %v3918_v58  ;;  %v3969_v32 = vmul.f32 %v3968_v7, %v3961_v9 }
 0xab4   :  { %v9608_v22 = vpop.eup %9607  ;;  %v3930_v4 = vpop.xlane.xlu1 %3929 }
 0xab5   :  { %v3943_v20 = vmul.f32 %v3935_v12, %v3935_v12  ;;  %v3939_v3 = vmul.f32 0.015625, %v3930_v4  ;;  %v3977_v21 = vadd.f32 %v3976_v15, %v3969_v32  ;;  %v3962_v27 = vmul.f32 %v9608_v22, %v3950_v2 }
 0xab6   :  { %v3920_v13 = vpop.xlane.xlu0 %3919  ;;  %v3951_v41 = vsub.f32 %v11087_v16, %v3935_v12 }
 0xab7   :  { %v3947_v31 = vsub.f32 %v3939_v3, %v3943_v20  ;;  %v3936_v25 = vmul.f32 0.015625, %v3920_v13  ;;  %4113 = vmatmul.mubr.f32.vlgmr.msra.gmra.mrb[58].mxu1 %v3977_v21  ;;  %8636 = vmatprep.mubr.f32.mxu0 %v3977_v21  ;;  %v3970_v30 = vmul.f32 %v3968_v7, %v3962_v27 }
 0xab8   :  { %v3932_v51 = vpop.xlane.xlu1 %3931  ;;  %4118 = vmatprep.mubr.f32.mxu1 %v9699_v18 }
 0xab9   :  { %v3955_v19 = vadd.f32 1e-06, %v3947_v31  ;;  %v3944_v44 = vmul.f32 %v3936_v25, %v3936_v25  ;;  %v3940_v26 = vmul.f32 0.015625, %v3932_v51  ;;  %v3978_v37 = vadd.f32 %v3976_v15, %v3970_v30 }
 0xaba   :  { %v3952_v23 = vsub.f32 %v11089_v45, %v3936_v25 }
 0xabb   :  { %9609 = vrsqrt.f32 %v3955_v19  ;;  %v3948_v50 = vsub.f32 %v3940_v26, %v3944_v44  ;;  %4119 = vmatmul.mubr.f32.gmra.mrb[60].mxu1 %v3978_v37  ;;  %8637 = vmatmul.mubr.f32.vlgmr.msra.gmra.mrb[54].mxu0 %v3978_v37 }
 0xabc   :  { %4124 = vmatprep.mubr.f32.mxu1 %v9699_v18 }
 0xabd   :  { %v3956_v52 = vadd.f32 1e-06, %v3948_v50 }
 0xabf   :  { %9611 = vrsqrt.f32 %v3956_v52 }
 0xac5   :  { %v9610_v24 = vpop.eup %9609 }
 0xac6   :  { %v3963_v28 = vmul.f32 %v9610_v24, %v3951_v41 }
 0xac8   :  { %v3971_v36 = vmul.f32 %v3968_v7, %v3963_v28 }
 0xac9   :  { %v9612_v56 = vpop.eup %9611 }
 0xaca   :  { %v3979_v53 = vadd.f32 %v3976_v15, %v3971_v36  ;;  %v3964_v48 = vmul.f32 %v9612_v56, %v3952_v23 }
 0xacc   :  { %4125 = vmatmul.mubr.f32.gmra.mrb[62].mxu1 %v3979_v53  ;;  %8639 = vmatprep.mubr.f32.mxu0 %v3979_v53  ;;  %v3972_v59 = vmul.f32 %v3968_v7, %v3964_v48 }
 0xacd   :  { %4130 = vmatprep.mubr.f32.mxu1 %v9699_v18 }
 0xace   :  { %v3980_v34 = vadd.f32 %v3976_v15, %v3972_v59 }
 0xad0   :  { %4131 = vmatmul.mubr.f32.gmra.mrb[64].mxu1 %v3980_v34  ;;  %8640 = vmatmul.mubr.f32.gmra.mrb[56].mxu0 %v3980_v34 }
 0xad1   :  { %8644 = vmatprep.mubr.msk.f32.mxu1 %vm9700_vm0, %v9699_v18  ;;  %8674 = vmatprep.mubr.msk.f32.mxu0 %vm9700_vm0, %v9699_v18 }
 0xb8a   :  { %v4114_v14 = vpop.f32.mrb[58].mxu1 }
 0xb8b   :  { %v4115_v1 = vadd.f32 %v4114_v14, %v4036_v0  ;;  %v4116_v60 = vpop.f32.mrb[59].mxu1 }
 0xb8c   :  { %v4117_v38 = vadd.f32 %v4116_v60, %v4040_v8 }
 0xb8d   :  { %4299 = vrot.lane.b32.xlu1 %v4115_v1, %s9702_s0 }
 0xb8e   :  { %4301 = vrot.lane.b32.xlu0 %v4117_v38, %s9702_s0  ;;  %8643 = vmatpush3.xpose.msk.msra.mxu1 %vm747_vm1, %v4117_v38  ;;  %v4120_v11 = vpop.f32.mrb[60].mxu1  ;;  %v8638_v17 = vpop.f32.mrb[54].mxu0 }
 0xb8f   :  { %8647 = vmatprep.subr.mxu1 %v9699_v18  ;;  %v4122_v43 = vpop.f32.mrb[61].mxu1  ;;  %v4203_v29 = vpop.f32.mrb[55].mxu0  ;;  %v11207_v49 = vadd.f32 %v4120_v11, %v4036_v0  ;;  %v11263_v22 = vadd.f32 %v8638_v17, %v4044_v61 }
 0xb90   :  { %v11212_v54 = vadd.f32 %v4122_v43, %v4040_v8  ;;  %v11253_v32 = vadd.f32 %v4203_v29, %v4044_v61 }
 0xb91   :  { %4378 = vrot.lane.b32.xlu1 %v4115_v1, %s9701_s19  ;;  %8645 = vmatmul.mubr.msk.f32.vlgmr.msra.gmra.mrb[66].mxu1 %vm747_vm1, %v4115_v1 }
 0xb92   :  { %4459 = vrot.lane.b32.xlu0 %v4117_v38, %s9703_s21  ;;  %8649 = vmatprep.mubr.msk.f32.mxu1 %vm9700_vm0, %v9699_v18 }
 0xb95   :  { %4457 = vrot.lane.b32.xlu1 %v4115_v1, %s9703_s21 }
 0xb96   :  { %4692 = vrot.lane.b32.xlu0 %v11207_v49, %s9701_s19 }
 0xb99   :  { %4380 = vrot.lane.b32.xlu1 %v4117_v38, %s9701_s19 }
 0xb9a   :  { %4615 = vrot.lane.b32.xlu0 %v11212_v54, %s9702_s0 }
 0xb9d   :  { %4613 = vrot.lane.b32.xlu1 %v11207_v49, %s9702_s0 }
 0xb9e   :  { %4694 = vrot.lane.b32.xlu0 %v11212_v54, %s9701_s19 }
 0xb9f   :  { %v4126_v39 = vpop.f32.mrb[62].mxu1 }
 0xba0   :  { %v11221_v47 = vadd.f32 %v4126_v39, %v4036_v0  ;;  %v4128_v6 = vpop.f32.mrb[63].mxu1 }
 0xba1   :  { %4771 = vrot.lane.b32.xlu1 %v11207_v49, %s9703_s21  ;;  %v4129_v57 = vadd.f32 %v4128_v6, %v4040_v8 }
 0xba2   :  { %5006 = vrot.lane.b32.xlu0 %v11221_v47, %s9701_s19 }
 0xba3   :  { %v4132_v5 = vpop.f32.mrb[64].mxu1  ;;  %v8641_v33 = vpop.f32.mrb[56].mxu0 }
 0xba4   :  { %v11228_v7 = vadd.f32 %v8641_v33, %v4044_v61  ;;  %v4134_v10 = vpop.f32.mrb[65].mxu1  ;;  %v4213_v9 = vpop.f32.mrb[57].mxu0  ;;  %v11247_v12 = vadd.f32 %v4132_v5, %v4036_v0 }
 0xba5   :  { %v11230_v15 = vadd.f32 %v4213_v9, %v4044_v61  ;;  %4773 = vrot.lane.b32.xlu1 %v11212_v54, %s9703_s21  ;;  %v11238_v58 = vadd.f32 %v4134_v10, %v4040_v8 }
 0xba6   :  { %4929 = vrot.lane.b32.xlu0 %v4129_v57, %s9702_s0 }
 0xba9   :  { %4927 = vrot.lane.b32.xlu1 %v11221_v47, %s9702_s0 }
 0xbaa   :  { %5008 = vrot.lane.b32.xlu0 %v4129_v57, %s9701_s19 }
 0xbad   :  { %5085 = vrot.lane.b32.xlu1 %v11221_v47, %s9703_s21 }
 0xbae   :  { %5243 = vrot.lane.b32.xlu0 %v11238_v58, %s9702_s0 }
 0xbb1   :  { %5087 = vrot.lane.b32.xlu1 %v4129_v57, %s9703_s21 }
 0xbb2   :  { %5322 = vrot.lane.b32.xlu0 %v11238_v58, %s9701_s19 }
 0xbb5   :  { %5241 = vrot.lane.b32.xlu1 %v11247_v12, %s9702_s0 }
 0xbb6   :  { %5320 = vrot.lane.b32.xlu0 %v11247_v12, %s9701_s19 }
 0xbb9   :  { %5401 = vrot.lane.b32.xlu1 %v11238_v58, %s9703_s21 }
 0xbba   :  { %5744 = vrot.lane.b32.xlu0 %v11253_v32, %s9702_s0 }
 0xbbd   :  { %5399 = vrot.lane.b32.xlu1 %v11247_v12, %s9703_s21 }
 0xbbe   :  { %5896 = vrot.lane.b32.xlu0 %v11253_v32, %s9703_s21 }
 0xbc1   :  { %5820 = vrot.lane.b32.xlu1 %v11253_v32, %s9701_s19 }
 0xbc2   :  { %6137 = vrot.lane.b32.xlu0 %v11263_v22, %s9701_s19 }
 0xbc5   :  { %6061 = vrot.lane.b32.xlu1 %v11263_v22, %s9702_s0 }
 0xbc9   :  { %6213 = vrot.lane.b32.xlu1 %v11263_v22, %s9703_s21 }
 0xbff   :  { %v4300_v2 = vpop.permute.xlu1 %4299 }
 0xc00   :  { %v4302_v4 = vpop.permute.xlu0 %4301 }
 0xc01   :  { %8648 = vmatpush3.xpose.msk.msra.mxu1 %vm747_vm1, %v4302_v4 }
 0xc02   :  { %8652 = vmatprep.subr.mxu1 %v9699_v18 }
 0xc03   :  { %v4379_v20 = vpop.permute.xlu1 %4378 }
 0xc04   :  { %8650 = vmatmul.mubr.msk.f32.vlgmr.msra.gmra.mrb[68].mxu1 %vm747_vm1, %v4300_v2  ;;  %v4460_v3 = vpop.permute.xlu0 %4459 }
 0xc05   :  { %8654 = vmatprep.mubr.msk.f32.mxu1 %vm9700_vm0, %v9699_v18 }
 0xc07   :  { %v4458_v21 = vpop.permute.xlu1 %4457 }
 0xc08   :  { %v4693_v13 = vpop.permute.xlu0 %4692 }
 0xc0b   :  { %v4381_v27 = vpop.permute.xlu1 %4380 }
 0xc0c   :  { %8653 = vmatpush3.xpose.msk.msra.mxu1 %vm747_vm1, %v4381_v27  ;;  %v4616_v31 = vpop.permute.xlu0 %4615 }
 0xc0d   :  { %8657 = vmatprep.subr.mxu1 %v9699_v18 }
 0xc0f   :  { %v4614_v25 = vpop.permute.xlu1 %4613  ;;  %8655 = vmatmul.mubr.msk.f32.vlgmr.msra.gmra.mrb[70].mxu1 %vm747_vm1, %v4379_v20 }
 0xc10   :  { %8658 = vmatpush3.xpose.msk.msra.mxu1 %vm747_vm1, %v4460_v3  ;;  %v4695_v51 = vpop.permute.xlu0 %4694  ;;  %8659 = vmatprep.mubr.msk.f32.mxu1 %vm9700_vm0, %v9699_v18 }
 0xc11   :  { %8673 = vmatpush3.xpose.msk.msra.mxu0 %vm747_vm1, %v4695_v51  ;;  %8662 = vmatprep.subr.mxu1 %v9699_v18 }
 0xc12   :  { %8682 = vmatprep.subr.mxu0 %v9699_v18 }
 0xc13   :  { %v4772_v30 = vpop.permute.xlu1 %4771  ;;  %8660 = vmatmul.mubr.msk.f32.vlgmr.msra.gmra.mrb[72].mxu1 %vm747_vm1, %v4458_v21 }
 0xc14   :  { %8663 = vmatpush3.xpose.msk.msra.mxu1 %vm747_vm1, %v11212_v54  ;;  %8675 = vmatmul.mubr.msk.f32.vlgmr.msra.gmra.mrb[58].mxu0 %vm747_vm1, %v4693_v13  ;;  %v5007_v19 = vpop.permute.xlu0 %5006 }
 0xc15   :  { %8683 = vmatpush3.xpose.msk.msra.mxu0 %vm747_vm1, %v4129_v57  ;;  %8664 = vmatprep.mubr.msk.f32.mxu1 %vm9700_vm0, %v9699_v18 }
 0xc16   :  { %8667 = vmatprep.subr.mxu1 %v9699_v18  ;;  %8684 = vmatprep.mubr.msk.f32.mxu0 %vm9700_vm0, %v9699_v18 }
 0xc17   :  { %v4774_v44 = vpop.permute.xlu1 %4773  ;;  %8665 = vmatmul.mubr.msk.f32.vlgmr.msra.gmra.mrb[74].mxu1 %vm747_vm1, %v11207_v49  ;;  %8692 = vmatprep.subr.mxu0 %v9699_v18 }
 0xc18   :  { %8668 = vmatpush3.xpose.msk.msra.mxu1 %vm747_vm1, %v4616_v31  ;;  %8685 = vmatmul.mubr.msk.f32.vlgmr.msra.gmra.mrb[60].mxu0 %vm747_vm1, %v11221_v47  ;;  %v4930_v26 = vpop.permute.xlu0 %4929 }
 0xc19   :  { %8669 = vmatprep.mubr.msk.f32.mxu1 %vm9700_vm0, %v9699_v18  ;;  %8677 = vmatprep.subr.mxu1 %v9699_v18 }
 0xc1a   :  { %8694 = vmatprep.mubr.msk.f32.mxu0 %vm9700_vm0, %v9699_v18 }
 0xc1b   :  { %v4928_v37 = vpop.permute.xlu1 %4927  ;;  %8670 = vmatmul.mubr.msk.f32.vlgmr.msra.gmra.mrb[76].mxu1 %vm747_vm1, %v4614_v25 }
 0xc1c   :  { %8678 = vmatpush3.xpose.msk.msra.mxu1 %vm747_vm1, %v4774_v44  ;;  %v5009_v50 = vpop.permute.xlu0 %5008  ;;  %8679 = vmatprep.mubr.msk.f32.mxu1 %vm9700_vm0, %v9699_v18 }
 0xc1d   :  { %8693 = vmatpush3.xpose.msk.msra.mxu0 %vm747_vm1, %v5009_v50  ;;  %8687 = vmatprep.subr.mxu1 %v9699_v18 }
 0xc1e   :  { %8702 = vmatprep.subr.mxu0 %v9699_v18 }
 0xc1f   :  { %v5086_v52 = vpop.permute.xlu1 %5085  ;;  %8680 = vmatmul.mubr.msk.f32.vlgmr.msra.gmra.mrb[78].mxu1 %vm747_vm1, %v4772_v30 }
 0xc20   :  { %8688 = vmatpush3.xpose.msk.msra.mxu1 %vm747_vm1, %v4930_v26  ;;  %8695 = vmatmul.mubr.msk.f32.vlgmr.msra.gmra.mrb[62].mxu0 %vm747_vm1, %v5007_v19  ;;  %v5244_v41 = vpop.permute.xlu0 %5243 }
 0xc21   :  { %8703 = vmatpush3.xpose.msk.msra.mxu0 %vm747_vm1, %v11238_v58  ;;  %8689 = vmatprep.mubr.msk.f32.mxu1 %vm9700_vm0, %v9699_v18 }
 0xc22   :  { %8697 = vmatprep.subr.mxu1 %v9699_v18  ;;  %8704 = vmatprep.mubr.msk.f32.mxu0 %vm9700_vm0, %v9699_v18 }
 0xc23   :  { %v5088_v24 = vpop.permute.xlu1 %5087  ;;  %8690 = vmatmul.mubr.msk.f32.vlgmr.msra.gmra.mrb[80].mxu1 %vm747_vm1, %v4928_v37  ;;  %8712 = vmatprep.subr.mxu0 %v9699_v18 }
 0xc24   :  { %8698 = vmatpush3.xpose.msk.msra.mxu1 %vm747_vm1, %v5088_v24  ;;  %8705 = vmatmul.mubr.msk.f32.vlgmr.msra.gmra.mrb[64].mxu0 %vm747_vm1, %v11247_v12  ;;  %v5323_v28 = vpop.permute.xlu0 %5322 }
 0xc25   :  { %8713 = vmatpush3.xpose.msk.msra.mxu0 %vm747_vm1, %v5323_v28  ;;  %8699 = vmatprep.mubr.msk.f32.mxu1 %vm9700_vm0, %v9699_v18 }
 0xc26   :  { %8707 = vmatprep.subr.mxu1 %v9699_v18  ;;  %8714 = vmatprep.mubr.msk.f32.mxu0 %vm9700_vm0, %v9699_v18 }
 0xc27   :  { %v5242_v23 = vpop.permute.xlu1 %5241  ;;  %8700 = vmatmul.mubr.msk.f32.vlgmr.msra.gmra.mrb[82].mxu1 %vm747_vm1, %v5086_v52  ;;  %8722 = vmatprep.subr.mxu0 %v9699_v18 }
 0xc28   :  { %8708 = vmatpush3.xpose.msk.msra.mxu1 %vm747_vm1, %v5244_v41  ;;  %v5321_v36 = vpop.permute.xlu0 %5320  ;;  %8709 = vmatprep.mubr.msk.f32.mxu1 %vm9700_vm0, %v9699_v18 }
 0xc29   :  { %8715 = vmatmul.mubr.msk.f32.vlgmr.msra.gmra.mrb[66].mxu0 %vm747_vm1, %v5321_v36  ;;  %8717 = vmatprep.subr.mxu1 %v9699_v18 }
 0xc2a   :  { %8723 = vmatpush3.msra.mxu0 %v11253_v32  ;;  %8724 = vmatprep.mubr.msk.f32.mxu0 %vm9700_vm0, %v9699_v18 }
 0xc2b   :  { %v5402_v56 = vpop.permute.xlu1 %5401  ;;  %8710 = vmatmul.mubr.msk.f32.vlgmr.msra.gmra.mrb[84].mxu1 %vm747_vm1, %v5242_v23  ;;  %8732 = vmatprep.subr.mxu0 %v9699_v18 }
 0xc2c   :  { %8718 = vmatpush3.xpose.msk.msra.mxu1 %vm747_vm1, %v5402_v56  ;;  %8719 = vmatprep.mubr.msk.f32.mxu1 %vm9700_vm0, %v9699_v18  ;;  %v5745_v48 = vpop.permute.xlu0 %5744 }
 0xc2d   :  { %8727 = vmatprep.subr.mxu1 %v9699_v18 }
 0xc2f   :  { %v5400_v53 = vpop.permute.xlu1 %5399 }
 0xc30   :  { %8720 = vmatmul.mubr.msk.f32.vlgmr.msra.gmra.mrb[86].mxu1 %vm747_vm1, %v5400_v53 }
 0xc31   :  { %8728 = vmatpush3.msra.mxu1 %v5745_v48  ;;  %8729 = vmatprep.mubr.msk.f32.mxu1 %vm9700_vm0, %v9699_v18 }
 0xc32   :  { %8737 = vmatprep.subr.mxu1 %v9699_v18 }
 0xc64   :  { %v4294_v59 = vpop.f32.mrb[66].mxu1 }
 0xc65   :  { %v4298_v34 = vmul.f32 0.25, %v4294_v59  ;;  %v8646_v63 = vpop.f32.mrb[67].mxu1 }
 0xc67   :  { %v11357_v0 = vadd.f32 %v4298_v34, %v10525_v46 }
 0xc69   :  { %v5494_v8 = vsel %vm2020_vm3, %v11357_v0, -inf }
 0xc6a   :  { %5495 = vmax.xlane.f32.xlu0 %v5494_v8 }
 0xcd7   :  { %v4373_v14 = vpop.f32.mrb[68].mxu1 }
 0xcd8   :  { %v4377_v1 = vmul.f32 0.25, %v4373_v14  ;;  %v8651_v60 = vpop.f32.mrb[69].mxu1 }
 0xcda   :  { %v11362_v38 = vadd.f32 %v4377_v1, %v10525_v46 }
 0xcdc   :  { %v5497_v11 = vsel %vm2020_vm3, %v11362_v38, -inf }
 0xcdd   :  { %5498 = vmax.xlane.f32.xlu1 %v5497_v11 }
 0xce2   :  { %v4452_v17 = vpop.f32.mrb[70].mxu1 }
 0xce3   :  { %v4456_v43 = vmul.f32 0.25, %v4452_v17  ;;  %v8656_v29 = vpop.f32.mrb[71].mxu1 }
 0xce5   :  { %v11367_v49 = vadd.f32 %v4456_v43, %v10525_v46 }
 0xce6   :  { %v4531_v54 = vpop.f32.mrb[72].mxu1 }
 0xce7   :  { %v8661_v39 = vpop.f32.mrb[73].mxu1  ;;  %v4766_v47 = vpop.f32.mrb[58].mxu0  ;;  %v5500_v6 = vsel %vm2020_vm3, %v11367_v49, -inf  ;;  %v4535_v61 = vmul.f32 0.25, %v4531_v54 }
 0xce8   :  { %v4770_v5 = vmul.f32 0.25, %v4766_v47  ;;  %5501 = vmax.xlane.f32.xlu0 %v5500_v6  ;;  %v8676_v33 = vpop.f32.mrb[59].mxu0 }
 0xce9   :  { %v11375_v12 = vadd.f32 %v4535_v61, %v10525_v46 }
 0xcea   :  { %v11372_v57 = vadd.f32 %v4770_v5, %v10525_v46  ;;  %v4608_v10 = vpop.f32.mrb[74].mxu1 }
 0xceb   :  { %v8666_v9 = vpop.f32.mrb[75].mxu1  ;;  %v4922_v58 = vpop.f32.mrb[60].mxu0  ;;  %v4612_v13 = vmul.f32 0.25, %v4608_v10  ;;  %v5503_v31 = vsel %vm2020_vm3, %v11375_v12, -inf }
 0xcec   :  { %v4926_v32 = vmul.f32 0.25, %v4922_v58  ;;  %v8686_v2 = vpop.f32.mrb[61].mxu0  ;;  %v5512_v4 = vsel %vm2020_vm3, %v11372_v57, -inf  ;;  %v11423_v9 = vpop.permute.xlu0 %5896 }
 0xced   :  { %5513 = vmax.xlane.f32.xlu0 %v5512_v4  ;;  %v11390_v37 = vadd.f32 %v4612_v13, %v10525_v46 }
 0xcee   :  { %v4687_v20 = vpop.f32.mrb[76].mxu1  ;;  %v11380_v27 = vadd.f32 %v4926_v32, %v10525_v46 }
 0xcef   :  { %v4691_v3 = vmul.f32 0.25, %v4687_v20  ;;  %v8671_v21 = vpop.f32.mrb[77].mxu1  ;;  %v5506_v63 = vsel %vm2020_vm3, %v11390_v37, -inf }
 0xcf0   :  { %v5518_v41 = vsel %vm2020_vm3, %v11380_v27, -inf  ;;  %v11427_v58 = vpop.permute.xlu0 %6137 }
 0xcf1   :  { %v11385_v25 = vadd.f32 %v4691_v3, %v10525_v46  ;;  %5504 = vmax.xlane.f32.xlu0 %v5503_v31 }
 0xcf2   :  { %v4845_v51 = vpop.f32.mrb[78].mxu1 }
 0xcf3   :  { %v4849_v30 = vmul.f32 0.25, %v4845_v51  ;;  %v8681_v19 = vpop.f32.mrb[79].mxu1  ;;  %v5080_v44 = vpop.f32.mrb[62].mxu0  ;;  %v5509_v26 = vsel %vm2020_vm3, %v11385_v25, -inf }
 0xcf4   :  { %v5084_v50 = vmul.f32 0.25, %v5080_v44  ;;  %5510 = vmax.xlane.f32.xlu1 %v5509_v26  ;;  %v8696_v52 = vpop.f32.mrb[63].mxu0 }
 0xcf5   :  { %v11395_v24 = vadd.f32 %v4849_v30, %v10525_v46  ;;  %5519 = vmax.xlane.f32.xlu0 %v5518_v41 }
 0xcf6   :  { %v5001_v28 = vpop.f32.mrb[80].mxu1  ;;  %v11400_v48 = vadd.f32 %v5084_v50, %v10525_v46  ;;  %v11449_v50 = vpop.permute.xlu1 %5820 }
 0xcf7   :  { %v5005_v23 = vmul.f32 0.25, %v5001_v28  ;;  %v8691_v36 = vpop.f32.mrb[81].mxu1  ;;  %v5236_v56 = vpop.f32.mrb[64].mxu0  ;;  %v5515_v53 = vsel %vm2020_vm3, %v11395_v24, -inf }
 0xcf8   :  { %v5240_v59 = vmul.f32 0.25, %v5236_v56  ;;  %5516 = vmax.xlane.f32.xlu1 %v5515_v53  ;;  %v8706_v34 = vpop.f32.mrb[65].mxu0  ;;  %v5524_v43 = vsel %vm2020_vm3, %v11400_v48, -inf  ;;  %v5496_v32 = vpop.xlane.xlu0 %5495 }
 0xcf9   :  { %v11405_v8 = vadd.f32 %v5005_v23, %v10525_v46  ;;  %5507 = vmax.xlane.f32.xlu0 %v5506_v63  ;;  %v5542_v2 = vsub.f32 %v11357_v0, %v5496_v32 }
 0xcfa   :  { %v5159_v14 = vpop.f32.mrb[82].mxu1  ;;  %v11410_v11 = vadd.f32 %v5240_v59, %v10525_v46  ;;  %v11451_v52 = vpop.permute.xlu1 %6061 }
 0xcfb   :  { %v8701_v1 = vpop.f32.mrb[83].mxu1  ;;  %v5521_v60 = vsel %vm2020_vm3, %v11405_v8, -inf  ;;  %v5558_v4 = vmul.f32 1.442695, %v5542_v2  ;;  %v5163_v20 = vmul.f32 0.25, %v5159_v14 }
 0xcfc   :  { %5522 = vmax.xlane.f32.xlu1 %v5521_v60  ;;  %v5394_v17 = vpop.f32.mrb[66].mxu0  ;;  %v5530_v61 = vsel %vm2020_vm3, %v11410_v11, -inf }
 0xcfd   :  { %v5398_v29 = vmul.f32 0.25, %v5394_v17  ;;  %5525 = vmax.xlane.f32.xlu0 %v5524_v43  ;;  %v8716_v54 = vpop.f32.mrb[67].mxu0  ;;  %9613 = vpow2.f32 %v5558_v4  ;;  %v11431_v3 = vadd.f32 %v5163_v20, %v10525_v46 }
 0xcfe   :  { %v5315_v39 = vpop.f32.mrb[84].mxu1 }
 0xcff   :  { %v8711_v47 = vpop.f32.mrb[85].mxu1  ;;  %v11415_v6 = vadd.f32 %v5398_v29, %v10525_v46  ;;  %v5319_v21 = vmul.f32 0.25, %v5315_v39  ;;  %v5527_v51 = vsel %vm2020_vm3, %v11431_v3, -inf }
 0xd01   :  { %5531 = vmax.xlane.f32.xlu0 %v5530_v61  ;;  %v5536_v10 = vsel %vm2020_vm3, %v11415_v6, -inf  ;;  %v11434_v13 = vadd.f32 %v5319_v21, %v10525_v46 }
 0xd03   :  { %v5473_v5 = vpop.f32.mrb[86].mxu1  ;;  %v5533_v0 = vsel %vm2020_vm3, %v11434_v13, -inf }
 0xd04   :  { %v8721_v33 = vpop.f32.mrb[87].mxu1  ;;  %v5477_v31 = vmul.f32 0.25, %v5473_v5 }
 0xd05   :  { %5537 = vmax.xlane.f32.xlu0 %v5536_v10 }
 0xd06   :  { %v11439_v30 = vadd.f32 %v5477_v31, %v10525_v46  ;;  %v11453_v46 = vpop.permute.xlu1 %6213 }
 0xd07   :  { %v11443_v19 = vpop.eup %9613 }
 0xd08   :  { %v5539_v44 = vsel %vm2020_vm3, %v11439_v30, -inf  ;;  %v5590_v26 = vsel %vm2020_vm3, %v11443_v19, 0.0 }
 0xd0d   :  { %6454 = vrot.lane.b32.xlu1 %v11230_v15, %s9701_s19 }
 0xd1b   :  { %6378 = vrot.lane.b32.xlu0 %v11230_v15, %s9702_s0 }
 0xd31   :  { %5528 = vmax.xlane.f32.xlu1 %v5527_v51 }
 0xd35   :  { %5534 = vmax.xlane.f32.xlu1 %v5533_v0 }
 0xd39   :  { %5540 = vmax.xlane.f32.xlu1 %v5539_v44 }
 0xd3a   :  { %5591 = vadd.xlane.f32.xlu0 %v5590_v26 }
 0xd6a   :  { %v5499_v41 = vpop.xlane.xlu1 %5498 }
 0xd6b   :  { %v5543_v28 = vsub.f32 %v11362_v38, %v5499_v41 }
 0xd6d   :  { %v5560_v23 = vmul.f32 1.442695, %v5543_v28 }
 0xd6f   :  { %9615 = vpow2.f32 %v5560_v23 }
 0xd75   :  { %v5502_v36 = vpop.xlane.xlu0 %5501 }
 0xd76   :  { %v5544_v56 = vsub.f32 %v11367_v49, %v5502_v36 }
 0xd78   :  { %v5562_v53 = vmul.f32 1.442695, %v5544_v56 }
 0xd79   :  { %v11457_v59 = vpop.eup %9615 }
 0xd7a   :  { %9617 = vpow2.f32 %v5562_v53  ;;  %v5514_v34 = vpop.xlane.xlu0 %5513  ;;  %v5593_v63 = vsel %vm2020_vm3, %v11457_v59, 0.0 }
 0xd7b   :  { %v5548_v14 = vsub.f32 %v11372_v57, %v5514_v34  ;;  %5594 = vadd.xlane.f32.xlu1 %v5593_v63 }
 0xd7d   :  { %v5570_v1 = vmul.f32 1.442695, %v5548_v14 }
 0xd7e   :  { %v5505_v60 = vpop.xlane.xlu0 %5504 }
 0xd7f   :  { %9619 = vpow2.f32 %v5570_v1  ;;  %v5545_v38 = vsub.f32 %v11375_v12, %v5505_v60 }
 0xd81   :  { %v5564_v17 = vmul.f32 1.442695, %v5545_v38  ;;  %v5511_v4 = vpop.xlane.xlu1 %5510 }
 0xd82   :  { %v5520_v43 = vpop.xlane.xlu0 %5519  ;;  %v5547_v31 = vsub.f32 %v11385_v25, %v5511_v4 }
 0xd83   :  { %9621 = vpow2.f32 %v5564_v17  ;;  %v5550_v49 = vsub.f32 %v11380_v27, %v5520_v43 }
 0xd84   :  { %v11464_v29 = vpop.eup %9617  ;;  %v5568_v0 = vmul.f32 1.442695, %v5547_v31 }
 0xd85   :  { %v5574_v54 = vmul.f32 1.442695, %v5550_v49  ;;  %v5596_v39 = vsel %vm2020_vm3, %v11464_v29, 0.0  ;;  %v5517_v21 = vpop.xlane.xlu1 %5516 }
 0xd86   :  { %5597 = vadd.xlane.f32.xlu0 %v5596_v39  ;;  %v5508_v47 = vpop.xlane.xlu0 %5507  ;;  %v5549_v44 = vsub.f32 %v11395_v24, %v5517_v21 }
 0xd87   :  { %9623 = vpow2.f32 %v5574_v54  ;;  %v5546_v57 = vsub.f32 %v11390_v37, %v5508_v47 }
 0xd88   :  { %v5572_v28 = vmul.f32 1.442695, %v5549_v44 }
 0xd89   :  { %v11469_v61 = vpop.eup %9619  ;;  %v5566_v5 = vmul.f32 1.442695, %v5546_v57  ;;  %v5523_v26 = vpop.xlane.xlu1 %5522 }
 0xd8a   :  { %v5608_v12 = vsel %vm2020_vm3, %v11469_v61, 0.0  ;;  %v5526_v20 = vpop.xlane.xlu0 %5525  ;;  %v5551_v41 = vsub.f32 %v11405_v8, %v5523_v26 }
 0xd8b   :  { %9625 = vpow2.f32 %v5566_v5  ;;  %5609 = vadd.xlane.f32.xlu0 %v5608_v12  ;;  %v5552_v23 = vsub.f32 %v11400_v48, %v5526_v20 }
 0xd8c   :  { %9627 = vpow2.f32 %v5568_v0  ;;  %v5576_v56 = vmul.f32 1.442695, %v5551_v41 }
 0xd8d   :  { %v11473_v27 = vpop.eup %9621  ;;  %9629 = vpow2.f32 %v5572_v28  ;;  %v5578_v34 = vmul.f32 1.442695, %v5552_v23  ;;  %v11494_v63 = vpop.permute.xlu1 %6454 }
 0xd8e   :  { %v5599_v33 = vsel %vm2020_vm3, %v11473_v27, 0.0  ;;  %v5532_v51 = vpop.xlane.xlu0 %5531  ;;  %9631 = vpow2.f32 %v5576_v56 }
 0xd8f   :  { %5600 = vadd.xlane.f32.xlu1 %v5599_v33  ;;  %v5554_v53 = vsub.f32 %v11410_v11, %v5532_v51  ;;  %9633 = vpow2.f32 %v5578_v34 }
 0xd91   :  { %v11477_v10 = vpop.eup %9623  ;;  %v5582_v14 = vmul.f32 1.442695, %v5554_v53 }
 0xd92   :  { %v5614_v32 = vsel %vm2020_vm3, %v11477_v10, 0.0  ;;  %v5538_v36 = vpop.xlane.xlu0 %5537 }
 0xd93   :  { %5615 = vadd.xlane.f32.xlu0 %v5614_v32  ;;  %v5556_v25 = vsub.f32 %v11415_v6, %v5538_v36  ;;  %9635 = vpow2.f32 %v5582_v14 }
 0xd95   :  { %v11481_v37 = vpop.eup %9625  ;;  %v5586_v24 = vmul.f32 1.442695, %v5556_v25 }
 0xd96   :  { %v5602_v2 = vsel %vm2020_vm3, %v11481_v37, 0.0  ;;  %v11498_v60 = vpop.eup %9627  ;;  %v11500_v11 = vpop.permute.xlu0 %6378 }
 0xd97   :  { %5603 = vadd.xlane.f32.xlu0 %v5602_v2  ;;  %9637 = vpow2.f32 %v5586_v24  ;;  %v5605_v6 = vsel %vm2020_vm3, %v11498_v60, 0.0  ;;  %v11505_v43 = vpop.eup %9629 }
 0xd98   :  { %v5611_v57 = vsel %vm2020_vm3, %v11505_v43, 0.0 }
 0xda0   :  { %6695 = vrot.lane.b32.xlu1 %v11228_v7, %s9702_s0 }
 0xdad   :  { %6530 = vrot.lane.b32.xlu0 %v11230_v15, %s9703_s21 }
 0xdbe   :  { %v5529_v1 = vpop.xlane.xlu1 %5528 }
 0xdbf   :  { %v5553_v8 = vsub.f32 %v11431_v3, %v5529_v1  ;;  %v11507_v3 = vpop.eup %9631 }
 0xdc0   :  { %v11512_v5 = vpop.eup %9633  ;;  %v5617_v33 = vsel %vm2020_vm3, %v11507_v3, 0.0 }
 0xdc1   :  { %v5580_v48 = vmul.f32 1.442695, %v5553_v8  ;;  %v11514_v12 = vpop.eup %9635  ;;  %v5620_v32 = vsel %vm2020_vm3, %v11512_v5, 0.0 }
 0xdc2   :  { %v5535_v38 = vpop.xlane.xlu1 %5534  ;;  %v11520_v2 = vpop.eup %9637 }
 0xdc3   :  { %v5555_v17 = vsub.f32 %v11434_v13, %v5535_v38  ;;  %9639 = vpow2.f32 %v5580_v48  ;;  %v5632_v4 = vsel %vm2020_vm3, %v11520_v2, 0.0 }
 0xdc4   :  { %5606 = vadd.xlane.f32.xlu1 %v5605_v6 }
 0xdc5   :  { %v5584_v49 = vmul.f32 1.442695, %v5555_v17 }
 0xdc6   :  { %v5541_v54 = vpop.xlane.xlu1 %5540 }
 0xdc7   :  { %v5557_v39 = vsub.f32 %v11439_v30, %v5541_v54  ;;  %v5592_v47 = vpop.xlane.xlu0 %5591  ;;  %v5626_v30 = vsel %vm2020_vm3, %v11514_v12, 0.0 }
 0xdc8   :  { %9641 = vrcp.f32 %v5592_v47  ;;  %5612 = vadd.xlane.f32.xlu1 %v5611_v57 }
 0xdc9   :  { %9643 = vpow2.f32 %v5584_v49  ;;  %v5588_v13 = vmul.f32 1.442695, %v5557_v39 }
 0xdcb   :  { %9645 = vpow2.f32 %v5588_v13 }
 0xdcc   :  { %5618 = vadd.xlane.f32.xlu1 %v5617_v33  ;;  %5621 = vadd.xlane.f32.xlu0 %v5620_v32 }
 0xdcd   :  { %v11526_v20 = vpop.eup %9639 }
 0xdce   :  { %v5623_v51 = vsel %vm2020_vm3, %v11526_v20, 0.0 }
 0xdd0   :  { %5627 = vadd.xlane.f32.xlu0 %v5626_v30  ;;  %5633 = vadd.xlane.f32.xlu1 %v5632_v4 }
 0xdd2   :  { %v9642_v21 = vpop.eup %9641 }
 0xdd3   :  { %v5654_v31 = vmul.f32 %v9642_v21, %v11443_v19  ;;  %v11531_v0 = vpop.eup %9643 }
 0xdd4   :  { %5624 = vadd.xlane.f32.xlu1 %v5623_v51  ;;  %v5629_v44 = vsel %vm2020_vm3, %v11531_v0, 0.0 }
 0xdd5   :  { %8725 = vmatmul.mubr.msk.f32.vlgmr.msra.gmra.mrb[68].mxu0 %vm2020_vm3, %v5654_v31  ;;  %v11540_v26 = vpop.eup %9645 }
 0xdd6   :  { %8733 = vmatpush3.msra.mxu0 %v11449_v50  ;;  %8734 = vmatprep.mubr.msk.f32.mxu0 %vm9700_vm0, %v9699_v18  ;;  %v5635_v19 = vsel %vm2020_vm3, %v11540_v26, 0.0 }
 0xdd7   :  { %8742 = vmatprep.subr.mxu0 %v9699_v18 }
 0xdd8   :  { %5630 = vadd.xlane.f32.xlu1 %v5629_v44 }
 0xddc   :  { %5636 = vadd.xlane.f32.xlu1 %v5635_v19 }
 0xde6   :  { %6771 = vrot.lane.b32.xlu0 %v11228_v7, %s9701_s19 }
 0xded   :  { %6847 = vrot.lane.b32.xlu1 %v11228_v7, %s9703_s21 }
 0xe08   :  { %v5595_v50 = vpop.xlane.xlu1 %5594 }
 0xe09   :  { %9647 = vrcp.f32 %v5595_v50 }
 0xe13   :  { %v9648_v41 = vpop.eup %9647  ;;  %v5598_v28 = vpop.xlane.xlu0 %5597 }
 0xe14   :  { %v5655_v23 = vmul.f32 %v9648_v41, %v11457_v59  ;;  %9649 = vrcp.f32 %v5598_v28  ;;  %v7780_v28 = vld [vmem:[%s11979_s6 + $0x80] sm:$0xff] }
 0xe16   :  { %8730 = vmatmul.mubr.msk.f32.vlgmr.msra.gmra.mrb[88].mxu1 %vm2020_vm3, %v5655_v23  ;;  %v7781_v23 = vld [vmem:[%s11979_s6 + $0x88] sm:$0xff] }
 0xe17   :  { %8738 = vmatpush3.msra.mxu1 %v11423_v9  ;;  %8739 = vmatprep.mubr.msk.f32.mxu1 %vm9700_vm0, %v9699_v18 }
 0xe18   :  { %8747 = vmatprep.subr.mxu1 %v9699_v18  ;;  %v5610_v36 = vpop.xlane.xlu0 %5609 }
 0xe1c   :  { %v5601_v56 = vpop.xlane.xlu1 %5600 }
 0xe1d   :  { %9651 = vrcp.f32 %v5601_v56  ;;  %v7783_v56 = vld [vmem:[%s11979_s6 + $0x98] sm:$0xff] }
 0xe1e   :  { %v9650_v53 = vpop.eup %9649 }
 0xe1f   :  { %v5656_v34 = vmul.f32 %v9650_v53, %v11464_v29 }
 0xe20   :  { %v5616_v25 = vpop.xlane.xlu0 %5615 }
 0xe21   :  { %8735 = vmatmul.mubr.msk.f32.vlgmr.msra.gmra.mrb[70].mxu0 %vm2020_vm3, %v5656_v34  ;;  %v7784_v34 = vld [vmem:[%s11979_s6 + $0xa0] sm:$0xff] }
 0xe22   :  { %8743 = vmatpush3.msra.mxu0 %v11263_v22  ;;  %8744 = vmatprep.mubr.msk.f32.mxu0 %vm9700_vm0, %v9699_v18 }
 0xe23   :  { %8752 = vmatprep.subr.mxu0 %v9699_v18 }
 0xe24   :  { %v5604_v9 = vpop.xlane.xlu0 %5603 }
 0xe25   :  { %9653 = vrcp.f32 %v5604_v9 }
 0xe26   :  { %9655 = vrcp.f32 %v5610_v36  ;;  %v9306_v36 = vpack.c.bf16 %v7781_v23, %v7780_v28 }
 0xe27   :  { %v9652_v59 = vpop.eup %9651  ;;  %9657 = vrcp.f32 %v5616_v25  ;;  %v7785_v25 = vld [vmem:[%s11979_s6 + $0xa8] sm:$0xff] }
 0xe28   :  { %v5657_v14 = vmul.f32 %v9652_v59, %v11473_v27  ;;  %v9314_v9 = vpack.c.bf16 %v7785_v25, %v7784_v34 }
 0xe2a   :  { %8740 = vmatmul.mubr.msk.f32.vlgmr.msra.gmra.mrb[90].mxu1 %vm2020_vm3, %v5657_v14  ;;  %v7786_v14 = vld [vmem:[%s11979_s6 + $0xb0] sm:$0xff] }
 0xe2b   :  { %8748 = vmatpush3.msra.mxu1 %v11451_v52  ;;  %8749 = vmatprep.mubr.msk.f32.mxu1 %vm9700_vm0, %v9699_v18 }
 0xe2c   :  { %8757 = vmatprep.subr.mxu1 %v9699_v18 }
 0xe2f   :  { %v9654_v22 = vpop.eup %9653 }
 0xe30   :  { %v5658_v29 = vmul.f32 %v9654_v22, %v11481_v37  ;;  %v9656_v24 = vpop.eup %9655  ;;  %v7787_v22 = vld [vmem:[%s11979_s6 + $0xb8] sm:$0xff] }
 0xe31   :  { %v5660_v27 = vmul.f32 %v9656_v24, %v11469_v61  ;;  %v9658_v52 = vpop.eup %9657  ;;  %v9318_v24 = vpack.c.bf16 %v7787_v22, %v7786_v14 }
 0xe32   :  { %8745 = vmatmul.mubr.msk.f32.vlgmr.msra.gmra.mrb[72].mxu0 %vm2020_vm3, %v5658_v29  ;;  %v5662_v37 = vmul.f32 %v9658_v52, %v11477_v10  ;;  %v7788_v52 = vld [vmem:[%s11979_s6 + $0xc0] sm:$0xff] }
 0xe33   :  { %8753 = vmatpush3.msra.mxu0 %v11427_v58  ;;  %8754 = vmatprep.mubr.msk.f32.mxu0 %vm9700_vm0, %v9699_v18  ;;  %v6696_v58 = vpop.permute.xlu1 %6695 }
 0xe34   :  { %8762 = vmatprep.subr.mxu0 %v9699_v18 }
 0xe36   :  { %8755 = vmatmul.mubr.msk.f32.vlgmr.msra.gmra.mrb[74].mxu0 %vm2020_vm3, %v5660_v27 }
 0xe37   :  { %8763 = vmatpush3.msra.mxu0 %v11230_v15  ;;  %8764 = vmatprep.mubr.msk.f32.mxu0 %vm9700_vm0, %v9699_v18  ;;  %v6531_v15 = vpop.permute.xlu0 %6530 }
 0xe38   :  { %8772 = vmatprep.subr.mxu0 %v9699_v18 }
 0xe3a   :  { %8765 = vmatmul.mubr.msk.f32.vlgmr.msra.gmra.mrb[76].mxu0 %vm2020_vm3, %v5662_v37  ;;  %v7789_v37 = vld [vmem:[%s11979_s6 + $0xc8] sm:$0xff] }
 0xe3b   :  { %8773 = vmatpush3.msra.mxu0 %v11494_v63  ;;  %8774 = vmatprep.mubr.msk.f32.mxu0 %vm9700_vm0, %v9699_v18 }
 0xe3c   :  { %8782 = vmatprep.subr.mxu0 %v9699_v18 }
 0xe51   :  { %v5607_v61 = vpop.xlane.xlu1 %5606 }
 0xe52   :  { %9659 = vrcp.f32 %v5607_v61 }
 0xe55   :  { %v5613_v1 = vpop.xlane.xlu1 %5612 }
 0xe56   :  { %9661 = vrcp.f32 %v5613_v1 }
 0xe59   :  { %v5619_v8 = vpop.xlane.xlu1 %5618  ;;  %v5622_v48 = vpop.xlane.xlu0 %5621 }
 0xe5a   :  { %9663 = vrcp.f32 %v5619_v8  ;;  %v7790_v8 = vld [vmem:[%s11979_s6 + $0xd0] sm:$0xff] }
 0xe5b   :  { %9665 = vrcp.f32 %v5622_v48  ;;  %v7791_v48 = vld [vmem:[%s11979_s6 + $0xd8] sm:$0xff] }
 0xe5c   :  { %v9660_v10 = vpop.eup %9659 }
 0xe5d   :  { %v5659_v38 = vmul.f32 %v9660_v10, %v11498_v60  ;;  %v5634_v17 = vpop.xlane.xlu1 %5633  ;;  %v5628_v63 = vpop.xlane.xlu0 %5627 }
 0xe5e   :  { %9667 = vrcp.f32 %v5628_v63  ;;  %v7793_v63 = vld [vmem:[%s11979_s6 + $0xe8] sm:$0xff] }
 0xe5f   :  { %8750 = vmatmul.mubr.msk.f32.vlgmr.msra.gmra.mrb[92].mxu1 %vm2020_vm3, %v5659_v38  ;;  %9669 = vrcp.f32 %v5634_v17  ;;  %v9326_v38 = vpack.c.bf16 %v7791_v48, %v7790_v8  ;;  %v7792_v17 = vld [vmem:[%s11979_s6 + $0xe0] sm:$0xff] }
 0xe60   :  { %v9662_v6 = vpop.eup %9661  ;;  %8758 = vmatpush3.msra.mxu1 %v11453_v46  ;;  %8759 = vmatprep.mubr.msk.f32.mxu1 %vm9700_vm0, %v9699_v18 }
 0xe61   :  { %v5661_v49 = vmul.f32 %v9662_v6, %v11505_v43  ;;  %v5625_v54 = vpop.xlane.xlu1 %5624  ;;  %8767 = vmatprep.subr.mxu1 %v9699_v18  ;;  %v6772_v33 = vpop.permute.xlu0 %6771  ;;  %v9330_v6 = vpack.c.bf16 %v7793_v63, %v7792_v17 }
 0xe62   :  { %9671 = vrcp.f32 %v5625_v54  ;;  %v7795_v54 = vld [vmem:[%s11979_s6 + $0xf8] sm:$0xff] }
 0xe63   :  { %8760 = vmatmul.mubr.msk.f32.vlgmr.msra.gmra.mrb[94].mxu1 %vm2020_vm3, %v5661_v49  ;;  %v7794_v49 = vld [vmem:[%s11979_s6 + $0xf0] sm:$0xff] }
 0xe64   :  { %v9664_v60 = vpop.eup %9663  ;;  %8768 = vmatpush3.msra.mxu1 %v11500_v11  ;;  %8769 = vmatprep.mubr.msk.f32.mxu1 %vm9700_vm0, %v9699_v18 }
 0xe65   :  { %v9666_v39 = vpop.eup %9665  ;;  %v5663_v46 = vmul.f32 %v9664_v60, %v11507_v3  ;;  %v5631_v47 = vpop.xlane.xlu1 %5630  ;;  %8777 = vmatprep.subr.mxu1 %v9699_v18  ;;  %v9334_v60 = vpack.c.bf16 %v7795_v54, %v7794_v49 }
 0xe66   :  { %v5664_v43 = vmul.f32 %v9666_v39, %v11512_v5  ;;  %9673 = vrcp.f32 %v5631_v47 }
 0xe67   :  { %8770 = vmatmul.mubr.msk.f32.vlgmr.msra.gmra.mrb[96].mxu1 %vm2020_vm3, %v5663_v46 }
 0xe68   :  { %8775 = vmatmul.mubr.msk.f32.vlgmr.msra.gmra.mrb[78].mxu0 %vm2020_vm3, %v5664_v43  ;;  %8778 = vmatpush3.msra.mxu1 %v6531_v15  ;;  %v9668_v57 = vpop.eup %9667  ;;  %v9322_v15 = vpack.c.bf16 %v7789_v37, %v7788_v52 }
 0xe69   :  { %8783 = vmatpush3.msra.mxu0 %v11228_v7  ;;  %v5637_v11 = vpop.xlane.xlu1 %5636  ;;  %8784 = vmatprep.mubr.msk.f32.mxu0 %vm9700_vm0, %v9699_v18  ;;  %v5666_v3 = vmul.f32 %v9668_v57, %v11514_v12  ;;  %v9670_v5 = vpop.eup %9669 }
 0xe6a   :  { %9675 = vrcp.f32 %v5637_v11  ;;  %8792 = vmatprep.subr.mxu0 %v9699_v18  ;;  %8779 = vmatprep.mubr.msk.f32.mxu1 %vm9700_vm0, %v9699_v18  ;;  %v5668_v12 = vmul.f32 %v9670_v5, %v11520_v2 }
 0xe6b   :  { %8787 = vmatprep.subr.mxu1 %v9699_v18 }
 0xe6c   :  { %v9672_v13 = vpop.eup %9671  ;;  %8785 = vmatmul.mubr.msk.f32.vlgmr.msra.gmra.mrb[80].mxu0 %vm2020_vm3, %v5666_v3 }
 0xe6d   :  { %v5665_v7 = vmul.f32 %v9672_v13, %v11526_v20  ;;  %8793 = vmatpush3.msra.mxu0 %v6772_v33  ;;  %8794 = vmatprep.mubr.msk.f32.mxu0 %vm9700_vm0, %v9699_v18  ;;  %v6848_v4 = vpop.permute.xlu1 %6847 }
 0xe6e   :  { %9307 = vmatprep.subr.bf16.mxu0 %v9306_v36 }
 0xe6f   :  { %8780 = vmatmul.mubr.msk.f32.vlgmr.msra.gmra.mrb[98].mxu1 %vm2020_vm3, %v5665_v7 }
 0xe70   :  { %v9674_v32 = vpop.eup %9673  ;;  %8788 = vmatpush3.msra.mxu1 %v6696_v58  ;;  %8795 = vmatmul.mubr.msk.f32.vlgmr.msra.gmra.mrb[82].mxu0 %vm2020_vm3, %v5668_v12 }
 0xe71   :  { %v5667_v30 = vmul.f32 %v9674_v32, %v11531_v0  ;;  %8789 = vmatprep.mubr.msk.f32.mxu1 %vm9700_vm0, %v9699_v18  ;;  %8797 = vmatprep.subr.mxu1 %v9699_v18 }
 0xe72   :  { %9309 = vmatpush3.bf16.msra.mxu0 %v9306_v36 }
 0xe73   :  { %8790 = vmatmul.mubr.msk.f32.vlgmr.msra.gmra.mrb[100].mxu1 %vm2020_vm3, %v5667_v30 }
 0xe74   :  { %v9676_v20 = vpop.eup %9675  ;;  %8798 = vmatpush3.msra.mxu1 %v6848_v4  ;;  %8799 = vmatprep.mubr.msk.f32.mxu1 %vm9700_vm0, %v9699_v18 }
 0xe75   :  { %v5669_v2 = vmul.f32 %v9676_v20, %v11540_v26  ;;  %v7782_v26 = vld [vmem:[%s11979_s6 + $0x90] sm:$0xff] }
 0xe76   :  { %v9310_v53 = vpack.c.bf16 %v7783_v56, %v7782_v26 }
 0xe77   :  { %8800 = vmatmul.mubr.msk.f32.vlgmr.msra.gmra.mrb[102].mxu1 %vm2020_vm3, %v5669_v2 }
 0xe78   :  { %9311 = vmatprep.subr.bf16.mxu0 %v9310_v53 }
 0xe79   :  { %9313 = vmatpush3.bf16.msra.mxu0 %v9310_v53 }
 0xe7a   :  { %9315 = vmatprep.subr.bf16.mxu0 %v9314_v9 }
 0xe7d   :  { %9317 = vmatpush3.bf16.msra.mxu0 %v9314_v9 }
 0xe7e   :  { %9319 = vmatprep.subr.bf16.mxu0 %v9318_v24 }
 0xe81   :  { %9321 = vmatpush3.bf16.msra.mxu0 %v9318_v24 }
 0xe82   :  { %9323 = vmatprep.subr.bf16.mxu0 %v9322_v15 }
 0xe85   :  { %9325 = vmatpush3.bf16.msra.mxu0 %v9322_v15 }
 0xe86   :  { %9327 = vmatprep.subr.bf16.mxu0 %v9326_v38 }
 0xe89   :  { %9329 = vmatpush3.bf16.msra.mxu0 %v9326_v38 }
 0xe8a   :  { %9331 = vmatprep.subr.bf16.mxu0 %v9330_v6 }
 0xe8d   :  { %9333 = vmatpush3.bf16.msra.mxu0 %v9330_v6 }
 0xe8e   :  { %9335 = vmatprep.subr.bf16.mxu0 %v9334_v60 }
 0xe91   :  { %9337 = vmatpush3.bf16.msra.mxu0 %v9334_v60 }
 0xea8   :  { %v11624_v21 = vpop.f32.mrb[68].mxu0 }
 0xea9   :  { %v8726_v31 = vpop.f32.mrb[69].mxu0 }
 0xee9   :  { %v5816_v51 = vpop.f32.mrb[88].mxu1 }
 0xeea   :  { %v8731_v0 = vpop.f32.mrb[89].mxu1 }
 0xef4   :  { %v5892_v44 = vpop.f32.mrb[70].mxu0 }
 0xef5   :  { %v8736_v19 = vpop.f32.mrb[71].mxu0 }
 0xefd   :  { %v5968_v50 = vpop.f32.mrb[90].mxu1 }
 0xefe   :  { %v8741_v41 = vpop.f32.mrb[91].mxu1 }
 0xf05   :  { %v11644_v59 = vpop.f32.mrb[72].mxu0 }
 0xf06   :  { %v8746_v29 = vpop.f32.mrb[73].mxu0 }
 0xf09   :  { %v6209_v27 = vpop.f32.mrb[74].mxu0 }
 0xf0a   :  { %v9492_v58 = vpack.i.bf16 %v6209_v27, %v5892_v44  ;;  %v8756_v61 = vpop.f32.mrb[75].mxu0 }
 0xf0c   :  { %9493 = vrot.lane.b32.xlu1 %v9492_v58, %s9701_s19 }
 0xf0d   :  { %v11659_v1 = vpop.f32.mrb[76].mxu0 }
 0xf0e   :  { %v8766_v10 = vpop.f32.mrb[77].mxu0 }
 0xf32   :  { %v6133_v39 = vpop.f32.mrb[92].mxu1 }
 0xf33   :  { %v9487_v46 = vpack.i.bf16 %v6133_v39, %v5816_v51  ;;  %v8751_v47 = vpop.f32.mrb[93].mxu1 }
 0xf35   :  { %9488 = vrot.lane.b32.xlu0 %v9487_v46, %s9703_s21 }
 0xf36   :  { %v6285_v43 = vpop.f32.mrb[94].mxu1 }
 0xf37   :  { %v9497_v57 = vpack.i.bf16 %v6285_v43, %v5968_v50  ;;  %v8761_v11 = vpop.f32.mrb[95].mxu1 }
 0xf39   :  { %9498 = vrot.lane.b32.xlu0 %v9497_v57, %s9702_s0 }
 0xf3a   :  { %v6450_v3 = vpop.f32.mrb[96].mxu1 }
 0xf3b   :  { %v6526_v5 = vpop.f32.mrb[78].mxu0  ;;  %v8771_v13 = vpop.f32.mrb[97].mxu1 }
 0xf3c   :  { %v8776_v33 = vpop.f32.mrb[79].mxu0 }
 0xf3f   :  { %v6690_v7 = vpop.f32.mrb[80].mxu0 }
 0xf40   :  { %v8786_v12 = vpop.f32.mrb[81].mxu0 }
 0xf42   :  { %v6602_v32 = vpop.f32.mrb[98].mxu1 }
 0xf43   :  { %v6843_v30 = vpop.f32.mrb[82].mxu0  ;;  %v8781_v4 = vpop.f32.mrb[99].mxu1 }
 0xf44   :  { %v9507_v20 = vpack.i.bf16 %v6843_v30, %v6526_v5  ;;  %v8796_v2 = vpop.f32.mrb[83].mxu0  ;;  %v7801_v30 = vld [vmem:[%s11981_s8 + $0x98] sm:$0xff] }
 0xf45   :  { %v7803_v2 = vld [vmem:[%s11981_s8 + $0xa8] sm:$0xff] }
 0xf46   :  { %9508 = vrot.lane.b32.xlu0 %v9507_v20, %s9701_s19  ;;  %v6767_v31 = vpop.f32.mrb[100].mxu1 }
 0xf47   :  { %v9502_v51 = vpack.i.bf16 %v6767_v31, %v6450_v3  ;;  %v8791_v0 = vpop.f32.mrb[101].mxu1 }
 0xf48   :  { %v7804_v0 = vld [vmem:[%s11981_s8 + $0xb0] sm:$0xff] }
 0xf49   :  { %9503 = vrot.lane.b32.xlu1 %v9502_v51, %s9703_s21 }
 0xf4a   :  { %v6919_v44 = vpop.f32.mrb[102].mxu1 }
 0xf4b   :  { %v9512_v19 = vpack.i.bf16 %v6919_v44, %v6602_v32  ;;  %v8801_v50 = vpop.f32.mrb[103].mxu1  ;;  %v7800_v32 = vld [vmem:[%s11981_s8 + $0x90] sm:$0xff]  ;;  %v7805_v44 = vld [vmem:[%s11981_s8 + $0xb8] sm:$0xff] }
 0xf4c   :  { %v9342_v20 = vpack.c.bf16 %v7801_v30, %v7800_v32  ;;  %v7806_v50 = vld [vmem:[%s11981_s8 + $0xc0] sm:$0xff] }
 0xf4d   :  { %9513 = vrot.lane.b32.xlu1 %v9512_v19, %s9702_s0  ;;  %v9350_v19 = vpack.c.bf16 %v7805_v44, %v7804_v0 }
 0xf7e   :  { %v9494_v28 = vpop.permute.xlu1 %9493 }
 0xf7f   :  { %v9496_v53 = vunpack.i.h.bf16 %v9494_v28  ;;  %v9495_v34 = vunpack.i.l.bf16 %v9494_v28 }
 0xfa7   :  { %v9489_v41 = vpop.permute.xlu0 %9488 }
 0xfa8   :  { %v9491_v23 = vunpack.i.h.bf16 %v9489_v41  ;;  %v9490_v26 = vunpack.i.l.bf16 %v9489_v41  ;;  %v7807_v41 = vld [vmem:[%s11981_s8 + $0xc8] sm:$0xff] }
 0xfa9   :  { %v9354_v28 = vpack.c.bf16 %v7807_v41, %v7806_v50 }
 0xfaa   :  { %v6301_v36 = vsel %vm747_vm1, %v11644_v59, %v9491_v23  ;;  %v5984_v56 = vsel %vm747_vm1, %v11624_v21, %v9490_v26  ;;  %v7808_v23 = vld [vmem:[%s11981_s8 + $0xd0] sm:$0xff]  ;;  %v7809_v26 = vld [vmem:[%s11981_s8 + $0xd8] sm:$0xff] }
 0xfab   :  { %v9499_v25 = vpop.permute.xlu0 %9498  ;;  %v5985_v22 = vsel %vm2512_vm4, %v5984_v56, %v9495_v34  ;;  %v6302_v29 = vsel %vm2512_vm4, %v6301_v36, %v9496_v53  ;;  %v9358_v36 = vpack.c.bf16 %v7809_v26, %v7808_v23  ;;  %v7810_v56 = vld [vmem:[%s11981_s8 + $0xe0] sm:$0xff]  ;;  %v7811_v53 = vld [vmem:[%s11981_s8 + $0xe8] sm:$0xff] }
 0xfac   :  { %v9501_v9 = vunpack.i.h.bf16 %v9499_v25  ;;  %v9500_v14 = vunpack.i.l.bf16 %v9499_v25  ;;  %v9362_v34 = vpack.c.bf16 %v7811_v53, %v7810_v56  ;;  %v7812_v25 = vld [vmem:[%s11981_s8 + $0xf0] sm:$0xff]  ;;  %v7816_v26 = vld [vmem:[%s11982_s10 + $0x80] sm:$0xff] }
 0xfad   :  { %v7818_v53 = vld [vmem:[%s11982_s10 + $0x90] sm:$0xff] }
 0xfae   :  { %v5986_v24 = vsel %vm2514_vm5, %v5985_v22, %v9500_v14  ;;  %v6303_v27 = vsel %vm2514_vm5, %v6302_v29, %v9501_v9  ;;  %v7813_v9 = vld [vmem:[%s11981_s8 + $0xf8] sm:$0xff] }
 0xfaf   :  { %8834 = vmatprep.mubr.f32.mxu0 %v5986_v24  ;;  %v9366_v14 = vpack.c.bf16 %v7813_v9, %v7812_v25  ;;  %v7820_v9 = vld [vmem:[%s11982_s10 + $0xa0] sm:$0xff] }
 0xfb0   :  { %8835 = vmatmul.mubr.f32.vlgmr.msra.gmra.mrb[84].mxu0 %v6303_v27 }
 0xfb8   :  { %v9509_v59 = vpop.permute.xlu0 %9508 }
 0xfb9   :  { %v9511_v15 = vunpack.i.h.bf16 %v9509_v59  ;;  %v9510_v8 = vunpack.i.l.bf16 %v9509_v59 }
 0xfbb   :  { %v9504_v52 = vpop.permute.xlu1 %9503 }
 0xfbc   :  { %v9506_v37 = vunpack.i.h.bf16 %v9504_v52  ;;  %v9505_v58 = vunpack.i.l.bf16 %v9504_v52 }
 0xfbe   :  { %v6618_v21 = vsel %vm747_vm1, %v11659_v1, %v9505_v58  ;;  %v6935_v61 = vsel %vm747_vm1, %v6690_v7, %v9506_v37  ;;  %v7797_v1 = vld [vmem:[%s11980_s7 + $0x1] ss:$0 sm:$0xff] }
 0xfbf   :  { %v9514_v48 = vpop.permute.xlu1 %9513  ;;  %v6619_v17 = vsel %vm2512_vm4, %v6618_v21, %v9510_v8  ;;  %v6936_v63 = vsel %vm2512_vm4, %v6935_v61, %v9511_v15 }
 0xfc0   :  { %v9516_v10 = vunpack.i.h.bf16 %v9514_v48  ;;  %v9515_v38 = vunpack.i.l.bf16 %v9514_v48 }
 0xfc2   :  { %v6620_v6 = vsel %vm2514_vm5, %v6619_v17, %v9515_v38  ;;  %v6937_v49 = vsel %vm2514_vm5, %v6936_v63, %v9516_v10 }
 0xfc3   :  { %8837 = vmatprep.mubr.f32.mxu0 %v6620_v6 }
 0xfc4   :  { %8838 = vmatmul.mubr.f32.gmra.mrb[86].mxu0 %v6937_v49 }
0x1083   :  { %v8836_v54 = vpop.f32.mrb[84].mxu0 }
0x1084   :  { %v7041_v60 = vadd.f32 %v8836_v54, %v11041_v55  ;;  %v7021_v39 = vpop.f32.mrb[85].mxu0  ;;  %v7799_v55 = vld [vmem:[%s11981_s8 + $0x88] sm:$0xff] }
0x1085   :  { %v7040_v46 = vadd.f32 %v7021_v39, %v11039_v35  ;;  %v7798_v35 = vld [vmem:[%s11981_s8 + $0x80] sm:$0xff] }
0x1086   :  { %v11704_v47 = vadd.f32 %v7797_v1, %v7041_v60  ;;  %v9338_v5 = vpack.c.bf16 %v7799_v55, %v7798_v35  ;;  %v9698_v60 = vld [vmem:[%s11977_s3 + $0x4] sm:$0xf] }
0x1087   :  { %v11706_v43 = vadd.f32 %v7797_v1, %v7040_v46  ;;  %v7111_v39 = vrot.slane %v9698_v60, %v10395_v62  ;;  %v7119_v30 = vrot.slane %v9698_v60, %v3645_v40 }
0x1088   :  { %7058 = vadd.xlane.f32.xlu1 %v11704_v47  ;;  %v7065_v57 = vmul.f32 %v11704_v47, %v11704_v47  ;;  %9339 = vmatprep.subr.bf16.mxu1 %v9338_v5 }
0x1089   :  { %7056 = vadd.xlane.f32.xlu0 %v11706_v43  ;;  %v7064_v11 = vmul.f32 %v11706_v43, %v11706_v43  ;;  %9341 = vmatpush3.bf16.msra.mxu1 %v9338_v5 }
0x108a   :  { %9343 = vmatprep.subr.bf16.mxu1 %v9342_v20 }
0x108d   :  { %7070 = vadd.xlane.f32.xlu0 %v7065_v57  ;;  %9345 = vmatpush3.bf16.msra.mxu1 %v9342_v20 }
0x1091   :  { %7068 = vadd.xlane.f32.xlu0 %v7064_v11 }
0x1097   :  { %v8839_v3 = vpop.f32.mrb[86].mxu0 }
0x1098   :  { %v7043_v13 = vadd.f32 %v8839_v3, %v11089_v45  ;;  %v7031_v33 = vpop.f32.mrb[87].mxu0  ;;  %v7802_v45 = vld [vmem:[%s11981_s8 + $0xa0] sm:$0xff] }
0x1099   :  { %v7042_v7 = vadd.f32 %v7031_v33, %v11087_v16  ;;  %v9346_v51 = vpack.c.bf16 %v7803_v2, %v7802_v45 }
0x109a   :  { %v11722_v12 = vadd.f32 %v7797_v1, %v7043_v13 }
0x109b   :  { %v11730_v4 = vadd.f32 %v7797_v1, %v7042_v7  ;;  %9347 = vmatprep.subr.bf16.mxu1 %v9346_v51 }
0x109c   :  { %7062 = vadd.xlane.f32.xlu1 %v11722_v12  ;;  %v7067_v16 = vmul.f32 %v11722_v12, %v11722_v12  ;;  %9349 = vmatpush3.bf16.msra.mxu1 %v9346_v51 }
0x109d   :  { %7060 = vadd.xlane.f32.xlu0 %v11730_v4  ;;  %v7066_v31 = vmul.f32 %v11730_v4, %v11730_v4  ;;  %9351 = vmatprep.subr.bf16.mxu1 %v9350_v19 }
0x10a0   :  { %7074 = vadd.xlane.f32.xlu1 %v7067_v16  ;;  %9353 = vmatpush3.bf16.msra.mxu1 %v9350_v19 }
0x10a1   :  { %7072 = vadd.xlane.f32.xlu0 %v7066_v31  ;;  %9355 = vmatprep.subr.bf16.mxu1 %v9354_v28 }
0x10a4   :  { %9357 = vmatpush3.bf16.msra.mxu1 %v9354_v28 }
0x10a5   :  { %9359 = vmatprep.subr.bf16.mxu1 %v9358_v36 }
0x10a8   :  { %9361 = vmatpush3.bf16.msra.mxu1 %v9358_v36  ;;  %v7817_v36 = vld [vmem:[%s11982_s10 + $0x88] sm:$0xff] }
0x10a9   :  { %9363 = vmatprep.subr.bf16.mxu1 %v9362_v34  ;;  %v9370_v56 = vpack.c.bf16 %v7817_v36, %v7816_v26 }
0x10ab   :  { %9371 = vmatprep.subr.bf16.mxu0 %v9370_v56 }
0x10ac   :  { %9365 = vmatpush3.bf16.msra.mxu1 %v9362_v34  ;;  %9373 = vmatpush3.bf16.msra.mxu0 %v9370_v56  ;;  %v7819_v34 = vld [vmem:[%s11982_s10 + $0x98] sm:$0xff] }
0x10ad   :  { %9367 = vmatprep.subr.bf16.mxu1 %v9366_v14  ;;  %v9374_v25 = vpack.c.bf16 %v7819_v34, %v7818_v53 }
0x10af   :  { %9375 = vmatprep.subr.bf16.mxu0 %v9374_v25 }
0x10b0   :  { %9369 = vmatpush3.bf16.msra.mxu1 %v9366_v14  ;;  %9377 = vmatpush3.bf16.msra.mxu0 %v9374_v25  ;;  %v7821_v14 = vld [vmem:[%s11982_s10 + $0xa8] sm:$0xff] }
0x1115   :  { %v7059_v22 = vpop.xlane.xlu1 %7058 }
0x1116   :  { %v7057_v29 = vpop.xlane.xlu0 %7056  ;;  %v7077_v24 = vmul.f32 0.015625, %v7059_v22  ;;  %v9378_v22 = vpack.c.bf16 %v7821_v14, %v7820_v9 }
0x1117   :  { %v7076_v59 = vmul.f32 0.015625, %v7057_v29  ;;  %v7822_v29 = vld [vmem:[%s11982_s10 + $0xb0] sm:$0xff] }
0x1118   :  { %v7085_v52 = vmul.f32 %v7077_v24, %v7077_v24  ;;  %v7093_v49 = vsub.f32 %v11704_v47, %v7077_v24  ;;  %9379 = vmatprep.subr.bf16.mxu0 %v9378_v22  ;;  %v7823_v24 = vld [vmem:[%s11982_s10 + $0xb8] sm:$0xff] }
0x1119   :  { %v7084_v61 = vmul.f32 %v7076_v59, %v7076_v59  ;;  %v7092_v57 = vsub.f32 %v11706_v43, %v7076_v59  ;;  %9381 = vmatpush3.bf16.msra.mxu0 %v9378_v22  ;;  %v7825_v59 = vld [vmem:[%s11982_s10 + $0xc8] sm:$0xff] }
0x111a   :  { %v7071_v27 = vpop.xlane.xlu0 %7070 }
0x111b   :  { %v7081_v37 = vmul.f32 0.015625, %v7071_v27  ;;  %v9382_v27 = vpack.c.bf16 %v7823_v24, %v7822_v29  ;;  %v9705_v24 = vmov 0.0|0.0  }
0x111c   :  { %9402 = vmatprep.subr.bf16.mxu1 %v9705_v24 }
0x111d   :  { %v7089_v58 = vsub.f32 %v7081_v37, %v7085_v52  ;;  %9383 = vmatprep.subr.bf16.mxu0 %v9382_v27  ;;  %v7824_v52 = vld [vmem:[%s11982_s10 + $0xc0] sm:$0xff] }
0x111e   :  { %v7069_v21 = vpop.xlane.xlu0 %7068  ;;  %9385 = vmatpush3.bf16.msra.mxu0 %v9382_v27  ;;  %v9386_v37 = vpack.c.bf16 %v7825_v59, %v7824_v52  ;;  %v7431_v27 = vld [vmem:[%s11985_s13] sm:$0xff]  ;;  %v7432_v52 = vld [vmem:[%s11985_s13 + $0x8] sm:$0xff]  ;;  %v7433_v59 = vld [vmem:[%s11985_s13 + $0x10] sm:$0xff] }
0x111f   :  { %v7097_v15 = vadd.f32 1e-06, %v7089_v58  ;;  %v7080_v8 = vmul.f32 0.015625, %v7069_v21  ;;  %v7826_v58 = vld [vmem:[%s11982_s10 + $0xd0] sm:$0xff]  ;;  %v7827_v21 = vld [vmem:[%s11982_s10 + $0xd8] sm:$0xff] }
0x1120   :  { %9387 = vmatprep.subr.bf16.mxu0 %v9386_v37 }
0x1121   :  { %9677 = vrsqrt.f32 %v7097_v15  ;;  %v7088_v48 = vsub.f32 %v7080_v8, %v7084_v61  ;;  %v9390_v61 = vpack.c.bf16 %v7827_v21, %v7826_v58  ;;  %v7828_v15 = vld [vmem:[%s11982_s10 + $0xe0] sm:$0xff]  ;;  %v7829_v8 = vld [vmem:[%s11982_s10 + $0xe8] sm:$0xff] }
0x1122   :  { %9389 = vmatpush3.bf16.msra.mxu0 %v9386_v37  ;;  %v9403_v37 = vpack.c.bf16 %v7432_v52, %v7431_v27  ;;  %v7535_v27 = vld [vmem:[%s11986_s15 + $0x10] sm:$0xff]  ;;  %v7536_v52 = vld [vmem:[%s11986_s15 + $0x18] sm:$0xff] }
0x1123   :  { %v7096_v10 = vadd.f32 1e-06, %v7088_v48  ;;  %9391 = vmatprep.subr.bf16.mxu0 %v9390_v61  ;;  %v9394_v48 = vpack.c.bf16 %v7829_v8, %v7828_v15 }
0x1125   :  { %9679 = vrsqrt.f32 %v7096_v10  ;;  %v7830_v10 = vld [vmem:[%s11982_s10 + $0xf0] sm:$0xff] }
0x1126   :  { %9393 = vmatpush3.bf16.msra.mxu0 %v9390_v61  ;;  %v7833_v61 = vld [vmem:[%s11984_s11 + $0x1] ss:$0 sm:$0xff] }
0x1127   :  { %9395 = vmatprep.subr.bf16.mxu0 %v9394_v48 }
0x1129   :  { %v7063_v38 = vpop.xlane.xlu1 %7062 }
0x112a   :  { %v7079_v17 = vmul.f32 0.015625, %v7063_v38  ;;  %v7061_v63 = vpop.xlane.xlu0 %7060  ;;  %9397 = vmatpush3.bf16.msra.mxu0 %v9394_v48  ;;  %v7831_v38 = vld [vmem:[%s11982_s10 + $0xf8] sm:$0xff] }
0x112b   :  { %v9678_v6 = vpop.eup %9677  ;;  %v7078_v54 = vmul.f32 0.015625, %v7061_v63  ;;  %v7815_v63 = vld [vmem:[%s11983_s9 + $0x1] ss:$0 sm:$0xff] }
0x112c   :  { %v7105_v46 = vmul.f32 %v9678_v6, %v7093_v49  ;;  %v7087_v11 = vmul.f32 %v7079_v17, %v7079_v17  ;;  %v7095_v51 = vsub.f32 %v11722_v12, %v7079_v17  ;;  %v9398_v17 = vpack.c.bf16 %v7831_v38, %v7830_v10 }
0x112d   :  { %v7075_v1 = vpop.xlane.xlu1 %7074  ;;  %v7086_v5 = vmul.f32 %v7078_v54, %v7078_v54  ;;  %v7094_v44 = vsub.f32 %v11730_v4, %v7078_v54 }
0x112e   :  { %v7083_v35 = vmul.f32 0.015625, %v7075_v1  ;;  %v7073_v55 = vpop.xlane.xlu0 %7072  ;;  %v7113_v20 = vmul.f32 %v7111_v39, %v7105_v46  ;;  %9399 = vmatprep.subr.bf16.mxu0 %v9398_v17 }
0x112f   :  { %v9680_v3 = vpop.eup %9679  ;;  %v7082_v13 = vmul.f32 0.015625, %v7073_v55  ;;  %9401 = vmatpush3.bf16.msra.mxu0 %v9398_v17 }
0x1130   :  { %v7091_v33 = vsub.f32 %v7083_v35, %v7087_v11  ;;  %v7104_v7 = vmul.f32 %v9680_v3, %v7092_v57  ;;  %v7121_v31 = vadd.f32 %v7119_v30, %v7113_v20  ;;  %9426 = vmatprep.subr.bf16.mxu0 %v9705_v24 }
0x1131   :  { %v7090_v32 = vsub.f32 %v7082_v13, %v7086_v5 }
0x1132   :  { %v7099_v16 = vadd.f32 1e-06, %v7091_v33  ;;  %v7112_v45 = vmul.f32 %v7111_v39, %v7104_v7 }
0x1133   :  { %v7098_v2 = vadd.f32 1e-06, %v7090_v32 }
0x1134   :  { %9681 = vrsqrt.f32 %v7099_v16  ;;  %v7120_v62 = vadd.f32 %v7119_v30, %v7112_v45 }
0x1135   :  { %9683 = vrsqrt.f32 %v7098_v2 }
0x1136   :  { %8872 = vmatprep.mubr.f32.mxu1 %v7120_v62 }
0x1137   :  { %8873 = vmatmul.mubr.f32.vlgmr.msra.gmra.mrb[104].mxu1 %v7121_v31 }
0x1138   :  { %9404 = vmatpush3.bf16.msra.mxu1 %v9403_v37  ;;  %v7537_v37 = vld [vmem:[%s11986_s15 + $0x20] sm:$0xff] }
0x1139   :  { %9405 = vmatprep.subr.bf16.mxu1 %v9705_v24 }
0x113e   :  { %v9682_v0 = vpop.eup %9681 }
0x113f   :  { %v9684_v19 = vpop.eup %9683  ;;  %v7107_v50 = vmul.f32 %v9682_v0, %v7095_v51 }
0x1140   :  { %v7106_v41 = vmul.f32 %v9684_v19, %v7094_v44 }
0x1141   :  { %v7115_v42 = vmul.f32 %v7111_v39, %v7107_v50 }
0x1142   :  { %v7114_v40 = vmul.f32 %v7111_v39, %v7106_v41 }
0x1143   :  { %v7123_v23 = vadd.f32 %v7119_v30, %v7115_v42 }
0x1144   :  { %v7122_v28 = vadd.f32 %v7119_v30, %v7114_v40 }
0x1146   :  { %8875 = vmatprep.mubr.f32.mxu1 %v7122_v28 }
0x1147   :  { %8876 = vmatmul.mubr.f32.gmra.mrb[106].mxu1 %v7123_v23 }
0x1148   :  { %8948 = vmatprep.mubr.msk.f32.mxu1 %vm9700_vm0, %v9699_v18 }
0x120a   :  { %v8874_v6 = vpop.f32.mrb[104].mxu1 }
0x120b   :  { %v7221_v49 = vadd.f32 %v8874_v6, %v7815_v63  ;;  %v7215_v54 = vpop.f32.mrb[105].mxu1 }
0x120c   :  { %v7216_v1 = vadd.f32 %v7815_v63, %v7215_v54 }
0x120d   :  { %v7235_v60 = vmul.f32 %v7221_v49, %v7221_v49 }
0x120e   :  { %v7234_v39 = vmul.f32 %v7216_v1, %v7216_v1 }
0x120f   :  { %v7239_v46 = vmul.f32 %v7235_v60, %v7221_v49 }
0x1210   :  { %v7238_v57 = vmul.f32 %v7234_v39, %v7216_v1 }
0x1211   :  { %v7243_v11 = vmul.f32 0.044715, %v7239_v46 }
0x1212   :  { %v7242_v35 = vmul.f32 0.044715, %v7238_v57 }
0x1213   :  { %v7247_v55 = vadd.f32 %v7243_v11, %v7221_v49 }
0x1214   :  { %v7246_v3 = vadd.f32 %v7242_v35, %v7216_v1 }
0x1215   :  { %v7251_v5 = vmul.f32 0.7978846, %v7247_v55 }
0x1216   :  { %v7250_v13 = vmul.f32 0.7978846, %v7246_v3 }
0x1217   :  { %9685 = vtanh.f32 %v7251_v5  ;;  %v7437_v5 = vld [vmem:[%s11985_s13 + $0x30] sm:$0xff] }
0x1218   :  { %9687 = vtanh.f32 %v7250_v13  ;;  %v7438_v13 = vld [vmem:[%s11985_s13 + $0x38] sm:$0xff] }
0x121a   :  { %v8877_v33 = vpop.f32.mrb[106].mxu1 }
0x121b   :  { %v7231_v7 = vadd.f32 %v8877_v33, %v7815_v63  ;;  %v7225_v32 = vpop.f32.mrb[107].mxu1  ;;  %v9412_v33 = vpack.c.bf16 %v7438_v13, %v7437_v5 }
0x121c   :  { %v7226_v30 = vadd.f32 %v7815_v63, %v7225_v32  ;;  %v7440_v32 = vld [vmem:[%s11985_s13 + $0x48] sm:$0xff] }
0x121d   :  { %v7237_v20 = vmul.f32 %v7231_v7, %v7231_v7 }
0x121e   :  { %v7236_v16 = vmul.f32 %v7226_v30, %v7226_v30 }
0x121f   :  { %v7241_v45 = vmul.f32 %v7237_v20, %v7231_v7  ;;  %v7441_v20 = vld [vmem:[%s11985_s13 + $0x50] sm:$0xff] }
0x1220   :  { %v7240_v2 = vmul.f32 %v7236_v16, %v7226_v30  ;;  %v7442_v16 = vld [vmem:[%s11985_s13 + $0x58] sm:$0xff] }
0x1221   :  { %v9686_v62 = vpop.eup %9685  ;;  %v7245_v31 = vmul.f32 0.044715, %v7241_v45  ;;  %v9418_v45 = vpack.c.bf16 %v7442_v16, %v7441_v20 }
0x1222   :  { %v9688_v51 = vpop.eup %9687  ;;  %v7259_v0 = vadd.f32 1.0, %v9686_v62  ;;  %v7244_v44 = vmul.f32 0.044715, %v7240_v2  ;;  %v7443_v2 = vld [vmem:[%s11985_s13 + $0x60] sm:$0xff]  ;;  %v7444_v62 = vld [vmem:[%s11985_s13 + $0x68] sm:$0xff] }
0x1223   :  { %v7249_v19 = vadd.f32 %v7245_v31, %v7231_v7  ;;  %v7258_v50 = vadd.f32 1.0, %v9688_v51  ;;  %v9421_v31 = vpack.c.bf16 %v7444_v62, %v7443_v2  ;;  %v7445_v51 = vld [vmem:[%s11985_s13 + $0x70] sm:$0xff] }
0x1224   :  { %v7263_v41 = vmul.f32 0.5, %v7259_v0  ;;  %v7248_v42 = vadd.f32 %v7244_v44, %v7226_v30  ;;  %v7446_v0 = vld [vmem:[%s11985_s13 + $0x78] sm:$0xff] }
0x1225   :  { %v7253_v40 = vmul.f32 0.7978846, %v7249_v19  ;;  %v7262_v28 = vmul.f32 0.5, %v7258_v50  ;;  %v9424_v44 = vpack.c.bf16 %v7446_v0, %v7445_v51  ;;  %v7533_v19 = vld [vmem:[%s11986_s15] sm:$0xff]  ;;  %v7534_v50 = vld [vmem:[%s11986_s15 + $0x8] sm:$0xff] }
0x1226   :  { %v7252_v23 = vmul.f32 0.7978846, %v7248_v42  ;;  %v7267_v36 = vmul.f32 %v7263_v41, %v7221_v49  ;;  %v9427_v41 = vpack.c.bf16 %v7534_v50, %v7533_v19 }
0x1227   :  { %v7266_v26 = vmul.f32 %v7262_v28, %v7216_v1  ;;  %9689 = vtanh.f32 %v7253_v40 }
0x1228   :  { %9691 = vtanh.f32 %v7252_v23 }
0x1229   :  { %8910 = vmatprep.mubr.f32.mxu0 %v7266_v26 }
0x122a   :  { %8911 = vmatmul.mubr.f32.vlgmr.msra.gmra.mrb[88].mxu0 %v7267_v36 }
0x122b   :  { %9428 = vmatpush3.bf16.msra.mxu0 %v9427_v41 }
0x122c   :  { %9429 = vmatprep.subr.bf16.mxu0 %v9705_v24 }
0x1231   :  { %v9690_v56 = vpop.eup %9689 }
0x1232   :  { %v9692_v53 = vpop.eup %9691  ;;  %v7261_v34 = vadd.f32 1.0, %v9690_v56 }
0x1233   :  { %v7260_v25 = vadd.f32 1.0, %v9692_v53 }
0x1234   :  { %v7265_v9 = vmul.f32 0.5, %v7261_v34 }
0x1235   :  { %v7264_v14 = vmul.f32 0.5, %v7260_v25  ;;  %v7834_v25 = vld [vmem:[%s11987_s12] ss:$0 sm:$0xff] }
0x1236   :  { %v7269_v29 = vmul.f32 %v7265_v9, %v7231_v7  ;;  %v7439_v7 = vld [vmem:[%s11985_s13 + $0x40] sm:$0xff] }
0x1237   :  { %v7268_v22 = vmul.f32 %v7264_v14, %v7226_v30  ;;  %v9415_v30 = vpack.c.bf16 %v7440_v32, %v7439_v7  ;;  %v7835_v14 = vld [vmem:[%s11987_s12 + $0x1] ss:$0 sm:$0xff] }
0x1239   :  { %8913 = vmatprep.mubr.f32.mxu0 %v7268_v22 }
0x123a   :  { %8914 = vmatmul.mubr.f32.gmra.mrb[90].mxu0 %v7269_v29 }
0x123b   :  { %8983 = vmatprep.mubr.msk.f32.mxu0 %vm9700_vm0, %v9699_v18  ;;  %v7434_v18 = vld [vmem:[%s11985_s13 + $0x18] sm:$0xff] }
0x123c   :  { %v9406_v58 = vpack.c.bf16 %v7434_v18, %v7433_v59  ;;  %v9430_v59 = vpack.c.bf16 %v7536_v52, %v7535_v27  ;;  %v7538_v18 = vld [vmem:[%s11986_s15 + $0x28] sm:$0xff] }
0x123e   :  { %9407 = vmatpush3.bf16.msra.mxu1 %v9406_v58  ;;  %9431 = vmatpush3.bf16.msra.mxu0 %v9430_v59  ;;  %v9433_v58 = vpack.c.bf16 %v7538_v18, %v7537_v37 }
0x123f   :  { %9408 = vmatprep.subr.bf16.mxu1 %v9705_v24  ;;  %9432 = vmatprep.subr.bf16.mxu0 %v9705_v24 }
0x1242   :  { %9434 = vmatpush3.bf16.msra.mxu0 %v9433_v58 }
0x1243   :  { %9435 = vmatprep.subr.bf16.mxu0 %v9705_v24 }
0x12fd   :  { %v8912_v21 = vpop.f32.mrb[88].mxu0 }
0x12fe   :  { %v7373_v15 = vadd.f32 %v8912_v21, %v11704_v47  ;;  %v7353_v8 = vpop.f32.mrb[89].mxu0  ;;  %v7539_v21 = vld [vmem:[%s11986_s15 + $0x30] sm:$0xff] }
0x12ff   :  { %v7372_v48 = vadd.f32 %v7353_v8, %v11706_v43  ;;  %v7541_v8 = vld [vmem:[%s11986_s15 + $0x40] sm:$0xff] }
0x1300   :  { %v7385_v10 = vadd.f32 %v7833_v61, %v7373_v15 }
0x1301   :  { %v7384_v38 = vadd.f32 %v7833_v61, %v7372_v48  ;;  %v7542_v48 = vld [vmem:[%s11986_s15 + $0x48] sm:$0xff] }
0x1302   :  { %v7389_v17 = vrot.slane %v7385_v10, 7  ;;  %v9439_v10 = vpack.c.bf16 %v7542_v48, %v7541_v8 }
0x1304   :  { %v7398_v63 = vsel %vm7397_vm6, %v7384_v38, %v7389_v17  ;;  %v7543_v38 = vld [vmem:[%s11986_s15 + $0x50] sm:$0xff]  ;;  %v7544_v17 = vld [vmem:[%s11986_s15 + $0x58] sm:$0xff] }
0x130d   :  { %v8915_v6 = vpop.f32.mrb[90].mxu0 }
0x130e   :  { %v7375_v49 = vadd.f32 %v8915_v6, %v11722_v12  ;;  %v7363_v54 = vpop.f32.mrb[91].mxu0  ;;  %v7435_v12 = vld [vmem:[%s11985_s13 + $0x20] sm:$0xff] }
0x130f   :  { %v7374_v1 = vadd.f32 %v7363_v54, %v11730_v4  ;;  %v7436_v4 = vld [vmem:[%s11985_s13 + $0x28] sm:$0xff]  ;;  %v7545_v6 = vld [vmem:[%s11986_s15 + $0x60] sm:$0xff] }
0x1310   :  { %v7387_v60 = vadd.f32 %v7833_v61, %v7375_v49  ;;  %v9409_v3 = vpack.c.bf16 %v7436_v4, %v7435_v12  ;;  %v7546_v49 = vld [vmem:[%s11986_s15 + $0x68] sm:$0xff] }
0x1311   :  { %v7386_v39 = vadd.f32 %v7833_v61, %v7374_v1  ;;  %v7540_v61 = vld [vmem:[%s11986_s15 + $0x38] sm:$0xff]  ;;  %v9445_v54 = vpack.c.bf16 %v7546_v49, %v7545_v6  ;;  %v7547_v1 = vld [vmem:[%s11986_s15 + $0x70] sm:$0xff] }
0x1312   :  { %v7395_v47 = vrot.slane %v7387_v60, 5  ;;  %9410 = vmatpush3.bf16.msra.mxu1 %v9409_v3  ;;  %v9436_v15 = vpack.c.bf16 %v7540_v61, %v7539_v21  ;;  %v7548_v60 = vld [vmem:[%s11986_s15 + $0x78] sm:$0xff] }
0x1313   :  { %v7392_v46 = vrot.slane %v7386_v39, 6  ;;  %9411 = vmatprep.subr.bf16.mxu1 %v9705_v24  ;;  %v9448_v39 = vpack.c.bf16 %v7548_v60, %v7547_v1 }
0x1314   :  { %9437 = vmatpush3.bf16.msra.mxu0 %v9436_v15 }
0x1315   :  { %v7400_v57 = vsel %vm7399_vm7, %v7398_v63, %v7392_v46  ;;  %9438 = vmatprep.subr.bf16.mxu0 %v9705_v24  ;;  %v9442_v63 = vpack.c.bf16 %v7544_v17, %v7543_v38  ;;  %v7836_v46 = vld [vmem:[%s11988_s14] ss:$0 sm:$0xff] }
0x1316   :  { %v7402_v43 = vsel %vm7401_vm8, %v7400_v57, %v7395_v47  ;;  %9413 = vmatpush3.bf16.msra.mxu1 %v9412_v33  ;;  %v7837_v33 = vld [vmem:[%s11989_s16] ss:$0 sm:$0xff] }
0x1317   :  { %v7406_v11 = vsel %vm7405_vm9, %v7402_v43, 0.0  ;;  %v7409_v35 = vmul.f32 %v7402_v43, %v7402_v43  ;;  %9414 = vmatprep.subr.bf16.mxu1 %v9705_v24 }
0x1318   :  { %7407 = vadd.xlane.f32.xlu0 %v7406_v11  ;;  %9440 = vmatpush3.bf16.msra.mxu0 %v9439_v10 }
0x1319   :  { %v7410_v55 = vsel %vm7405_vm9, %v7409_v35, 0.0  ;;  %9441 = vmatprep.subr.bf16.mxu0 %v9705_v24 }
0x131a   :  { %7411 = vadd.xlane.f32.xlu1 %v7410_v55  ;;  %9416 = vmatpush3.bf16.msra.mxu1 %v9415_v30 }
0x131b   :  { %9417 = vmatprep.subr.bf16.mxu1 %v9705_v24 }
0x131c   :  { %9443 = vmatpush3.bf16.msra.mxu0 %v9442_v63 }
0x131d   :  { %9444 = vmatprep.subr.bf16.mxu0 %v9705_v24 }
0x131e   :  { %9419 = vmatpush3.bf16.msra.mxu1 %v9418_v45 }
0x131f   :  { %9420 = vmatprep.subr.bf16.mxu1 %v9705_v24 }
0x1320   :  { %9446 = vmatpush3.bf16.msra.mxu0 %v9445_v54 }
0x1321   :  { %9447 = vmatprep.subr.bf16.mxu0 %v9705_v24 }
0x1322   :  { %9422 = vmatpush3.bf16.msra.mxu1 %v9421_v31 }
0x1323   :  { %9423 = vmatprep.subr.bf16.mxu1 %v9705_v24 }
0x1324   :  { %9449 = vmatpush3.bf16.msra.mxu0 %v9448_v39 }
0x1326   :  { %9425 = vmatpush3.bf16.msra.mxu1 %v9424_v44 }
0x13a5   :  { %v7408_v42 = vpop.xlane.xlu0 %7407 }
0x13a6   :  { %v7413_v40 = vmul.f32 0.015625, %v7408_v42 }
0x13a7   :  { %v7412_v28 = vpop.xlane.xlu1 %7411 }
0x13a8   :  { %v7415_v23 = vmul.f32 %v7413_v40, %v7413_v40  ;;  %v7414_v26 = vmul.f32 0.015625, %v7412_v28  ;;  %v7417_v53 = vsub.f32 %v7402_v43, %v7413_v40 }
0x13aa   :  { %v7416_v36 = vsub.f32 %v7414_v26, %v7415_v23 }
0x13ac   :  { %v7418_v56 = vadd.f32 1e-06, %v7416_v36 }
0x13ae   :  { %9693 = vrsqrt.f32 %v7418_v56 }
0x13b8   :  { %v9694_v34 = vpop.eup %9693 }
0x13b9   :  { %v7420_v9 = vmul.f32 %v9694_v34, %v7417_v53 }
0x13bb   :  { %v7425_v22 = vmul.f32 %v7834_v25, %v7420_v9 }
0x13bd   :  { %v7430_v29 = vadd.f32 %v7835_v14, %v7425_v22 }
0x13bf   :  { %8949 = vmatmul.mubr.f32.vlgmr.msra.gmra.mrb[108].mxu1 %v7430_v29 }
0x1492   :  { %v7520_v47 = vpop.f32.mrb[108].mxu1 }
0x1493   :  { %v7521_v57 = vadd.f32 %v7836_v46, %v7520_v47  ;;  %v8950_v43 = vpop.f32.mrb[109].mxu1 }
0x1495   :  { %v7524_v11 = vmul.f32 %v7521_v57, %v7521_v57 }
0x1497   :  { %v7525_v35 = vmul.f32 %v7524_v11, %v7521_v57 }
0x1499   :  { %v7526_v24 = vmul.f32 0.044715, %v7525_v35 }
0x149b   :  { %v7527_v55 = vadd.f32 %v7526_v24, %v7521_v57 }
0x149d   :  { %v7528_v12 = vmul.f32 0.7978846, %v7527_v55 }
0x149f   :  { %9695 = vtanh.f32 %v7528_v12 }
0x14a9   :  { %v9696_v4 = vpop.eup %9695 }
0x14aa   :  { %v7530_v3 = vadd.f32 1.0, %v9696_v4 }
0x14ac   :  { %v7531_v5 = vmul.f32 0.5, %v7530_v3 }
0x14ae   :  { %v7532_v13 = vmul.f32 %v7531_v5, %v7521_v57 }
0x14b0   :  { %8984 = vmatmul.mubr.f32.vlgmr.msra.gmra.mrb[92].mxu0 %v7532_v13 }
0x1583   :  { %v7622_v7 = vpop.f32.mrb[92].mxu0 }
0x1584   :  { %v7623_v32 = vadd.f32 %v7837_v33, %v7622_v7  ;;  %v8985_v30 = vpop.f32.mrb[93].mxu0 }
0x1586   :  { %7626 = vst [vmem:[%s11990_s17] sm:$0xf] %v7623_v32 }

</bundles_post_ra>
